<compile_context>
chip_gen: v7x
topology: tpu7x:2x2x1
jax: 0.10.0
libtpu: 0.0.40
codegen_flags: <defaults>
</compile_context>

<pallas_src>
import functools

import jax
import jax.numpy as jnp
import numpy as np
from jax.experimental import pallas as pl
from jax.experimental.pallas import tpu as pltpu


# ----------------------------------------------------------------------------
# Fused SPPF kernel: cv1 -> 3x maxpool(5,1,'same') -> (concat-free) cv2
# ----------------------------------------------------------------------------
def _sppf_fused_kernel(x_ref, w1_ref, b1_ref, w2_ref, b2_ref, o_ref,
                       pad_ref, hmax_ref, *, H, W, c_, c2):
    HW = H * W
    neg_inf = jnp.float32(-jnp.inf)

    # -inf frame for 'same' padding of the 5x5 pool; interior is overwritten
    # by every pool call, border stays -inf.  Cheap: VMEM-only store.
    pad_ref[...] = jnp.full(pad_ref.shape, neg_inf, jnp.float32)

    # --- cv1: 1x1 conv as matmul (+ folded BN bias) + SiLU -------------------
    x = x_ref[0].astype(jnp.float32)                       # (H, W, C1)
    xf = x.reshape(HW, x.shape[-1])                        # (HW, C1)
    z1 = jnp.dot(xf, w1_ref[...], preferred_element_type=jnp.float32) + b1_ref[...]
    y = z1 * jax.nn.sigmoid(z1)                            # y1 flat: (HW, c_)

    # --- cv2 accumulation, interleaved with the 3 chained 5x5 max pools ------
    # (replaces torch.cat: w2 is pre-split into 4 row chunks, one per y_i)
    acc = jnp.dot(y, w2_ref[0], preferred_element_type=jnp.float32)   # (HW, c2)

    def pool(img):                                         # (H, W, c_) -> same
        # place image in the -inf padded scratch
        pad_ref[2:2 + H, 2:2 + W, :] = img
        # max over the 5-wide H window: leading-dim address-offset reads
        m = pad_ref[0:H, :, :]
        for d in range(1, 5):
            m = jnp.maximum(m, pad_ref[d:d + H, :, :])
        # stash so the W-direction shifts are ref reads (not live-value slices)
        hmax_ref[...] = m                                  # (H, W+4, c_); W borders stay -inf
        out = hmax_ref[:, 0:W, :]
        for d in range(1, 5):
            out = jnp.maximum(out, hmax_ref[:, d:d + W, :])
        return out

    img = y.reshape(H, W, c_)                              # y1 as an image
    for j in range(1, 4):                                  # y2, y3, y4
        img = pool(img)
        acc = acc + jnp.dot(img.reshape(HW, c_), w2_ref[j],
                            preferred_element_type=jnp.float32)

    z2 = acc + b2_ref[...]                                 # folded BN bias
    out = z2 * jax.nn.sigmoid(z2)                          # SiLU
    o_ref[...] = out.astype(o_ref.dtype).reshape(1, H, W, c2)


# ----------------------------------------------------------------------------
# Parameter construction (deterministic) and BN folding (eval-mode semantics)
# ----------------------------------------------------------------------------
def fold_bn(gamma, beta, mean, var, eps=1e-5):
    scale = gamma / jnp.sqrt(var + eps)
    bias = beta - mean * scale
    return scale.reshape(1, -1), bias.reshape(1, -1)


def make_sppf_params(key, c1, c2):
    c_ = c1 // 2
    ks = jax.random.split(key, 10)
    # cv1: Conv2d(c1, c_, 1) weight (c_, c1, 1, 1) -> matmul form (c1, c_)
    w1 = jax.random.normal(ks[0], (c1, c_), jnp.float32) * 0.1
    g1 = jax.random.uniform(ks[1], (c_,), jnp.float32, 0.5, 1.5)
    b1 = jax.random.normal(ks[2], (c_,), jnp.float32) * 0.1
    m1 = jax.random.normal(ks[3], (c_,), jnp.float32) * 0.1
    v1 = jax.random.uniform(ks[4], (c_,), jnp.float32, 0.5, 1.5)
    # cv2: Conv2d(4*c_, c2, 1) weight (c2, 4*c_, 1, 1) -> matmul form (4*c_, c2)
    w2 = jax.random.normal(ks[5], (4 * c_, c2), jnp.float32) * 0.1
    g2 = jax.random.uniform(ks[6], (c2,), jnp.float32, 0.5, 1.5)
    b2 = jax.random.normal(ks[7], (c2,), jnp.float32) * 0.1
    m2 = jax.random.normal(ks[8], (c2,), jnp.float32) * 0.1
    v2 = jax.random.uniform(ks[9], (c2,), jnp.float32, 0.5, 1.5)
    s1, bb1 = fold_bn(g1, b1, m1, v1)
    s2, bb2 = fold_bn(g2, b2, m2, v2)
    return dict(w1=w1, s1=s1, b1=bb1, w2=w2, s2=s2, b2=bb2, c_=c_, c2=c2)


# ----------------------------------------------------------------------------
# SPPF forward (public interface NCHW, matching PyTorch)
# ----------------------------------------------------------------------------
def sppf_forward(x_nchw, params):
    x = jnp.transpose(x_nchw, (0, 2, 3, 1))                # NCHW -> NHWC (C on lanes)
    N, H, W, C1 = x.shape
    c_, c2 = params["c_"], params["c2"]

    # Fold BN scale into the weights (removes a per-tile VPU mul and one DMA'd
    # operand inside the kernel); split w2 row-wise for the concat-free cv2.
    w1f = params["w1"] * params["s1"]                      # (C1, c_)
    b1 = params["b1"]                                      # (1, c_)
    w2f = (params["w2"] * params["s2"]).reshape(4, c_, c2) # (4, c_, c2)
    b2 = params["b2"]                                      # (1, c2)

    kernel = functools.partial(_sppf_fused_kernel, H=H, W=W, c_=c_, c2=c2)
    out = pl.pallas_call(
        kernel,
        out_shape=jax.ShapeDtypeStruct((N, H, W, c2), x.dtype),
        grid=(N,),
        in_specs=[
            pl.BlockSpec((1, H, W, C1), lambda n: (n, 0, 0, 0)),
            pl.BlockSpec((C1, c_), lambda n: (0, 0)),
            pl.BlockSpec((1, c_), lambda n: (0, 0)),
            pl.BlockSpec((4, c_, c2), lambda n: (0, 0, 0)),
            pl.BlockSpec((1, c2), lambda n: (0, 0)),
        ],
        out_specs=pl.BlockSpec((1, H, W, c2), lambda n: (n, 0, 0, 0)),
        scratch_shapes=[
            pltpu.VMEM((H + 4, W + 4, c_), jnp.float32),   # -inf padded image
            pltpu.VMEM((H, W + 4, c_), jnp.float32),       # H-direction max
        ],
        compiler_params=pltpu.CompilerParams(dimension_semantics=("parallel",)),
    )(x, w1f, b1, w2f, b2)
    return jnp.transpose(out, (0, 3, 1, 2))                # NHWC -> NCHW


# ----------------------------------------------------------------------------
# Pure-JAX reference (original, un-fused math) for the correctness check
# ----------------------------------------------------------------------------
def _ref_maxpool5(x):  # x: NHWC
    xp = jnp.pad(x, ((0, 0), (2, 2), (2, 2), (0, 0)), constant_values=-jnp.inf)
    return jax.lax.reduce_window(xp, -jnp.inf, jax.lax.max,
                                 (1, 5, 5, 1), (1, 1, 1, 1), "VALID")


def sppf_reference(x_nchw, params):
    x = jnp.transpose(x_nchw, (0, 2, 3, 1))

    def pw(v, w, s, b):
        z = jnp.einsum("nhwc,cd->nhwd", v, w) * s.reshape(1, 1, 1, -1) + b.reshape(1, 1, 1, -1)
        return z * jax.nn.sigmoid(z)

    y1 = pw(x, params["w1"], params["s1"], params["b1"])
    y2 = _ref_maxpool5(y1)
    y3 = _ref_maxpool5(y2)
    y4 = _ref_maxpool5(y3)
    cat = jnp.concatenate([y1, y2, y3, y4], axis=-1)
    out = pw(cat, params["w2"], params["s2"], params["b2"])
    return jnp.transpose(out, (0, 3, 1, 2))


if __name__ == "__main__":
    key = jax.random.PRNGKey(0)
    k_x, k_p = jax.random.split(key)

    N, C1, H, W = 2, 4, 16, 16   # c1=4 -> c_=2
    C2 = 8
    x = jax.random.normal(k_x, (N, C1, H, W), jnp.float32)
    params = make_sppf_params(k_p, C1, C2)

    out = jax.block_until_ready(sppf_forward(x, params))
    assert out.shape == (N, C2, H, W), out.shape

    ref = jax.block_until_ready(sppf_reference(x, params))
    np.testing.assert_allclose(np.asarray(out), np.asarray(ref), rtol=1e-5, atol=1e-5)

    print("KERNEL_OK")
</pallas_src>

<mosaic_0001>
module attributes {stable_mosaic.version = 11 : i64} {
  func.func @_sppf_fused_kernel(%arg0: i32, %arg1: memref<1x16x16x4xf32, #tpu.memory_space<vmem>>, %arg2: memref<4x2xf32, #tpu.memory_space<vmem>>, %arg3: memref<1x2xf32, #tpu.memory_space<vmem>>, %arg4: memref<4x2x8xf32, #tpu.memory_space<vmem>>, %arg5: memref<1x8xf32, #tpu.memory_space<vmem>>, %arg6: memref<1x16x16x8xf32, #tpu.memory_space<vmem>>, %arg7: memref<20x20x2xf32, #tpu.memory_space<vmem>>, %arg8: memref<16x20x2xf32, #tpu.memory_space<vmem>>) attributes {dimension_semantics = [#tpu.dimension_semantics<parallel>], iteration_bounds = array<i64: 2>, scalar_prefetch = 0 : i64, scratch_operands = 2 : i64, tpu.core_type = #tpu.core_type<tc>, window_params = [{transform_indices = @transform_0, window_bounds = array<i64: 1, 16, 16, 4>}, {pipeline_mode = #tpu.pipeline_mode<synchronous>, transform_indices = @transform_1, window_bounds = array<i64: 4, 2>}, {pipeline_mode = #tpu.pipeline_mode<synchronous>, transform_indices = @transform_2, window_bounds = array<i64: 1, 2>}, {pipeline_mode = #tpu.pipeline_mode<synchronous>, transform_indices = @transform_3, window_bounds = array<i64: 4, 2, 8>}, {pipeline_mode = #tpu.pipeline_mode<synchronous>, transform_indices = @transform_4, window_bounds = array<i64: 1, 8>}, {transform_indices = @transform_5, window_bounds = array<i64: 1, 16, 16, 8>}]} {
    %cst = arith.constant 0xFF800000 : f32
    %0 = vector.broadcast %cst : f32 to vector<20x20x2xf32>
    %c0 = arith.constant 0 : index
    %c0_0 = arith.constant 0 : index
    %c0_1 = arith.constant 0 : index
    %1 = vector.load %arg7[%c0, %c0_0, %c0_1] : memref<20x20x2xf32, #tpu.memory_space<vmem>>, vector<20x20x2xf32>
    tpu.vector_store %arg7[%c0, %c0_0, %c0_1], %0 {strides = array<i32>} : memref<20x20x2xf32, #tpu.memory_space<vmem>>, vector<20x20x2xf32>,
    %c0_2 = arith.constant 0 : index
    %c0_3 = arith.constant 0 : index
    %c0_4 = arith.constant 0 : index
    %c0_5 = arith.constant 0 : index
    %2 = vector.load %arg1[%c0_2, %c0_3, %c0_4, %c0_5] : memref<1x16x16x4xf32, #tpu.memory_space<vmem>>, vector<1x16x16x4xf32>
    %3 = vector.shape_cast %2 : vector<1x16x16x4xf32> to vector<16x16x4xf32>
    %4 = vector.shape_cast %3 : vector<16x16x4xf32> to vector<256x4xf32>
    %c0_6 = arith.constant 0 : index
    %c0_7 = arith.constant 0 : index
    %5 = vector.load %arg2[%c0_6, %c0_7] : memref<4x2xf32, #tpu.memory_space<vmem>>, vector<4x2xf32>
    %cst_8 = arith.constant dense<0.000000e+00> : vector<256x2xf32>
    %6 = tpu.matmul %4, %5, %cst_8 {dimension_numbers = #tpu.dot_dimension_numbers<[1], [0], [0], [1], [0, 0, 1, 1], [], []>} : vector<256x4xf32>, vector<4x2xf32>, vector<256x2xf32> -> vector<256x2xf32>
    %c0_9 = arith.constant 0 : index
    %c0_10 = arith.constant 0 : index
    %7 = vector.load %arg3[%c0_9, %c0_10] : memref<1x2xf32, #tpu.memory_space<vmem>>, vector<1x2xf32>
    %8 = vector.broadcast %7 : vector<1x2xf32> to vector<256x2xf32>
    %9 = arith.addf %6, %8 : vector<256x2xf32>
    %10 = arith.negf %9 : vector<256x2xf32>
    %11 = math.exp %10 : vector<256x2xf32>
    %cst_11 = arith.constant 1.000000e+00 : f32
    %12 = vector.broadcast %cst_11 : f32 to vector<256x2xf32>
    %13 = arith.addf %12, %11 : vector<256x2xf32>
    %14 = arith.divf %12, %13 : vector<256x2xf32>
    %15 = arith.mulf %9, %14 : vector<256x2xf32>
    %c0_12 = arith.constant 0 : index
    %c0_13 = arith.constant 0 : index
    %c0_14 = arith.constant 0 : index
    %16 = vector.load %arg4[%c0_12, %c0_13, %c0_14] : memref<4x2x8xf32, #tpu.memory_space<vmem>>, vector<1x2x8xf32>
    %17 = vector.shape_cast %16 : vector<1x2x8xf32> to vector<2x8xf32>
    %cst_15 = arith.constant dense<0.000000e+00> : vector<256x8xf32>
    %18 = tpu.matmul %15, %17, %cst_15 {dimension_numbers = #tpu.dot_dimension_numbers<[1], [0], [0], [1], [0, 0, 1, 1], [], []>} : vector<256x2xf32>, vector<2x8xf32>, vector<256x8xf32> -> vector<256x8xf32>
    %19 = vector.shape_cast %15 : vector<256x2xf32> to vector<16x16x2xf32>
    %c2 = arith.constant 2 : index
    %c2_16 = arith.constant 2 : index
    %c0_17 = arith.constant 0 : index
    %20 = vector.load %arg7[%c2, %c2_16, %c0_17] : memref<20x20x2xf32, #tpu.memory_space<vmem>>, vector<16x16x2xf32>
    tpu.vector_store %arg7[%c2, %c2_16, %c0_17], %19 {strides = array<i32>} : memref<20x20x2xf32, #tpu.memory_space<vmem>>, vector<16x16x2xf32>,
    %c0_18 = arith.constant 0 : index
    %c0_19 = arith.constant 0 : index
    %c0_20 = arith.constant 0 : index
    %21 = vector.load %arg7[%c0_18, %c0_19, %c0_20] : memref<20x20x2xf32, #tpu.memory_space<vmem>>, vector<16x20x2xf32>
    %c1 = arith.constant 1 : index
    %c0_21 = arith.constant 0 : index
    %c0_22 = arith.constant 0 : index
    %22 = vector.load %arg7[%c1, %c0_21, %c0_22] : memref<20x20x2xf32, #tpu.memory_space<vmem>>, vector<16x20x2xf32>
    %23 = arith.maximumf %21, %22 : vector<16x20x2xf32>
    %c2_23 = arith.constant 2 : index
    %c0_24 = arith.constant 0 : index
    %c0_25 = arith.constant 0 : index
    %24 = vector.load %arg7[%c2_23, %c0_24, %c0_25] : memref<20x20x2xf32, #tpu.memory_space<vmem>>, vector<16x20x2xf32>
    %25 = arith.maximumf %23, %24 : vector<16x20x2xf32>
    %c3 = arith.constant 3 : index
    %c0_26 = arith.constant 0 : index
    %c0_27 = arith.constant 0 : index
    %26 = vector.load %arg7[%c3, %c0_26, %c0_27] : memref<20x20x2xf32, #tpu.memory_space<vmem>>, vector<16x20x2xf32>
    %27 = arith.maximumf %25, %26 : vector<16x20x2xf32>
    %c4 = arith.constant 4 : index
    %c0_28 = arith.constant 0 : index
    %c0_29 = arith.constant 0 : index
    %28 = vector.load %arg7[%c4, %c0_28, %c0_29] : memref<20x20x2xf32, #tpu.memory_space<vmem>>, vector<16x20x2xf32>
    %29 = arith.maximumf %27, %28 : vector<16x20x2xf32>
    %c0_30 = arith.constant 0 : index
    %c0_31 = arith.constant 0 : index
    %c0_32 = arith.constant 0 : index
    %30 = vector.load %arg8[%c0_30, %c0_31, %c0_32] : memref<16x20x2xf32, #tpu.memory_space<vmem>>, vector<16x20x2xf32>
    tpu.vector_store %arg8[%c0_30, %c0_31, %c0_32], %29 {strides = array<i32>} : memref<16x20x2xf32, #tpu.memory_space<vmem>>, vector<16x20x2xf32>,
    %c0_33 = arith.constant 0 : index
    %c0_34 = arith.constant 0 : index
    %c0_35 = arith.constant 0 : index
    %31 = vector.load %arg8[%c0_33, %c0_34, %c0_35] : memref<16x20x2xf32, #tpu.memory_space<vmem>>, vector<16x16x2xf32>
    %c0_36 = arith.constant 0 : index
    %c1_37 = arith.constant 1 : index
    %c0_38 = arith.constant 0 : index
    %32 = vector.load %arg8[%c0_36, %c1_37, %c0_38] : memref<16x20x2xf32, #tpu.memory_space<vmem>>, vector<16x16x2xf32>
    %33 = arith.maximumf %31, %32 : vector<16x16x2xf32>
    %c0_39 = arith.constant 0 : index
    %c2_40 = arith.constant 2 : index
    %c0_41 = arith.constant 0 : index
    %34 = vector.load %arg8[%c0_39, %c2_40, %c0_41] : memref<16x20x2xf32, #tpu.memory_space<vmem>>, vector<16x16x2xf32>
    %35 = arith.maximumf %33, %34 : vector<16x16x2xf32>
    %c0_42 = arith.constant 0 : index
    %c3_43 = arith.constant 3 : index
    %c0_44 = arith.constant 0 : index
    %36 = vector.load %arg8[%c0_42, %c3_43, %c0_44] : memref<16x20x2xf32, #tpu.memory_space<vmem>>, vector<16x16x2xf32>
    %37 = arith.maximumf %35, %36 : vector<16x16x2xf32>
    %c0_45 = arith.constant 0 : index
    %c4_46 = arith.constant 4 : index
    %c0_47 = arith.constant 0 : index
    %38 = vector.load %arg8[%c0_45, %c4_46, %c0_47] : memref<16x20x2xf32, #tpu.memory_space<vmem>>, vector<16x16x2xf32>
    %39 = arith.maximumf %37, %38 : vector<16x16x2xf32>
    %40 = vector.shape_cast %39 : vector<16x16x2xf32> to vector<256x2xf32>
    %c1_48 = arith.constant 1 : index
    %c0_49 = arith.constant 0 : index
    %c0_50 = arith.constant 0 : index
    %41 = vector.load %arg4[%c1_48, %c0_49, %c0_50] : memref<4x2x8xf32, #tpu.memory_space<vmem>>, vector<1x2x8xf32>
    %42 = vector.shape_cast %41 : vector<1x2x8xf32> to vector<2x8xf32>
    %cst_51 = arith.constant dense<0.000000e+00> : vector<256x8xf32>
    %43 = tpu.matmul %40, %42, %cst_51 {dimension_numbers = #tpu.dot_dimension_numbers<[1], [0], [0], [1], [0, 0, 1, 1], [], []>} : vector<256x2xf32>, vector<2x8xf32>, vector<256x8xf32> -> vector<256x8xf32>
    %44 = arith.addf %18, %43 : vector<256x8xf32>
    %c2_52 = arith.constant 2 : index
    %c2_53 = arith.constant 2 : index
    %c0_54 = arith.constant 0 : index
    %45 = vector.load %arg7[%c2_52, %c2_53, %c0_54] : memref<20x20x2xf32, #tpu.memory_space<vmem>>, vector<16x16x2xf32>
    tpu.vector_store %arg7[%c2_52, %c2_53, %c0_54], %39 {strides = array<i32>} : memref<20x20x2xf32, #tpu.memory_space<vmem>>, vector<16x16x2xf32>,
    %c0_55 = arith.constant 0 : index
    %c0_56 = arith.constant 0 : index
    %c0_57 = arith.constant 0 : index
    %46 = vector.load %arg7[%c0_55, %c0_56, %c0_57] : memref<20x20x2xf32, #tpu.memory_space<vmem>>, vector<16x20x2xf32>
    %c1_58 = arith.constant 1 : index
    %c0_59 = arith.constant 0 : index
    %c0_60 = arith.constant 0 : index
    %47 = vector.load %arg7[%c1_58, %c0_59, %c0_60] : memref<20x20x2xf32, #tpu.memory_space<vmem>>, vector<16x20x2xf32>
    %48 = arith.maximumf %46, %47 : vector<16x20x2xf32>
    %c2_61 = arith.constant 2 : index
    %c0_62 = arith.constant 0 : index
    %c0_63 = arith.constant 0 : index
    %49 = vector.load %arg7[%c2_61, %c0_62, %c0_63] : memref<20x20x2xf32, #tpu.memory_space<vmem>>, vector<16x20x2xf32>
    %50 = arith.maximumf %48, %49 : vector<16x20x2xf32>
    %c3_64 = arith.constant 3 : index
    %c0_65 = arith.constant 0 : index
    %c0_66 = arith.constant 0 : index
    %51 = vector.load %arg7[%c3_64, %c0_65, %c0_66] : memref<20x20x2xf32, #tpu.memory_space<vmem>>, vector<16x20x2xf32>
    %52 = arith.maximumf %50, %51 : vector<16x20x2xf32>
    %c4_67 = arith.constant 4 : index
    %c0_68 = arith.constant 0 : index
    %c0_69 = arith.constant 0 : index
    %53 = vector.load %arg7[%c4_67, %c0_68, %c0_69] : memref<20x20x2xf32, #tpu.memory_space<vmem>>, vector<16x20x2xf32>
    %54 = arith.maximumf %52, %53 : vector<16x20x2xf32>
    %c0_70 = arith.constant 0 : index
    %c0_71 = arith.constant 0 : index
    %c0_72 = arith.constant 0 : index
    %55 = vector.load %arg8[%c0_70, %c0_71, %c0_72] : memref<16x20x2xf32, #tpu.memory_space<vmem>>, vector<16x20x2xf32>
    tpu.vector_store %arg8[%c0_70, %c0_71, %c0_72], %54 {strides = array<i32>} : memref<16x20x2xf32, #tpu.memory_space<vmem>>, vector<16x20x2xf32>,
    %c0_73 = arith.constant 0 : index
    %c0_74 = arith.constant 0 : index
    %c0_75 = arith.constant 0 : index
    %56 = vector.load %arg8[%c0_73, %c0_74, %c0_75] : memref<16x20x2xf32, #tpu.memory_space<vmem>>, vector<16x16x2xf32>
    %c0_76 = arith.constant 0 : index
    %c1_77 = arith.constant 1 : index
    %c0_78 = arith.constant 0 : index
    %57 = vector.load %arg8[%c0_76, %c1_77, %c0_78] : memref<16x20x2xf32, #tpu.memory_space<vmem>>, vector<16x16x2xf32>
    %58 = arith.maximumf %56, %57 : vector<16x16x2xf32>
    %c0_79 = arith.constant 0 : index
    %c2_80 = arith.constant 2 : index
    %c0_81 = arith.constant 0 : index
    %59 = vector.load %arg8[%c0_79, %c2_80, %c0_81] : memref<16x20x2xf32, #tpu.memory_space<vmem>>, vector<16x16x2xf32>
    %60 = arith.maximumf %58, %59 : vector<16x16x2xf32>
    %c0_82 = arith.constant 0 : index
    %c3_83 = arith.constant 3 : index
    %c0_84 = arith.constant 0 : index
    %61 = vector.load %arg8[%c0_82, %c3_83, %c0_84] : memref<16x20x2xf32, #tpu.memory_space<vmem>>, vector<16x16x2xf32>
    %62 = arith.maximumf %60, %61 : vector<16x16x2xf32>
    %c0_85 = arith.constant 0 : index
    %c4_86 = arith.constant 4 : index
    %c0_87 = arith.constant 0 : index
    %63 = vector.load %arg8[%c0_85, %c4_86, %c0_87] : memref<16x20x2xf32, #tpu.memory_space<vmem>>, vector<16x16x2xf32>
    %64 = arith.maximumf %62, %63 : vector<16x16x2xf32>
    %65 = vector.shape_cast %64 : vector<16x16x2xf32> to vector<256x2xf32>
    %c2_88 = arith.constant 2 : index
    %c0_89 = arith.constant 0 : index
    %c0_90 = arith.constant 0 : index
    %66 = vector.load %arg4[%c2_88, %c0_89, %c0_90] : memref<4x2x8xf32, #tpu.memory_space<vmem>>, vector<1x2x8xf32>
    %67 = vector.shape_cast %66 : vector<1x2x8xf32> to vector<2x8xf32>
    %cst_91 = arith.constant dense<0.000000e+00> : vector<256x8xf32>
    %68 = tpu.matmul %65, %67, %cst_91 {dimension_numbers = #tpu.dot_dimension_numbers<[1], [0], [0], [1], [0, 0, 1, 1], [], []>} : vector<256x2xf32>, vector<2x8xf32>, vector<256x8xf32> -> vector<256x8xf32>
    %69 = arith.addf %44, %68 : vector<256x8xf32>
    %c2_92 = arith.constant 2 : index
    %c2_93 = arith.constant 2 : index
    %c0_94 = arith.constant 0 : index
    %70 = vector.load %arg7[%c2_92, %c2_93, %c0_94] : memref<20x20x2xf32, #tpu.memory_space<vmem>>, vector<16x16x2xf32>
    tpu.vector_store %arg7[%c2_92, %c2_93, %c0_94], %64 {strides = array<i32>} : memref<20x20x2xf32, #tpu.memory_space<vmem>>, vector<16x16x2xf32>,
    %c0_95 = arith.constant 0 : index
    %c0_96 = arith.constant 0 : index
    %c0_97 = arith.constant 0 : index
    %71 = vector.load %arg7[%c0_95, %c0_96, %c0_97] : memref<20x20x2xf32, #tpu.memory_space<vmem>>, vector<16x20x2xf32>
    %c1_98 = arith.constant 1 : index
    %c0_99 = arith.constant 0 : index
    %c0_100 = arith.constant 0 : index
    %72 = vector.load %arg7[%c1_98, %c0_99, %c0_100] : memref<20x20x2xf32, #tpu.memory_space<vmem>>, vector<16x20x2xf32>
    %73 = arith.maximumf %71, %72 : vector<16x20x2xf32>
    %c2_101 = arith.constant 2 : index
    %c0_102 = arith.constant 0 : index
    %c0_103 = arith.constant 0 : index
    %74 = vector.load %arg7[%c2_101, %c0_102, %c0_103] : memref<20x20x2xf32, #tpu.memory_space<vmem>>, vector<16x20x2xf32>
    %75 = arith.maximumf %73, %74 : vector<16x20x2xf32>
    %c3_104 = arith.constant 3 : index
    %c0_105 = arith.constant 0 : index
    %c0_106 = arith.constant 0 : index
    %76 = vector.load %arg7[%c3_104, %c0_105, %c0_106] : memref<20x20x2xf32, #tpu.memory_space<vmem>>, vector<16x20x2xf32>
    %77 = arith.maximumf %75, %76 : vector<16x20x2xf32>
    %c4_107 = arith.constant 4 : index
    %c0_108 = arith.constant 0 : index
    %c0_109 = arith.constant 0 : index
    %78 = vector.load %arg7[%c4_107, %c0_108, %c0_109] : memref<20x20x2xf32, #tpu.memory_space<vmem>>, vector<16x20x2xf32>
    %79 = arith.maximumf %77, %78 : vector<16x20x2xf32>
    %c0_110 = arith.constant 0 : index
    %c0_111 = arith.constant 0 : index
    %c0_112 = arith.constant 0 : index
    %80 = vector.load %arg8[%c0_110, %c0_111, %c0_112] : memref<16x20x2xf32, #tpu.memory_space<vmem>>, vector<16x20x2xf32>
    tpu.vector_store %arg8[%c0_110, %c0_111, %c0_112], %79 {strides = array<i32>} : memref<16x20x2xf32, #tpu.memory_space<vmem>>, vector<16x20x2xf32>,
    %c0_113 = arith.constant 0 : index
    %c0_114 = arith.constant 0 : index
    %c0_115 = arith.constant 0 : index
    %81 = vector.load %arg8[%c0_113, %c0_114, %c0_115] : memref<16x20x2xf32, #tpu.memory_space<vmem>>, vector<16x16x2xf32>
    %c0_116 = arith.constant 0 : index
    %c1_117 = arith.constant 1 : index
    %c0_118 = arith.constant 0 : index
    %82 = vector.load %arg8[%c0_116, %c1_117, %c0_118] : memref<16x20x2xf32, #tpu.memory_space<vmem>>, vector<16x16x2xf32>
    %83 = arith.maximumf %81, %82 : vector<16x16x2xf32>
    %c0_119 = arith.constant 0 : index
    %c2_120 = arith.constant 2 : index
    %c0_121 = arith.constant 0 : index
    %84 = vector.load %arg8[%c0_119, %c2_120, %c0_121] : memref<16x20x2xf32, #tpu.memory_space<vmem>>, vector<16x16x2xf32>
    %85 = arith.maximumf %83, %84 : vector<16x16x2xf32>
    %c0_122 = arith.constant 0 : index
    %c3_123 = arith.constant 3 : index
    %c0_124 = arith.constant 0 : index
    %86 = vector.load %arg8[%c0_122, %c3_123, %c0_124] : memref<16x20x2xf32, #tpu.memory_space<vmem>>, vector<16x16x2xf32>
    %87 = arith.maximumf %85, %86 : vector<16x16x2xf32>
    %c0_125 = arith.constant 0 : index
    %c4_126 = arith.constant 4 : index
    %c0_127 = arith.constant 0 : index
    %88 = vector.load %arg8[%c0_125, %c4_126, %c0_127] : memref<16x20x2xf32, #tpu.memory_space<vmem>>, vector<16x16x2xf32>
    %89 = arith.maximumf %87, %88 : vector<16x16x2xf32>
    %90 = vector.shape_cast %89 : vector<16x16x2xf32> to vector<256x2xf32>
    %c3_128 = arith.constant 3 : index
    %c0_129 = arith.constant 0 : index
    %c0_130 = arith.constant 0 : index
    %91 = vector.load %arg4[%c3_128, %c0_129, %c0_130] : memref<4x2x8xf32, #tpu.memory_space<vmem>>, vector<1x2x8xf32>
    %92 = vector.shape_cast %91 : vector<1x2x8xf32> to vector<2x8xf32>
    %cst_131 = arith.constant dense<0.000000e+00> : vector<256x8xf32>
    %93 = tpu.matmul %90, %92, %cst_131 {dimension_numbers = #tpu.dot_dimension_numbers<[1], [0], [0], [1], [0, 0, 1, 1], [], []>} : vector<256x2xf32>, vector<2x8xf32>, vector<256x8xf32> -> vector<256x8xf32>
    %94 = arith.addf %69, %93 : vector<256x8xf32>
    %c0_132 = arith.constant 0 : index
    %c0_133 = arith.constant 0 : index
    %95 = vector.load %arg5[%c0_132, %c0_133] : memref<1x8xf32, #tpu.memory_space<vmem>>, vector<1x8xf32>
    %96 = vector.broadcast %95 : vector<1x8xf32> to vector<256x8xf32>
    %97 = arith.addf %94, %96 : vector<256x8xf32>
    %98 = arith.negf %97 : vector<256x8xf32>
    %99 = math.exp %98 : vector<256x8xf32>
    %cst_134 = arith.constant 1.000000e+00 : f32
    %100 = vector.broadcast %cst_134 : f32 to vector<256x8xf32>
    %101 = arith.addf %100, %99 : vector<256x8xf32>
    %102 = arith.divf %100, %101 : vector<256x8xf32>
    %103 = arith.mulf %97, %102 : vector<256x8xf32>
    %104 = vector.shape_cast %103 : vector<256x8xf32> to vector<1x16x16x8xf32>
    %c0_135 = arith.constant 0 : index
    %c0_136 = arith.constant 0 : index
    %c0_137 = arith.constant 0 : index
    %c0_138 = arith.constant 0 : index
    %105 = vector.load %arg6[%c0_135, %c0_136, %c0_137, %c0_138] : memref<1x16x16x8xf32, #tpu.memory_space<vmem>>, vector<1x16x16x8xf32>
    tpu.vector_store %arg6[%c0_135, %c0_136, %c0_137, %c0_138], %104 {strides = array<i32>} : memref<1x16x16x8xf32, #tpu.memory_space<vmem>>, vector<1x16x16x8xf32>,
    return
  }
  func.func @transform_0(%arg0: i32) -> (i32, i32, i32, i32) {
    %c0_i32 = arith.constant 0 : i32
    %c0_i32_0 = arith.constant 0 : i32
    %c0_i32_1 = arith.constant 0 : i32
    %c0_i32_2 = arith.constant 0 : i32
    return %arg0, %c0_i32, %c0_i32_0, %c0_i32_1 : i32, i32, i32, i32
  }
  func.func @transform_1(%arg0: i32) -> (i32, i32) {
    %c0_i32 = arith.constant 0 : i32
    %c0_i32_0 = arith.constant 0 : i32
    %c0_i32_1 = arith.constant 0 : i32
    return %c0_i32, %c0_i32_0 : i32, i32
  }
  func.func @transform_2(%arg0: i32) -> (i32, i32) {
    %c0_i32 = arith.constant 0 : i32
    %c0_i32_0 = arith.constant 0 : i32
    %c0_i32_1 = arith.constant 0 : i32
    return %c0_i32, %c0_i32_0 : i32, i32
  }
  func.func @transform_3(%arg0: i32) -> (i32, i32, i32) {
    %c0_i32 = arith.constant 0 : i32
    %c0_i32_0 = arith.constant 0 : i32
    %c0_i32_1 = arith.constant 0 : i32
    %c0_i32_2 = arith.constant 0 : i32
    return %c0_i32, %c0_i32_0, %c0_i32_1 : i32, i32, i32
  }
  func.func @transform_4(%arg0: i32) -> (i32, i32) {
    %c0_i32 = arith.constant 0 : i32
    %c0_i32_0 = arith.constant 0 : i32
    %c0_i32_1 = arith.constant 0 : i32
    return %c0_i32, %c0_i32_0 : i32, i32
  }
  func.func @transform_5(%arg0: i32) -> (i32, i32, i32, i32) {
    %c0_i32 = arith.constant 0 : i32
    %c0_i32_0 = arith.constant 0 : i32
    %c0_i32_1 = arith.constant 0 : i32
    %c0_i32_2 = arith.constant 0 : i32
    return %arg0, %c0_i32, %c0_i32_0, %c0_i32_1 : i32, i32, i32, i32
  }
}

</mosaic_0001>

<bundles_post_ra>
// kernel: tpu_custom_call.1
= control target key start
LH: loop header
LB: loop body
LE: loop exit
PB: predicated region body
PF: predicated region fallthrough
CT: control target
= control target key end

     0   :  { %s6075_s18 = smov 0   ;;  %s8520_s0 = inlined_call_operand.vmem [shape: f32[2,16,16,4], index: 0, kind: input, shape index: {}]   ;;  %s8521_s1 = inlined_call_operand.vmem [shape: f32[4,2], index: 1, kind: input, shape index: {}]   ;;  %s8522_s2 = inlined_call_operand.vmem [shape: f32[1,2], index: 2, kind: input, shape index: {}]   ;;  %s8523_s3 = inlined_call_operand.vmem [shape: f32[4,2,8], index: 3, kind: input, shape index: {}]   ;;  %s8524_s4 = inlined_call_operand.vmem [shape: f32[1,8], index: 4, kind: input, shape index: {}]   ;;  %s8525_s5 = inlined_call_operand.vmem [shape: f32[2,16,16,8], index: 5, kind: output, shape index: {}]  }
   0x1 LB: > { %s5000_s19 = sadd.s32 4294967295, %s6042_s18   ;;  %p5004_p0 = scmp.ge.s32.totalorder %s6042_s18, 1  ;;  %s6042_s18 = sphi %s6075_s18, %s15_s18  }
   0x2   : > { %p187_p1 = scmp.lt.s32.totalorder %s6042_s18, 3 }
   0x4   : > { %p188_p2 = pnand %p5004_p0, %p187_p1 }
   0x6   : > { %191 = sbr.rel (%p188_p2) target bundleno = 879 (0x36f), region = 40 }
   0xd   : > { %v319_v0 = vld [vmem:[%s8521_s1] sm:$0xf]  ;;  %vm424_vm0 = vcmask 1043456   ;;  %p215_p3 = scmp.lt.s32.totalorder %s5000_s19, 1  ;;  %vm225_vm1 = vcmask 15360   ;;  %vm228_vm2 = vcmask 11264  }
   0xe   : > { %5412 = vmatprep.subr.msk.mxu0 %vm424_vm0, %v319_v0  ;;  %v6044_v1 = vmov -inf   ;;  %vm327_vm3 = vcmask 31744   ;;  %v877_v34 = vld [vmem:[%s8523_s3] sm:$0x3]  ;;  %vm1780_vm4 = vcmask 1041408   ;;  %vm4912_vm5 = vcmask 64512  }
   0xf   : > { %5413 = vmatpush3.msk.msra.mxu0 %vm424_vm0, %v319_v0  ;;  %s8629_s19 = smov (!%p215_p3, %s5000_s19), 1  ;;  %229 = vst.msk [vmem:[#allocation2 + $0x10] sm:$0xf] %vm228_vm2, %v6044_v1  ;;  %232 = vst.msk [vmem:[#allocation2 + $0x28] sm:$0xf] %vm228_vm2, %v6044_v1  ;;  %5662 = vmatprep.subr.msk.mxu1 %vm1780_vm4, %v877_v34 }
  0x10   : > { %234 = vst.msk [vmem:[#allocation2 + $0x38] sm:$0xff] %vm225_vm1, %v6044_v1  ;;  %226 = vst.msk [vmem:[#allocation2] sm:$0xff] %vm225_vm1, %v6044_v1  ;;  %s5245_s22 = sshll.u32 %s8629_s19, 8  ;;  %5663 = vmatpush3.msk.msra.mxu1 %vm1780_vm4, %v877_v34  ;;  %v6228_v35 = vld [vmem:[%s8522_s2] ss:$0 sm:$0xff] }
  0x11   : > { %235 = vst.msk [vmem:[#allocation2 + $0x40] sm:$0xf] %vm228_vm2, %v6044_v1  ;;  %238 = vst.msk [vmem:[#allocation2 + $0x58] sm:$0xf] %vm228_vm2, %v6044_v1  ;;  %s6154_s25 = scalar_lea.vmem %s8520_s0, %s5245_s22  ;;  %v5075_v41 = vld [vmem:[%s8523_s3 + $0x2] sm:$0x3]  ;;  %s8301_s21 = scalar_lea.vmem %s8525_s5, %s5245_s22 }
  0x12   : > { %227 = vst.msk [vmem:[#allocation2 + $0x8] sm:$0xff] %vm225_vm1, %v6044_v1  ;;  %230 = vst.msk [vmem:[#allocation2 + $0x18] sm:$0xff] %vm225_vm1, %v6044_v1  ;;  %v287_v2 = vld [vmem:[%s6154_s25] sm:$0xff]  ;;  %v288_v3 = vld [vmem:[%s6154_s25 + $0x8] sm:$0xff]  ;;  %5462 = vmatprep.subr.msk.mxu0 %vm1780_vm4, %v5075_v41 }
  0x13   : > { %231 = vst.msk [vmem:[#allocation2 + $0x20] sm:$0xff] %vm225_vm1, %v6044_v1  ;;  %233 = vst.msk [vmem:[#allocation2 + $0x30] sm:$0xff] %vm225_vm1, %v6044_v1  ;;  %v289_v4 = vld [vmem:[%s6154_s25 + $0x10] sm:$0xff]  ;;  %5414 = vmatprep.mubr.msk.f32.mxu0 %vm327_vm3, %v287_v2  ;;  %v290_v5 = vld [vmem:[%s6154_s25 + $0x18] sm:$0xff] }
  0x14   : > { %236 = vst.msk [vmem:[#allocation2 + $0x48] sm:$0xff] %vm225_vm1, %v6044_v1  ;;  %237 = vst.msk [vmem:[#allocation2 + $0x50] sm:$0xff] %vm225_vm1, %v6044_v1  ;;  %5415 = vmatmul.mubr.msk.f32.vlgmr.msra.gmra.mrb[0].mxu0 %vm327_vm3, %v288_v3  ;;  %v291_v6 = vld [vmem:[%s6154_s25 + $0x20] sm:$0xff]  ;;  %v292_v7 = vld [vmem:[%s6154_s25 + $0x28] sm:$0xff] }
  0x15   : > { %239 = vst.msk [vmem:[#allocation2 + $0x60] sm:$0xff] %vm225_vm1, %v6044_v1  ;;  %240 = vst.msk [vmem:[#allocation2 + $0x68] sm:$0xff] %vm225_vm1, %v6044_v1  ;;  %5417 = vmatprep.mubr.msk.f32.mxu0 %vm327_vm3, %v289_v4  ;;  %v293_v8 = vld [vmem:[%s6154_s25 + $0x30] sm:$0xff]  ;;  %v294_v9 = vld [vmem:[%s6154_s25 + $0x38] sm:$0xff]  ;;  %5463 = vmatpush3.msk.msra.mxu0 %vm1780_vm4, %v5075_v41 }
  0x16   : > { %241 = vst.msk [vmem:[#allocation2 + $0x70] sm:$0xf] %vm228_vm2, %v6044_v1  ;;  %244 = vst.msk [vmem:[#allocation2 + $0x88] sm:$0xf] %vm228_vm2, %v6044_v1  ;;  %v295_v10 = vld [vmem:[%s6154_s25 + $0x40] sm:$0xff]  ;;  %v296_v11 = vld [vmem:[%s6154_s25 + $0x48] sm:$0xff]  ;;  %5512 = vmatprep.subr.msk.mxu0 %vm1780_vm4, %v877_v34 }
  0x17   : > { %242 = vst.msk [vmem:[#allocation2 + $0x78] sm:$0xff] %vm225_vm1, %v6044_v1  ;;  %243 = vst.msk [vmem:[#allocation2 + $0x80] sm:$0xff] %vm225_vm1, %v6044_v1  ;;  %v297_v12 = vld [vmem:[%s6154_s25 + $0x50] sm:$0xff]  ;;  %v298_v13 = vld [vmem:[%s6154_s25 + $0x58] sm:$0xff] }
  0x18   : > { %245 = vst.msk [vmem:[#allocation2 + $0x90] sm:$0xff] %vm225_vm1, %v6044_v1  ;;  %246 = vst.msk [vmem:[#allocation2 + $0x98] sm:$0xff] %vm225_vm1, %v6044_v1  ;;  %5418 = vmatmul.mubr.msk.f32.gmra.mrb[2].mxu0 %vm327_vm3, %v290_v5  ;;  %v299_v14 = vld [vmem:[%s6154_s25 + $0x60] sm:$0xff]  ;;  %v300_v15 = vld [vmem:[%s6154_s25 + $0x68] sm:$0xff] }
  0x19   : > { %247 = vst.msk [vmem:[#allocation2 + $0xa0] sm:$0xf] %vm228_vm2, %v6044_v1  ;;  %250 = vst.msk [vmem:[#allocation2 + $0xb8] sm:$0xf] %vm228_vm2, %v6044_v1  ;;  %5420 = vmatprep.mubr.msk.f32.mxu0 %vm327_vm3, %v291_v6  ;;  %v301_v16 = vld [vmem:[%s6154_s25 + $0x70] sm:$0xff]  ;;  %v302_v17 = vld [vmem:[%s6154_s25 + $0x78] sm:$0xff] }
  0x1a   : > { %248 = vst.msk [vmem:[#allocation2 + $0xa8] sm:$0xff] %vm225_vm1, %v6044_v1  ;;  %249 = vst.msk [vmem:[#allocation2 + $0xb0] sm:$0xff] %vm225_vm1, %v6044_v1  ;;  %v303_v18 = vld [vmem:[%s6154_s25 + $0x80] sm:$0xff]  ;;  %v304_v19 = vld [vmem:[%s6154_s25 + $0x88] sm:$0xff] }
  0x1b   : > { %251 = vst.msk [vmem:[#allocation2 + $0xc0] sm:$0xff] %vm225_vm1, %v6044_v1  ;;  %252 = vst.msk [vmem:[#allocation2 + $0xc8] sm:$0xff] %vm225_vm1, %v6044_v1  ;;  %v305_v20 = vld [vmem:[%s6154_s25 + $0x90] sm:$0xff]  ;;  %v306_v21 = vld [vmem:[%s6154_s25 + $0x98] sm:$0xff] }
  0x1c   : > { %253 = vst.msk [vmem:[#allocation2 + $0xd0] sm:$0xf] %vm228_vm2, %v6044_v1  ;;  %256 = vst.msk [vmem:[#allocation2 + $0xe8] sm:$0xf] %vm228_vm2, %v6044_v1  ;;  %5421 = vmatmul.mubr.msk.f32.gmra.mrb[4].mxu0 %vm327_vm3, %v292_v7  ;;  %v307_v22 = vld [vmem:[%s6154_s25 + $0xa0] sm:$0xff]  ;;  %v308_v23 = vld [vmem:[%s6154_s25 + $0xa8] sm:$0xff] }
  0x1d   : > { %254 = vst.msk [vmem:[#allocation2 + $0xd8] sm:$0xff] %vm225_vm1, %v6044_v1  ;;  %255 = vst.msk [vmem:[#allocation2 + $0xe0] sm:$0xff] %vm225_vm1, %v6044_v1  ;;  %5423 = vmatprep.mubr.msk.f32.mxu0 %vm327_vm3, %v293_v8  ;;  %v309_v24 = vld [vmem:[%s6154_s25 + $0xb0] sm:$0xff]  ;;  %v310_v25 = vld [vmem:[%s6154_s25 + $0xb8] sm:$0xff] }
  0x1e   : > { %257 = vst.msk [vmem:[#allocation2 + $0xf0] sm:$0xff] %vm225_vm1, %v6044_v1  ;;  %258 = vst.msk [vmem:[#allocation2 + $0xf8] sm:$0xff] %vm225_vm1, %v6044_v1  ;;  %v311_v26 = vld [vmem:[%s6154_s25 + $0xc0] sm:$0xff]  ;;  %v312_v27 = vld [vmem:[%s6154_s25 + $0xc8] sm:$0xff] }
  0x1f   : > { %259 = vst.msk [vmem:[#allocation2 + $0x100] sm:$0xf] %vm228_vm2, %v6044_v1  ;;  %262 = vst.msk [vmem:[#allocation2 + $0x118] sm:$0xf] %vm228_vm2, %v6044_v1  ;;  %v313_v28 = vld [vmem:[%s6154_s25 + $0xd0] sm:$0xff]  ;;  %v314_v29 = vld [vmem:[%s6154_s25 + $0xd8] sm:$0xff] }
  0x20   : > { %260 = vst.msk [vmem:[#allocation2 + $0x108] sm:$0xff] %vm225_vm1, %v6044_v1  ;;  %261 = vst.msk [vmem:[#allocation2 + $0x110] sm:$0xff] %vm225_vm1, %v6044_v1  ;;  %5424 = vmatmul.mubr.msk.f32.gmra.mrb[6].mxu0 %vm327_vm3, %v294_v9  ;;  %v315_v30 = vld [vmem:[%s6154_s25 + $0xe0] sm:$0xff]  ;;  %v316_v31 = vld [vmem:[%s6154_s25 + $0xe8] sm:$0xff] }
  0x21   : > { %263 = vst.msk [vmem:[#allocation2 + $0x120] sm:$0xff] %vm225_vm1, %v6044_v1  ;;  %264 = vst.msk [vmem:[#allocation2 + $0x128] sm:$0xff] %vm225_vm1, %v6044_v1  ;;  %5426 = vmatprep.mubr.msk.f32.mxu0 %vm327_vm3, %v295_v10  ;;  %v317_v32 = vld [vmem:[%s6154_s25 + $0xf0] sm:$0xff]  ;;  %v318_v33 = vld [vmem:[%s6154_s25 + $0xf8] sm:$0xff] }
  0x22   : > { %265 = vst.msk [vmem:[#allocation2 + $0x130] sm:$0xf] %vm228_vm2, %v6044_v1  ;;  %268 = vst.msk [vmem:[#allocation2 + $0x148] sm:$0xf] %vm228_vm2, %v6044_v1 }
  0x23   : > { %266 = vst.msk [vmem:[#allocation2 + $0x138] sm:$0xff] %vm225_vm1, %v6044_v1  ;;  %267 = vst.msk [vmem:[#allocation2 + $0x140] sm:$0xff] %vm225_vm1, %v6044_v1 }
  0x24   : > { %269 = vst.msk [vmem:[#allocation2 + $0x150] sm:$0xff] %vm225_vm1, %v6044_v1  ;;  %270 = vst.msk [vmem:[#allocation2 + $0x158] sm:$0xff] %vm225_vm1, %v6044_v1  ;;  %5427 = vmatmul.mubr.msk.f32.gmra.mrb[8].mxu0 %vm327_vm3, %v296_v11 }
  0x25   : > { %271 = vst.msk [vmem:[#allocation2 + $0x160] sm:$0xf] %vm228_vm2, %v6044_v1  ;;  %274 = vst.msk [vmem:[#allocation2 + $0x178] sm:$0xf] %vm228_vm2, %v6044_v1  ;;  %5429 = vmatprep.mubr.msk.f32.mxu0 %vm327_vm3, %v297_v12 }
  0x26   : > { %272 = vst.msk [vmem:[#allocation2 + $0x168] sm:$0xff] %vm225_vm1, %v6044_v1  ;;  %273 = vst.msk [vmem:[#allocation2 + $0x170] sm:$0xff] %vm225_vm1, %v6044_v1 }
  0x27   : > { %275 = vst.msk [vmem:[#allocation2 + $0x180] sm:$0xff] %vm225_vm1, %v6044_v1  ;;  %276 = vst.msk [vmem:[#allocation2 + $0x188] sm:$0xff] %vm225_vm1, %v6044_v1 }
  0x28   : > { %277 = vst.msk [vmem:[#allocation2 + $0x190] sm:$0xf] %vm228_vm2, %v6044_v1  ;;  %280 = vst.msk [vmem:[#allocation2 + $0x1a8] sm:$0xf] %vm228_vm2, %v6044_v1  ;;  %5430 = vmatmul.mubr.msk.f32.gmra.mrb[10].mxu0 %vm327_vm3, %v298_v13 }
  0x29   : > { %278 = vst.msk [vmem:[#allocation2 + $0x198] sm:$0xff] %vm225_vm1, %v6044_v1  ;;  %279 = vst.msk [vmem:[#allocation2 + $0x1a0] sm:$0xff] %vm225_vm1, %v6044_v1  ;;  %5432 = vmatprep.mubr.msk.f32.mxu0 %vm327_vm3, %v299_v14 }
  0x2a   : > { %281 = vst.msk [vmem:[#allocation2 + $0x1b0] sm:$0xff] %vm225_vm1, %v6044_v1  ;;  %282 = vst.msk [vmem:[#allocation2 + $0x1b8] sm:$0xff] %vm225_vm1, %v6044_v1 }
  0x2b   : > { %283 = vst.msk [vmem:[#allocation2 + $0x1c0] sm:$0xf] %vm228_vm2, %v6044_v1  ;;  %286 = vst.msk [vmem:[#allocation2 + $0x1d8] sm:$0xf] %vm228_vm2, %v6044_v1 }
  0x2c   : > { %284 = vst.msk [vmem:[#allocation2 + $0x1c8] sm:$0xff] %vm225_vm1, %v6044_v1  ;;  %285 = vst.msk [vmem:[#allocation2 + $0x1d0] sm:$0xff] %vm225_vm1, %v6044_v1  ;;  %5433 = vmatmul.mubr.msk.f32.gmra.mrb[12].mxu0 %vm327_vm3, %v300_v15 }
  0x2d   : > { %5435 = vmatprep.mubr.msk.f32.mxu0 %vm327_vm3, %v301_v16 }
  0x30   : > { %5436 = vmatmul.mubr.msk.f32.gmra.mrb[14].mxu0 %vm327_vm3, %v302_v17 }
  0x31   : > { %5438 = vmatprep.mubr.msk.f32.mxu0 %vm327_vm3, %v303_v18 }
  0x34   : > { %5439 = vmatmul.mubr.msk.f32.gmra.mrb[16].mxu0 %vm327_vm3, %v304_v19 }
  0x35   : > { %5441 = vmatprep.mubr.msk.f32.mxu0 %vm327_vm3, %v305_v20 }
  0x38   : > { %5442 = vmatmul.mubr.msk.f32.gmra.mrb[18].mxu0 %vm327_vm3, %v306_v21 }
  0x39   : > { %5444 = vmatprep.mubr.msk.f32.mxu0 %vm327_vm3, %v307_v22 }
  0x3c   : > { %5445 = vmatmul.mubr.msk.f32.gmra.mrb[20].mxu0 %vm327_vm3, %v308_v23 }
  0x3d   : > { %5447 = vmatprep.mubr.msk.f32.mxu0 %vm327_vm3, %v309_v24 }
  0x40   : > { %5448 = vmatmul.mubr.msk.f32.gmra.mrb[22].mxu0 %vm327_vm3, %v310_v25 }
  0x41   : > { %5450 = vmatprep.mubr.msk.f32.mxu0 %vm327_vm3, %v311_v26 }
  0x44   : > { %5451 = vmatmul.mubr.msk.f32.gmra.mrb[24].mxu0 %vm327_vm3, %v312_v27 }
  0x45   : > { %5453 = vmatprep.mubr.msk.f32.mxu0 %vm327_vm3, %v313_v28 }
  0x48   : > { %5454 = vmatmul.mubr.msk.f32.gmra.mrb[26].mxu0 %vm327_vm3, %v314_v29 }
  0x49   : > { %5456 = vmatprep.mubr.msk.f32.mxu0 %vm327_vm3, %v315_v30 }
  0x4c   : > { %5457 = vmatmul.mubr.msk.f32.gmra.mrb[28].mxu0 %vm327_vm3, %v316_v31 }
  0x4d   : > { %5459 = vmatprep.mubr.msk.f32.mxu0 %vm327_vm3, %v317_v32 }
  0x50   : > { %5460 = vmatmul.mubr.msk.f32.gmra.mrb[30].mxu0 %vm327_vm3, %v318_v33 }
  0xe7   : > { %v5416_v36 = vpop.f32.mrb[0].mxu0 }
  0xe8   : > { %v6231_v37 = vadd.f32 %v5416_v36, %v6228_v35  ;;  %v494_v38 = vpop.f32.mrb[1].mxu0 }
  0xe9   : > { %v6234_v39 = vadd.f32 %v6228_v35, %v494_v38 }
  0xea   : > { %v5044_v40 = vmul.f32 -1.442695, %v6231_v37 }
  0xeb   : > { %v5043_v42 = vmul.f32 -1.442695, %v6234_v39  ;;  %v5419_v43 = vpop.f32.mrb[2].mxu0 }
  0xec   : > { %5769 = vpow2.f32 %v5044_v40  ;;  %v6243_v44 = vadd.f32 %v5419_v43, %v6228_v35  ;;  %v504_v45 = vpop.f32.mrb[3].mxu0 }
  0xed   : > { %5771 = vpow2.f32 %v5043_v42  ;;  %v6247_v46 = vadd.f32 %v6228_v35, %v504_v45 }
  0xee   : > { %v5046_v47 = vmul.f32 -1.442695, %v6243_v44 }
  0xef   : > { %v5045_v48 = vmul.f32 -1.442695, %v6247_v46  ;;  %v5422_v49 = vpop.f32.mrb[4].mxu0 }
  0xf0   : > { %5773 = vpow2.f32 %v5046_v47  ;;  %v6253_v50 = vadd.f32 %v5422_v49, %v6228_v35  ;;  %v514_v51 = vpop.f32.mrb[5].mxu0 }
  0xf1   : > { %5775 = vpow2.f32 %v5045_v48  ;;  %v6256_v52 = vadd.f32 %v6228_v35, %v514_v51 }
  0xf2   : > { %v5048_v53 = vmul.f32 -1.442695, %v6253_v50 }
  0xf3   : > { %v5047_v54 = vmul.f32 -1.442695, %v6256_v52  ;;  %v5425_v55 = vpop.f32.mrb[6].mxu0 }
  0xf4   : > { %5777 = vpow2.f32 %v5048_v53  ;;  %v6261_v56 = vadd.f32 %v5425_v55, %v6228_v35  ;;  %v524_v57 = vpop.f32.mrb[7].mxu0  ;;  %v6316_v55 = vld [vmem:[#allocation2 + $0x10] sm:$0xf] }
  0xf5   : > { %5779 = vpow2.f32 %v5047_v54  ;;  %v6264_v58 = vadd.f32 %v6228_v35, %v524_v57 }
  0xf6   : > { %v5770_v59 = vpop.eup %5769  ;;  %v5050_v60 = vmul.f32 -1.442695, %v6261_v56 }
  0xf7   : > { %v5772_v61 = vpop.eup %5771  ;;  %v750_v62 = vadd.f32 1.0, %v5770_v59  ;;  %v5049_v63 = vmul.f32 -1.442695, %v6264_v58  ;;  %v5428_v0 = vpop.f32.mrb[8].mxu0 }
  0xf8   : > { %v749_v1 = vadd.f32 1.0, %v5772_v61  ;;  %5781 = vpow2.f32 %v5050_v60  ;;  %v6269_v2 = vadd.f32 %v5428_v0, %v6228_v35  ;;  %v534_v3 = vpop.f32.mrb[9].mxu0  ;;  %v962_v61 = vld [vmem:[#allocation2 + $0x28] sm:$0xf]  ;;  %v911_v0 = vld [vmem:[#allocation2] sm:$0xff] }
  0xf9   : > { %5783 = vrcp.f32 %v750_v62  ;;  %v6272_v4 = vadd.f32 %v6228_v35, %v534_v3  ;;  %v6327_v3 = vld [vmem:[#allocation2 + $0x18] sm:$0xff] }
  0xfa   : > { %v5774_v5 = vpop.eup %5773  ;;  %5785 = vrcp.f32 %v749_v1  ;;  %v5052_v6 = vmul.f32 -1.442695, %v6269_v2  ;;  %v912_v1 = vld [vmem:[#allocation2 + $0x8] sm:$0xff] }
  0xfb   : > { %v5776_v7 = vpop.eup %5775  ;;  %v752_v8 = vadd.f32 1.0, %v5774_v5  ;;  %5787 = vpow2.f32 %v5049_v63  ;;  %v5051_v9 = vmul.f32 -1.442695, %v6272_v4  ;;  %v5431_v10 = vpop.f32.mrb[10].mxu0 }
  0xfc   : > { %v751_v11 = vadd.f32 1.0, %v5776_v7  ;;  %5789 = vpow2.f32 %v5052_v6  ;;  %v6277_v12 = vadd.f32 %v5431_v10, %v6228_v35  ;;  %v544_v13 = vpop.f32.mrb[11].mxu0  ;;  %v6331_v7 = vld [vmem:[#allocation2 + $0x20] sm:$0xff]  ;;  %v6336_v10 = vld [vmem:[#allocation2 + $0x8] sm:$0xff] }
  0xfd   : > { %5791 = vrcp.f32 %v752_v8  ;;  %v6280_v14 = vadd.f32 %v6228_v35, %v544_v13 }
  0xfe   : > { %v5778_v15 = vpop.eup %5777  ;;  %5793 = vrcp.f32 %v751_v11  ;;  %v5054_v16 = vmul.f32 -1.442695, %v6277_v12  ;;  %v6338_v11 = vld [vmem:[#allocation2 + $0x20] sm:$0xff] }
  0xff   : > { %v5780_v17 = vpop.eup %5779  ;;  %v754_v18 = vadd.f32 1.0, %v5778_v15  ;;  %5795 = vpow2.f32 %v5051_v9  ;;  %v5053_v19 = vmul.f32 -1.442695, %v6280_v14  ;;  %v5434_v20 = vpop.f32.mrb[12].mxu0  ;;  %v916_v15 = vld [vmem:[#allocation2 + $0x28] sm:$0xf] }
 0x100   : > { %v753_v21 = vadd.f32 1.0, %v5780_v17  ;;  %5797 = vpow2.f32 %v5054_v16  ;;  %v6285_v22 = vadd.f32 %v5434_v20, %v6228_v35  ;;  %v554_v23 = vpop.f32.mrb[13].mxu0 }
 0x101   : > { %5799 = vrcp.f32 %v754_v18  ;;  %v6288_v24 = vadd.f32 %v6228_v35, %v554_v23 }
 0x102   : > { %v5782_v25 = vpop.eup %5781  ;;  %5801 = vrcp.f32 %v753_v21  ;;  %v5056_v26 = vmul.f32 -1.442695, %v6285_v22  ;;  %v1010_v21 = vmax.f32 %v6316_v55, %v962_v61 }
 0x103   : > { %v5784_v27 = vpop.eup %5783  ;;  %v756_v28 = vadd.f32 1.0, %v5782_v25  ;;  %5803 = vpow2.f32 %v5053_v19  ;;  %v5055_v29 = vmul.f32 -1.442695, %v6288_v24  ;;  %v5437_v30 = vpop.f32.mrb[14].mxu0  ;;  %v6347_v19 = vld [vmem:[#allocation2] sm:$0xff] }
 0x104   : > { %v5786_v31 = vpop.eup %5785  ;;  %v6293_v32 = vmul.f32 %v5784_v27, %v6231_v37  ;;  %5805 = vpow2.f32 %v5056_v26  ;;  %v6296_v33 = vadd.f32 %v5437_v30, %v6228_v35  ;;  %v564_v34 = vpop.f32.mrb[15].mxu0  ;;  %v6356_v25 = vld [vmem:[#allocation2 + $0x28] sm:$0xf]  ;;  %v6362_v30 = vmax.f32 %v912_v1, %v6331_v7 }
 0x105   : > { %v5788_v36 = vpop.eup %5787  ;;  %v6299_v38 = vmul.f32 %v5786_v31, %v6234_v39  ;;  %5807 = vrcp.f32 %v756_v28  ;;  %v6302_v40 = vadd.f32 %v6228_v35, %v564_v34  ;;  %8561 = vst [vmem:[#allocation11_spill] sm:$0xff] %v6356_v25 }
 0x106   : > { %8554 = vst [vmem:[#allocation4_spill] sm:$0xff] %v6293_v32  ;;  %v5790_v41 = vpop.eup %5789  ;;  %880 = vst.msk [vmem:[#allocation2 + $0x3a] sm:$0xff] %vm225_vm1, %v6293_v32  ;;  %v755_v42 = vadd.f32 1.0, %v5788_v36  ;;  %5809 = vpow2.f32 %v5055_v29  ;;  %v5058_v37 = vmul.f32 -1.442695, %v6296_v33  ;;  %v6359_v29 = vmax.f32 %v911_v0, %v6327_v3 }
 0x107   : > { %8555 = vst [vmem:[#allocation5_spill] sm:$0xff] %v6299_v38  ;;  %v5792_v43 = vpop.eup %5791  ;;  %879 = vst.msk [vmem:[#allocation2 + $0x32] sm:$0xff] %vm225_vm1, %v6299_v38  ;;  %v758_v45 = vadd.f32 1.0, %v5790_v41  ;;  %v5057_v39 = vmul.f32 -1.442695, %v6302_v40  ;;  %v5440_v47 = vpop.f32.mrb[16].mxu0 }
 0x108   : > { %v5794_v48 = vpop.eup %5793  ;;  %v6311_v49 = vmul.f32 %v5792_v43, %v6243_v44  ;;  %5811 = vrcp.f32 %v755_v42  ;;  %v6314_v51 = vadd.f32 %v5440_v47, %v6228_v35  ;;  %v574_v53 = vpop.f32.mrb[17].mxu0  ;;  %8562 = vst [vmem:[#allocation12_spill] sm:$0xff] %v6359_v29  ;;  %8563 = vst [vmem:[#allocation13_spill] sm:$0xff] %v6362_v30 }
 0x109   : > { %v5796_v54 = vpop.eup %5795  ;;  %v6319_v57 = vmul.f32 %v5794_v48, %v6247_v46  ;;  %5813 = vrcp.f32 %v758_v45  ;;  %v6322_v59 = vadd.f32 %v6228_v35, %v574_v53 }
 0x10a   : > { %8556 = vst [vmem:[#allocation6_spill] sm:$0xff] %v6311_v49  ;;  %v5798_v60 = vpop.eup %5797  ;;  %882 = vst.msk [vmem:[#allocation2 + $0x52] sm:$0xff] %vm225_vm1, %v6311_v49  ;;  %v757_v44 = vadd.f32 1.0, %v5796_v54  ;;  %5815 = vpow2.f32 %v5058_v37  ;;  %v5060_v62 = vmul.f32 -1.442695, %v6314_v51 }
 0x10b   : > { %8557 = vst [vmem:[#allocation7_spill] sm:$0xff] %v6319_v57  ;;  %v5800_v63 = vpop.eup %5799  ;;  %881 = vst.msk [vmem:[#allocation2 + $0x4a] sm:$0xff] %vm225_vm1, %v6319_v57  ;;  %v760_v46 = vadd.f32 1.0, %v5798_v60  ;;  %5817 = vpow2.f32 %v5057_v39  ;;  %v5443_v5 = vpop.f32.mrb[18].mxu0  ;;  %v5059_v17 = vmul.f32 -1.442695, %v6322_v59 }
 0x10c   : > { %v5802_v6 = vpop.eup %5801  ;;  %v6334_v8 = vmul.f32 %v5800_v63, %v6253_v50  ;;  %5819 = vrcp.f32 %v757_v44  ;;  %v584_v9 = vpop.f32.mrb[19].mxu0  ;;  %v6345_v18 = vadd.f32 %v5443_v5, %v6228_v35  ;;  %v6349_v50 = vld [vmem:[#allocation2 + $0x18] sm:$0xff] }
 0x10d   : > { %v5804_v13 = vpop.eup %5803  ;;  %v6341_v16 = vmul.f32 %v5802_v6, %v6256_v52  ;;  %5821 = vrcp.f32 %v760_v46  ;;  %v6354_v52 = vld [vmem:[#allocation2 + $0x10] sm:$0xf]  ;;  %v965_v27 = vld [vmem:[#allocation2 + $0x40] sm:$0xf]  ;;  %v6381_v53 = vadd.f32 %v6228_v35, %v584_v9 }
 0x10e   : > { %8558 = vst [vmem:[#allocation8_spill] sm:$0xff] %v6334_v8  ;;  %v5806_v20 = vpop.eup %5805  ;;  %884 = vst.msk [vmem:[#allocation2 + $0x6a] sm:$0xff] %vm225_vm1, %v6334_v8  ;;  %v759_v23 = vadd.f32 1.0, %v5804_v13  ;;  %5823 = vpow2.f32 %v5060_v62  ;;  %v1058_v28 = vld [vmem:[#allocation2 + $0x40] sm:$0xf]  ;;  %v6368_v41 = vld [vmem:[#allocation2 + $0x30] sm:$0xff] }
 0x10f   : > { %8559 = vst [vmem:[#allocation9_spill] sm:$0xff] %v6341_v16  ;;  %8560 = vst [vmem:[#allocation10_spill] sm:$0xff] %v6354_v52  ;;  %v5808_v26 = vpop.eup %5807  ;;  %v5446_v31 = vpop.f32.mrb[20].mxu0  ;;  %v6370_v42 = vld [vmem:[#allocation2 + $0x38] sm:$0xff]  ;;  %v762_v43 = vadd.f32 1.0, %v5806_v20  ;;  %v1106_v60 = vmax.f32 %v1010_v21, %v1058_v28  ;;  %v1011_v1 = vmax.f32 %v6327_v3, %v6368_v41  ;;  %v1104_v5 = vmax.f32 %v6359_v29, %v6368_v41 }
 0x110   : > { %883 = vst.msk [vmem:[#allocation2 + $0x62] sm:$0xff] %vm225_vm1, %v6341_v16  ;;  %v5810_v36 = vpop.eup %5809  ;;  %v6373_v37 = vmul.f32 %v5808_v26, %v6261_v56  ;;  %5825 = vrcp.f32 %v759_v23  ;;  %v594_v45 = vpop.f32.mrb[21].mxu0  ;;  %v5062_v48 = vmul.f32 -1.442695, %v6345_v18  ;;  %v1013_v56 = vmax.f32 %v916_v15, %v965_v27  ;;  %v919_v0 = vld [vmem:[#allocation2 + $0x40] sm:$0xf] }
 0x111   : > { %v6377_v47 = vld [vmem:[#allocation2 + $0x58] sm:$0xf]  ;;  %5827 = vpow2.f32 %v5059_v17  ;;  %v761_v62 = vadd.f32 1.0, %v5810_v36  ;;  %v1012_v46 = vmax.f32 %v6331_v7, %v6370_v42  ;;  %v1105_v6 = vmax.f32 %v6362_v30, %v6370_v42 }
 0x112   : > { %8564 = vst [vmem:[#allocation14_spill] sm:$0xff] %v6373_v37  ;;  %v5812_v55 = vpop.eup %5811  ;;  %v1061_v61 = vld [vmem:[#allocation2 + $0x58] sm:$0xf]  ;;  %886 = vst.msk [vmem:[#allocation2 + $0x82] sm:$0xff] %vm225_vm1, %v6373_v37  ;;  %5829 = vrcp.f32 %v762_v43  ;;  %v6395_v9 = vld [vmem:[#allocation2 + $0x48] sm:$0xff]  ;;  %v1016_v20 = vmax.f32 %v919_v0, %v6377_v47  ;;  %v6404_v3 = vadd.f32 %v5446_v31, %v6228_v35  ;;  %v6407_v7 = vadd.f32 %v6228_v35, %v594_v45 }
 0x113   : > { %v1155_v44 = vld [vmem:[#allocation2 + $0x58] sm:$0xf]  ;;  %v5814_v63 = vpop.eup %5813  ;;  %v6397_v13 = vld [vmem:[#allocation2 + $0x50] sm:$0xff]  ;;  %v5449_v15 = vpop.f32.mrb[22].mxu0  ;;  %v6401_v21 = vmul.f32 %v5812_v55, %v6264_v58  ;;  %v1109_v27 = vmax.f32 %v1013_v56, %v1061_v61  ;;  %5831 = vrcp.f32 %v761_v62  ;;  %v1014_v58 = vmax.f32 %v6368_v41, %v6395_v9 }
 0x114   : > { %v5816_v17 = vpop.eup %5815  ;;  %v604_v23 = vpop.f32.mrb[23].mxu0  ;;  %v1203_v28 = vmax.f32 %v1106_v60, %v1155_v44  ;;  %v6412_v43 = vmul.f32 %v5814_v63, %v6269_v2  ;;  %v6419_v45 = vmax.f32 %v1011_v1, %v6395_v9  ;;  %5833 = vpow2.f32 %v5062_v48  ;;  %v6425_v60 = vld [vmem:[#allocation2 + $0x58] sm:$0xf] }
 0x115   : > { %8565 = vst [vmem:[#allocation15_spill] sm:$0xff] %v6401_v21  ;;  %v5818_v26 = vpop.eup %5817  ;;  %v6409_v36 = vld [vmem:[#allocation2 + $0x70] sm:$0xf]  ;;  %885 = vst.msk [vmem:[#allocation2 + $0x7a] sm:$0xff] %vm225_vm1, %v6401_v21  ;;  %v6428_v61 = vmax.f32 %v1012_v46, %v6397_v13  ;;  %v1201_v41 = vmax.f32 %v1104_v5, %v6395_v9  ;;  %v764_v63 = vadd.f32 1.0, %v5816_v17  ;;  %v6436_v39 = vmax.f32 %v1105_v6, %v6397_v13 }
 0x116   : > { %8566 = vst [vmem:[#allocation16_spill] sm:$0xff] %v6412_v43  ;;  %v5820_v47 = vpop.eup %5819  ;;  %v1158_v55 = vld [vmem:[#allocation2 + $0x70] sm:$0xf]  ;;  %888 = vst.msk [vmem:[#allocation2 + $0x9a] sm:$0xff] %vm225_vm1, %v6412_v43  ;;  %v1019_v48 = vmax.f32 %v6425_v60, %v6409_v36  ;;  %v6441_v46 = vadd.f32 %v5449_v15, %v6228_v35  ;;  %v6444_v5 = vadd.f32 %v6228_v35, %v604_v23  ;;  %v763_v31 = vadd.f32 1.0, %v5818_v26 }
 0x117   : > { %v1252_v0 = vld [vmem:[#allocation2 + $0x70] sm:$0xf]  ;;  %v6421_v56 = vld [vmem:[#allocation2 + $0x60] sm:$0xff]  ;;  %v5822_v2 = vpop.eup %5821  ;;  %v6433_v1 = vpop.f32.mrb[24].mxu0  ;;  %v6451_v34 = vmul.f32 %v5820_v47, %v6272_v4  ;;  %5835 = vrcp.f32 %v764_v63 }
 0x118   : > { %v1064_v44 = vld [vmem:[#allocation2 + $0x70] sm:$0xf]  ;;  %v1300_v62 = vmax.f32 %v1203_v28, %v1252_v0  ;;  %v5824_v54 = vpop.eup %5823  ;;  %v6446_v28 = vpop.f32.mrb[25].mxu0  ;;  %v1206_v0 = vmax.f32 %v1109_v27, %v1158_v55  ;;  %v1298_v17 = vmax.f32 %v1201_v41, %v6421_v56  ;;  %v6454_v6 = vmul.f32 %v5822_v2, %v6277_v12  ;;  %v6458_v27 = vld [vmem:[#allocation2 + $0x68] sm:$0xff] }
 0x119   : > { %8567 = vst [vmem:[#allocation17_spill] sm:$0xff] %v6451_v34  ;;  %v1112_v60 = vmax.f32 %v1016_v20, %v1064_v44  ;;  %v1017_v15 = vmax.f32 %v6395_v9, %v6421_v56  ;;  %v1255_v23 = vld [vmem:[#allocation2 + $0x88] sm:$0xf]  ;;  %v766_v43 = vadd.f32 1.0, %v5824_v54  ;;  %v6461_v55 = vmax.f32 %v1014_v58, %v6421_v56  ;;  %887 = vst.msk [vmem:[#allocation2 + $0x92] sm:$0xff] %vm225_vm1, %v6451_v34 }
 0x11a   : > { %1348 = vst.msk [vmem:[#allocation3 + $0x10] sm:$0xf] %vm228_vm2, %v1300_v62  ;;  %8568 = vst [vmem:[#allocation18_spill] sm:$0xff] %v6454_v6  ;;  %v5826_v36 = vpop.eup %5825  ;;  %v974_v4 = vld [vmem:[#allocation2 + $0x88] sm:$0xf]  ;;  %v1303_v12 = vmax.f32 %v1206_v0, %v1255_v23  ;;  %v1204_v58 = vmax.f32 %v6419_v45, %v6421_v56  ;;  %5837 = vrcp.f32 %v763_v31  ;;  %v1018_v31 = vmax.f32 %v6397_v13, %v6458_v27 }
 0x11b   : > { %v5828_v37 = vpop.eup %5827  ;;  %1346 = vst.msk [vmem:[#allocation3] sm:$0xff] %vm225_vm1, %v1298_v17  ;;  %v1161_v47 = vld [vmem:[#allocation2 + $0x88] sm:$0xf]  ;;  %890 = vst.msk [vmem:[#allocation2 + $0xb2] sm:$0xff] %vm225_vm1, %v6454_v6  ;;  %v6469_v9 = vmul.f32 %v5826_v36, %v6280_v14  ;;  %v6471_v54 = vpop.f32.mrb[26].mxu0  ;;  %5839 = vrcp.f32 %v766_v43  ;;  %v8571_v43 = vmax.f32 %v6370_v42, %v6397_v13 }
 0x11c   : > { %v5830_v20 = vpop.eup %5829  ;;  %v925_v26 = vld [vmem:[#allocation2 + $0x70] sm:$0xf]  ;;  %v1067_v2 = vld [vmem:[#allocation2 + $0x88] sm:$0xf]  ;;  %v765_v41 = vadd.f32 1.0, %v5828_v37  ;;  %v624_v62 = vpop.f32.mrb[27].mxu0  ;;  %v1209_v17 = vmax.f32 %v1112_v60, %v1161_v47 }
 0x11d   : > { %8569 = vst [vmem:[#allocation19_spill] sm:$0xff] %v6469_v9  ;;  %v5061_v44 = vmul.f32 -1.442695, %v6381_v53  ;;  %1351 = vst.msk [vmem:[#allocation3 + $0x28] sm:$0xf] %vm228_vm2, %v1303_v12  ;;  %v6477_v0 = vld [vmem:[#allocation2 + $0x78] sm:$0xff]  ;;  %v6484_v63 = vmul.f32 %v5830_v20, %v6285_v22  ;;  %v5832_v22 = vpop.eup %5831  ;;  %v6506_v20 = vmax.f32 %v8571_v43, %v6458_v27  ;;  %v1115_v16 = vmax.f32 %v1019_v48, %v1067_v2 }
 0x11e   : > { %v6479_v14 = vld [vmem:[#allocation2 + $0x80] sm:$0xff]  ;;  %889 = vst.msk [vmem:[#allocation2 + $0xaa] sm:$0xff] %vm225_vm1, %v6469_v9  ;;  %v6487_v45 = vmul.f32 -1.442695, %v6404_v3  ;;  %v6490_v37 = vmul.f32 -1.442695, %v6407_v7  ;;  %v1022_v9 = vmax.f32 %v925_v26, %v974_v4  ;;  %v1301_v60 = vmax.f32 %v1204_v58, %v6477_v0  ;;  %v5834_v8 = vpop.eup %5833 }
 0x11f   : > { %8570 = vst [vmem:[#allocation20_spill] sm:$0xff] %v6484_v63  ;;  %v6494_v36 = vld [vmem:[#allocation2 + $0xa0] sm:$0xf]  ;;  %v6497_v23 = vmul.f32 -1.442695, %v6441_v46  ;;  %892 = vst.msk [vmem:[#allocation2 + $0xca] sm:$0xff] %vm225_vm1, %v6484_v63  ;;  %v1020_v49 = vmax.f32 %v6421_v56, %v6477_v0  ;;  %v6516_v43 = vmul.f32 %v5832_v22, %v6288_v24  ;;  %v1021_v58 = vmax.f32 %v6458_v27, %v6479_v14 }
 0x120   : > { %v6500_v12 = vmul.f32 -1.442695, %v6444_v5  ;;  %v1070_v47 = vld [vmem:[#allocation2 + $0xa0] sm:$0xf]  ;;  %v5458_v21 = vpop.f32.mrb[28].mxu0  ;;  %v1113_v48 = vmax.f32 %v1017_v15, %v6477_v0  ;;  %v6529_v56 = vmax.f32 %v1018_v31, %v6479_v14  ;;  %1349 = vst.msk [vmem:[#allocation3 + $0x18] sm:$0xff] %vm225_vm1, %v1301_v60  ;;  %5841 = vrcp.f32 %v765_v41 }
 0x121   : > { %v1258_v34 = vld [vmem:[#allocation2 + $0xa0] sm:$0xf]  ;;  %8572 = vst [vmem:[#allocation21_spill] sm:$0xff] %v6516_v43  ;;  %v6518_v6 = vpop.f32.mrb[29].mxu0  ;;  %v6523_v4 = vld [vmem:[%s8523_s3 + $0x4] sm:$0x3]  ;;  %v1207_v24 = vmax.f32 %v6461_v55, %v6477_v0  ;;  %5843 = vpow2.f32 %v5061_v44  ;;  %v1118_v41 = vmax.f32 %v1022_v9, %v1070_v47  ;;  %v6555_v44 = vadd.f32 %v6228_v35, %v6446_v28 }
 0x122   : > { %v1164_v42 = vld [vmem:[#allocation2 + $0xa0] sm:$0xf]  ;;  %v1306_v13 = vmax.f32 %v1209_v17, %v1258_v34  ;;  %v928_v26 = vld [vmem:[#allocation2 + $0x88] sm:$0xf]  ;;  %5562 = vmatprep.subr.msk.mxu1 %vm1780_vm4, %v6523_v4  ;;  %v6540_v15 = vld [vmem:[#allocation2 + $0x90] sm:$0xff]  ;;  %891 = vst.msk [vmem:[#allocation2 + $0xc2] sm:$0xff] %vm225_vm1, %v6516_v43  ;;  %v6548_v34 = vadd.f32 %v6433_v1, %v6228_v35  ;;  %v5836_v1 = vpop.eup %5835  ;;  %v6570_v43 = vadd.f32 %v5458_v21, %v6228_v35 }
 0x123   : > { %v1025_v2 = vmax.f32 %v928_v26, %v6494_v36  ;;  %v1212_v31 = vmax.f32 %v1115_v16, %v1164_v42  ;;  %v6544_v17 = vld [vmem:[#allocation2 + $0x98] sm:$0xff]  ;;  %v768_v55 = vadd.f32 1.0, %v5834_v8  ;;  %v1304_v36 = vmax.f32 %v1207_v24, %v6540_v15  ;;  %v6564_v9 = vpop.f32.mrb[30].mxu0  ;;  %v931_v32 = vld [vmem:[#allocation2 + $0xa0] sm:$0xf] }
 0x124   : > { %1354 = vst.msk [vmem:[#allocation3 + $0x40] sm:$0xf] %vm228_vm2, %v1306_v13  ;;  %v980_v22 = vld [vmem:[#allocation2 + $0xb8] sm:$0xf]  ;;  %v6559_v16 = vadd.f32 %v6471_v54, %v6228_v35  ;;  %v6562_v8 = vadd.f32 %v6228_v35, %v624_v62  ;;  %v1023_v47 = vmax.f32 %v6477_v0, %v6540_v15  ;;  %v1210_v42 = vmax.f32 %v1113_v48, %v6540_v15  ;;  %v644_v28 = vpop.f32.mrb[31].mxu0  ;;  %v5838_v57 = vpop.eup %5837 }
 0x125   : > { %v1167_v60 = vld [vmem:[#allocation2 + $0xb8] sm:$0xf]  ;;  %v6551_v63 = vld [vmem:[#allocation2 + $0xa8] sm:$0xff]  ;;  %v1024_v54 = vmax.f32 %v6479_v14, %v6544_v17  ;;  %v1116_v62 = vmax.f32 %v1020_v49, %v6540_v15  ;;  %v1117_v29 = vmax.f32 %v1021_v58, %v6544_v17  ;;  %1352 = vst.msk [vmem:[#allocation3 + $0x30] sm:$0xff] %vm225_vm1, %v1304_v36  ;;  %v6577_v0 = vld [vmem:[#allocation2 + $0xb0] sm:$0xff]  ;;  %v5840_v48 = vpop.eup %5839  ;;  %v1211_v21 = vmax.f32 %v6529_v56, %v6544_v17 }
 0x126   : > { %v1073_v13 = vld [vmem:[#allocation2 + $0xb8] sm:$0xf]  ;;  %v1215_v38 = vmax.f32 %v1118_v41, %v1167_v60  ;;  %v1307_v30 = vmax.f32 %v1210_v42, %v6551_v63  ;;  %v6585_v25 = vld [vmem:[#allocation2 + $0xd0] sm:$0xf]  ;;  %v1026_v58 = vmax.f32 %v6540_v15, %v6551_v63  ;;  %v6592_v52 = vmul.f32 %v5836_v1, %v6296_v33 }
 0x127   : > { %v1261_v26 = vld [vmem:[#allocation2 + $0xb8] sm:$0xf]  ;;  %v1264_v49 = vld [vmem:[#allocation2 + $0xd0] sm:$0xf]  ;;  %5845 = vrcp.f32 %v768_v55  ;;  %v6607_v33 = vmax.f32 %v1023_v47, %v6551_v63  ;;  %v5068_v42 = vmul.f32 -1.442695, %v6548_v34 }
 0x128   : > { %v1309_v24 = vmax.f32 %v1212_v31, %v1261_v26  ;;  %v1028_v31 = vmax.f32 %v931_v32, %v980_v22  ;;  %v6581_v26 = vmax.f32 %v1025_v2, %v1073_v13  ;;  %v1076_v41 = vld [vmem:[#allocation2 + $0xd0] sm:$0xf]  ;;  %v1312_v36 = vmax.f32 %v1215_v38, %v1264_v49  ;;  %8573 = vst [vmem:[#allocation22_spill] sm:$0xff] %v6592_v52  ;;  %v6597_v56 = vld [vmem:[#allocation2 + $0xb8] sm:$0xf] }
 0x129   : > { %v6589_v60 = vld [vmem:[#allocation2 + $0xd0] sm:$0xf]  ;;  %v6595_v32 = vmul.f32 %v5838_v57, %v6302_v40  ;;  %v1027_v2 = vmax.f32 %v6544_v17, %v6577_v0  ;;  %v1213_v22 = vmax.f32 %v1116_v62, %v6551_v63  ;;  %1355 = vst.msk [vmem:[#allocation3 + $0x48] sm:$0xff] %vm225_vm1, %v1307_v30  ;;  %v6603_v15 = vld [vmem:[#allocation2 + $0xc0] sm:$0xff]  ;;  %v862_v13 = vmul.f32 %v5840_v48, %v6314_v51 }
 0x12a   : > { %1357 = vst.msk [vmem:[#allocation3 + $0x58] sm:$0xf] %vm228_vm2, %v1309_v24  ;;  %v6610_v38 = vmax.f32 %v1024_v54, %v6577_v0  ;;  %v1214_v40 = vmax.f32 %v1117_v29, %v6577_v0  ;;  %v1031_v57 = vmax.f32 %v6597_v56, %v6585_v25  ;;  %1360 = vst.msk [vmem:[#allocation3 + $0x70] sm:$0xf] %vm228_vm2, %v1312_v36  ;;  %v5842_v51 = vpop.eup %5841  ;;  %5847 = vpow2.f32 %v6487_v45  ;;  %v6632_v54 = vld [vmem:[#allocation2 + $0xc8] sm:$0xff] }
 0x12b   : > { %8574 = vst [vmem:[#allocation23_spill] sm:$0xff] %v6595_v32  ;;  %894 = vst.msk [vmem:[#allocation2 + $0xe2] sm:$0xff] %vm225_vm1, %v6592_v52  ;;  %v6620_v30 = vmax.f32 %v1028_v31, %v1076_v41  ;;  %v1218_v55 = vmax.f32 %v6581_v26, %v6589_v60  ;;  %v1310_v1 = vmax.f32 %v1213_v22, %v6603_v15  ;;  %v5844_v29 = vpop.eup %5843  ;;  %5849 = vpow2.f32 %v6490_v37 }
 0x12c   : > { %893 = vst.msk [vmem:[#allocation2 + $0xda] sm:$0xff] %vm225_vm1, %v6595_v32  ;;  %896 = vst.msk [vmem:[#allocation2 + $0xfa] sm:$0xff] %vm225_vm1, %v862_v13  ;;  %v1029_v47 = vmax.f32 %v6551_v63, %v6603_v15  ;;  %v5067_v24 = vmul.f32 -1.442695, %v6555_v44  ;;  %v767_v62 = vadd.f32 1.0, %v5844_v29  ;;  %5851 = vpow2.f32 %v6497_v23 }
 0x12d   : > { %1358 = vst.msk [vmem:[#allocation3 + $0x60] sm:$0xff] %vm225_vm1, %v1310_v1  ;;  %v5070_v48 = vmul.f32 -1.442695, %v6559_v16  ;;  %v6639_v45 = vadd.f32 %v6228_v35, %v6518_v6  ;;  %5853 = vpow2.f32 %v6500_v12  ;;  %v5069_v63 = vmul.f32 -1.442695, %v6562_v8 }
 0x12e   : > { %v861_v37 = vmul.f32 %v5842_v51, %v6322_v59  ;;  %v8575_v31 = vmax.f32 %v6506_v20, %v6479_v14  ;;  %5855 = vrcp.f32 %v767_v62  ;;  %v6650_v23 = vadd.f32 %v6564_v9, %v6228_v35 }
 0x12f   : > { %v6653_v49 = vadd.f32 %v6228_v35, %v644_v28  ;;  %v1308_v6 = vmax.f32 %v1211_v21, %v6577_v0  ;;  %5857 = vpow2.f32 %v5068_v42  ;;  %v5072_v12 = vmul.f32 -1.442695, %v6570_v43  ;;  %v5176_v35 = vld [vmem:[%s8523_s3 + $0x6] sm:$0x3] }
 0x130   : > { %v1305_v26 = vmax.f32 %v8575_v31, %v6544_v17  ;;  %895 = vst.msk [vmem:[#allocation2 + $0xf2] sm:$0xff] %vm225_vm1, %v861_v37  ;;  %v1311_v59 = vmax.f32 %v1214_v40, %v6632_v54  ;;  %5538 = vmatprep.mubr.msk.f32.mxu1 %vm225_vm1, %v861_v37  ;;  %v1299_v20 = vmax.f32 %v6436_v39, %v6458_v27  ;;  %v6666_v17 = vld [vmem:[#allocation2 + $0xd0] sm:$0xf]  ;;  %5859 = vpow2.f32 %v5067_v24 }
 0x131   : > { %v1030_v9 = vmax.f32 %v6577_v0, %v6632_v54  ;;  %v6673_v41 = vmul.f32 -1.442695, %v6639_v45  ;;  %1356 = vst.msk [vmem:[#allocation3 + $0x50] sm:$0xff] %vm225_vm1, %v1308_v6  ;;  %5539 = vmatmul.mubr.msk.f32.vlgmr.msra.gmra.mrb[0].mxu1 %vm225_vm1, %v862_v13  ;;  %v8576_v39 = vmax.f32 %v6428_v61, %v6458_v27  ;;  %v6682_v36 = vmax.f32 %v1026_v58, %v6603_v15  ;;  %v5846_v61 = vpop.eup %5845 }
 0x132   : > { %1353 = vst.msk [vmem:[#allocation3 + $0x38] sm:$0xff] %vm225_vm1, %v1305_v26  ;;  %v6670_v28 = vld [vmem:[#allocation2 + $0xe8] sm:$0xf]  ;;  %v6685_v0 = vmax.f32 %v1027_v2, %v6632_v54  ;;  %v1216_v22 = vmax.f32 %v6607_v33, %v6603_v15  ;;  %5861 = vpow2.f32 %v5070_v48  ;;  %1359 = vst.msk [vmem:[#allocation3 + $0x68] sm:$0xff] %vm225_vm1, %v1311_v59  ;;  %5563 = vmatpush3.msk.msra.mxu1 %vm1780_vm4, %v6523_v4  ;;  %v6700_v2 = vmul.f32 -1.442695, %v6650_v23 }
 0x133   : > { %v1079_v21 = vld [vmem:[#allocation2 + $0xe8] sm:$0xf]  ;;  %v1302_v60 = vmax.f32 %v8576_v39, %v6479_v14  ;;  %v6689_v1 = vld [vmem:[#allocation2 + $0xd8] sm:$0xff]  ;;  %1347 = vst.msk [vmem:[#allocation3 + $0x8] sm:$0xff] %vm225_vm1, %v1299_v20  ;;  %v1217_v27 = vmax.f32 %v6610_v38, %v6632_v54  ;;  %v6697_v58 = vld [vmem:[#allocation2 + $0xe0] sm:$0xff]  ;;  %5612 = vmatprep.subr.msk.mxu1 %vm1780_vm4, %v5176_v35  ;;  %v1034_v4 = vmax.f32 %v6666_v17, %v6670_v28  ;;  %5863 = vpow2.f32 %v5069_v63 }
 0x134   : > { %v1173_v40 = vld [vmem:[#allocation2 + $0xe8] sm:$0xf]  ;;  %v6703_v13 = vmul.f32 -1.442695, %v6653_v49  ;;  %v6712_v33 = vmax.f32 %v1031_v57, %v1079_v21  ;;  %v1270_v29 = vld [vmem:[#allocation2 + $0x100] sm:$0xf]  ;;  %v5848_v42 = vpop.eup %5847  ;;  %v1033_v24 = vmax.f32 %v6632_v54, %v6697_v58  ;;  %v6721_v62 = vmax.f32 %v1029_v47, %v6689_v1 }
 0x135   : > { %v1267_v51 = vld [vmem:[#allocation2 + $0xe8] sm:$0xf]  ;;  %1350 = vst.msk [vmem:[#allocation3 + $0x20] sm:$0xff] %vm225_vm1, %v1302_v60  ;;  %v1221_v38 = vmax.f32 %v6620_v30, %v1173_v40  ;;  %v6724_v48 = vmax.f32 %v1030_v9, %v6697_v58  ;;  %v1313_v25 = vmax.f32 %v1216_v22, %v6689_v1  ;;  %v6727_v56 = vld [vmem:[#allocation2 + $0x100] sm:$0xf]  ;;  %v5850_v57 = vpop.eup %5849  ;;  %v864_v26 = vmul.f32 %v5846_v61, %v6345_v18 }
 0x136   : > { %v1315_v14 = vmax.f32 %v1218_v55, %v1267_v51  ;;  %v1032_v55 = vmax.f32 %v6603_v15, %v6689_v1  ;;  %v1082_v30 = vld [vmem:[#allocation2 + $0x100] sm:$0xf]  ;;  %v770_v6 = vadd.f32 1.0, %v5848_v42  ;;  %v5852_v59 = vpop.eup %5851  ;;  %v6732_v20 = vld [vmem:[#allocation2 + $0xe8] sm:$0xf]  ;;  %v1219_v47 = vmax.f32 %v6682_v36, %v6689_v1 }
 0x137   : > { %v6729_v37 = vld [vmem:[#allocation2 + $0x100] sm:$0xf]  ;;  %v1318_v31 = vmax.f32 %v1221_v38, %v1270_v29  ;;  %1361 = vst.msk [vmem:[#allocation3 + $0x78] sm:$0xff] %vm225_vm1, %v1313_v25  ;;  %v769_v35 = vadd.f32 1.0, %v5850_v57  ;;  %5865 = vpow2.f32 %v5072_v12  ;;  %v6737_v17 = vld [vmem:[#allocation2 + $0xf0] sm:$0xff]  ;;  %v6739_v9 = vld [vmem:[#allocation2 + $0xf8] sm:$0xff]  ;;  %v1314_v28 = vmax.f32 %v1217_v27, %v6697_v58  ;;  %v5854_v21 = vpop.eup %5853 }
 0x138   : > { %1363 = vst.msk [vmem:[#allocation3 + $0x88] sm:$0xf] %vm228_vm2, %v1315_v14  ;;  %v1220_v18 = vmax.f32 %v6685_v0, %v6697_v58  ;;  %v1037_v63 = vmax.f32 %v6732_v20, %v6727_v56  ;;  %5867 = vrcp.f32 %v770_v6  ;;  %v772_v39 = vadd.f32 1.0, %v5852_v59  ;;  %v6748_v12 = vld [vmem:[#allocation3 + $0x30] sm:$0xff]  ;;  %v6750_v60 = vld [vmem:[#allocation3 + $0x48] sm:$0xff]  ;;  %v5856_v36 = vpop.eup %5855 }
 0x139   : > { %1366 = vst.msk [vmem:[#allocation3 + $0xa0] sm:$0xf] %vm228_vm2, %v1318_v31  ;;  %v6752_v22 = vmax.f32 %v1034_v4, %v1082_v30  ;;  %v1224_v40 = vmax.f32 %v6712_v33, %v6729_v37  ;;  %5869 = vrcp.f32 %v769_v35  ;;  %v771_v0 = vadd.f32 1.0, %v5854_v21  ;;  %v1399_v51 = vld [vmem:[#allocation3 + $0x38] sm:$0xff]  ;;  %v5858_v14 = vpop.eup %5857  ;;  %v1401_v42 = vld [vmem:[#allocation3 + $0x50] sm:$0xff]  ;;  %v1402_v35 = vld [vmem:[#allocation3 + $0x60] sm:$0xff] }
 0x13a   : > { %898 = vst.msk [vmem:[#allocation2 + $0x112] sm:$0xff] %vm225_vm1, %v864_v26  ;;  %1362 = vst.msk [vmem:[#allocation3 + $0x80] sm:$0xff] %vm225_vm1, %v1314_v28  ;;  %v1430_v61 = vld [vmem:[#allocation3 + $0x31] sm:$0xff]  ;;  %v1431_v27 = vld [vmem:[#allocation3 + $0x39] sm:$0xff]  ;;  %v863_v38 = vmul.f32 %v5856_v36, %v6381_v53  ;;  %5871 = vrcp.f32 %v772_v39  ;;  %v1035_v29 = vmax.f32 %v6689_v1, %v6737_v17  ;;  %v5860_v30 = vpop.eup %5859  ;;  %v774_v31 = vadd.f32 1.0, %v5858_v14 }
 0x13b   : > { %v1432_v25 = vld [vmem:[#allocation3 + $0x49] sm:$0xff]  ;;  %v1433_v57 = vld [vmem:[#allocation3 + $0x51] sm:$0xff]  ;;  %5873 = vrcp.f32 %v771_v0  ;;  %v1316_v6 = vmax.f32 %v1219_v47, %v6737_v17  ;;  %v1317_v59 = vmax.f32 %v1220_v18, %v6739_v9  ;;  %v1434_v28 = vld [vmem:[#allocation3 + $0x61] sm:$0xff]  ;;  %v773_v21 = vadd.f32 1.0, %v5860_v30 }
 0x13c   : > { %v5862_v53 = vpop.eup %5861  ;;  %897 = vst.msk [vmem:[#allocation2 + $0x10a] sm:$0xff] %vm225_vm1, %v863_v38  ;;  %5875 = vpow2.f32 %v6673_v41  ;;  %v6766_v39 = vld [vmem:[#allocation3 + $0x68] sm:$0xff]  ;;  %v1462_v4 = vmax.f32 %v6748_v12, %v1430_v61  ;;  %v1463_v0 = vmax.f32 %v1399_v51, %v1431_v27  ;;  %5541 = vmatprep.mubr.msk.f32.mxu1 %vm225_vm1, %v863_v38  ;;  %v1464_v18 = vmax.f32 %v6750_v60, %v1432_v25  ;;  %v1494_v30 = vld [vmem:[#allocation3 + $0x32] sm:$0xff]  ;;  %v1495_v61 = vld [vmem:[#allocation3 + $0x3a] sm:$0xff] }
 0x13d   : > { %v6768_v36 = vld [vmem:[#allocation3 + $0x69] sm:$0xff]  ;;  %5877 = vrcp.f32 %v774_v31  ;;  %v776_v47 = vadd.f32 1.0, %v5862_v53  ;;  %1364 = vst.msk [vmem:[#allocation3 + $0x90] sm:$0xff] %vm225_vm1, %v1316_v6  ;;  %1365 = vst.msk [vmem:[#allocation3 + $0x98] sm:$0xff] %vm225_vm1, %v1317_v59  ;;  %v1465_v14 = vmax.f32 %v1401_v42, %v1433_v57  ;;  %5542 = vmatmul.mubr.msk.f32.gmra.mrb[2].mxu1 %vm225_vm1, %v864_v26  ;;  %v6780_v41 = vmax.f32 %v1032_v55, %v6737_v17  ;;  %v1497_v27 = vld [vmem:[#allocation3 + $0x52] sm:$0xff]  ;;  %v5864_v25 = vpop.eup %5863 }
 0x13e   : > { %5879 = vrcp.f32 %v773_v21  ;;  %v6786_v12 = vmax.f32 %v1033_v24, %v6739_v9  ;;  %v1466_v51 = vmax.f32 %v1402_v35, %v1434_v28  ;;  %v1496_v60 = vld [vmem:[#allocation3 + $0x4a] sm:$0xff]  ;;  %v6788_v38 = vld [vmem:[#allocation2 + $0x100] sm:$0xf]  ;;  %v1222_v15 = vmax.f32 %v6721_v62, %v6737_v17  ;;  %v6801_v6 = vld [vmem:[#allocation3 + $0x78] sm:$0xff] }
 0x13f   : > { %5881 = vrcp.f32 %v776_v47  ;;  %v1223_v55 = vmax.f32 %v6724_v48, %v6739_v9  ;;  %v1467_v54 = vmax.f32 %v6766_v39, %v6768_v36  ;;  %v1498_v24 = vld [vmem:[#allocation3 + $0x62] sm:$0xff]  ;;  %v6803_v59 = vmax.f32 %v1462_v4, %v1494_v30  ;;  %v6830_v47 = vld [vmem:[#allocation3 + $0x33] sm:$0xff] }
 0x140   : > { %5883 = vpow2.f32 %v6700_v2  ;;  %v6805_v35 = vmax.f32 %v1463_v0, %v1495_v61  ;;  %v6807_v62 = vmax.f32 %v1464_v18, %v1496_v60  ;;  %v775_v53 = vadd.f32 1.0, %v5864_v25 }
 0x141   : > { %v6790_v26 = vld [vmem:[#allocation2 + $0x118] sm:$0xf]  ;;  %v5866_v28 = vpop.eup %5865  ;;  %5885 = vpow2.f32 %v6703_v13  ;;  %v6813_v21 = vld [vmem:[#allocation3 + $0x80] sm:$0xff]  ;;  %v6819_v4 = vmax.f32 %v1465_v14, %v1497_v27  ;;  %v6828_v13 = vmax.f32 %v1466_v51, %v1498_v24 }
 0x142   : > { %v1085_v42 = vld [vmem:[#allocation2 + $0x118] sm:$0xf]  ;;  %v6817_v2 = vld [vmem:[#allocation3 + $0x81] sm:$0xff]  ;;  %v5868_v36 = vpop.eup %5867  ;;  %v1040_v0 = vmax.f32 %v6788_v38, %v6790_v26  ;;  %v778_v37 = vadd.f32 1.0, %v5866_v28  ;;  %5887 = vrcp.f32 %v775_v53 }
 0x143   : > { %v6798_v57 = vld [vmem:[#allocation2 + $0x118] sm:$0xf]  ;;  %v6826_v33 = vmax.f32 %v1037_v63, %v1085_v42  ;;  %v5870_v18 = vpop.eup %5869  ;;  %v6835_v30 = vld [vmem:[#allocation2 + $0x108] sm:$0xff]  ;;  %v6837_v61 = vld [vmem:[#allocation2 + $0x110] sm:$0xff]  ;;  %v866_v56 = vmul.f32 %v5868_v36, %v6404_v3  ;;  %v1469_v25 = vmax.f32 %v6813_v21, %v6817_v2 }
 0x144   : > { %v1273_v31 = vld [vmem:[#allocation2 + $0x118] sm:$0xf]  ;;  %v1227_v14 = vmax.f32 %v6752_v22, %v6798_v57  ;;  %v5872_v51 = vpop.eup %5871  ;;  %v865_v60 = vmul.f32 %v5870_v18, %v6407_v7  ;;  %5889 = vrcp.f32 %v778_v37  ;;  %v1406_v27 = vld [vmem:[#allocation3 + $0x90] sm:$0xff]  ;;  %v1590_v7 = vmax.f32 %v6803_v59, %v6830_v47 }
 0x145   : > { %v1321_v48 = vmax.f32 %v1224_v40, %v1273_v31  ;;  %v6815_v39 = vld [vmem:[#allocation3 + $0x79] sm:$0xff]  ;;  %v1499_v40 = vld [vmem:[#allocation3 + $0x6a] sm:$0xff]  ;;  %v5874_v28 = vpop.eup %5873  ;;  %900 = vst.msk [vmem:[#allocation2 + $0x12a] sm:$0xff] %vm225_vm1, %v866_v56  ;;  %v868_v3 = vmul.f32 %v5872_v51, %v6441_v46  ;;  %v1319_v46 = vmax.f32 %v1222_v15, %v6835_v30  ;;  %v1320_v2 = vmax.f32 %v1223_v55, %v6837_v61 }
 0x146   : > { %v1468_v20 = vmax.f32 %v6801_v6, %v6815_v39  ;;  %v6842_v63 = vld [vmem:[#allocation3 + $0x3b] sm:$0xff]  ;;  %v1438_v24 = vld [vmem:[#allocation3 + $0x91] sm:$0xff]  ;;  %v6847_v31 = vmax.f32 %v1467_v54, %v1499_v40  ;;  %v1038_v6 = vmax.f32 %v6737_v17, %v6835_v30  ;;  %v5876_v39 = vpop.eup %5875  ;;  %899 = vst.msk [vmem:[#allocation2 + $0x122] sm:$0xff] %vm225_vm1, %v865_v60  ;;  %v867_v54 = vmul.f32 %v5874_v28, %v6444_v5 }
 0x147   : > { %1369 = vst.msk [vmem:[#allocation3 + $0xb8] sm:$0xf] %vm228_vm2, %v1321_v48  ;;  %v1407_v42 = vld [vmem:[#allocation3 + $0x98] sm:$0xff]  ;;  %v1591_v53 = vmax.f32 %v6805_v35, %v6842_v63  ;;  %5544 = vmatprep.mubr.msk.f32.mxu1 %vm225_vm1, %v865_v60  ;;  %v5878_v36 = vpop.eup %5877  ;;  %v777_v59 = vadd.f32 1.0, %v5876_v39  ;;  %v6869_v35 = vmax.f32 %v1035_v29, %v6835_v30  ;;  %v1470_v5 = vmax.f32 %v1406_v27, %v1438_v24  ;;  %v1560_v40 = vld [vmem:[#allocation3 + $0x4b] sm:$0xff]  ;;  %v1501_v29 = vld [vmem:[#allocation3 + $0x82] sm:$0xff] }
 0x148   : > { %v1439_v48 = vld [vmem:[#allocation3 + $0x99] sm:$0xff]  ;;  %902 = vst.msk [vmem:[#allocation2 + $0x142] sm:$0xff] %vm225_vm1, %v868_v3  ;;  %5545 = vmatmul.mubr.msk.f32.gmra.mrb[4].mxu1 %vm225_vm1, %v866_v56  ;;  %v5880_v15 = vpop.eup %5879  ;;  %901 = vst.msk [vmem:[#allocation2 + $0x13a] sm:$0xff] %vm225_vm1, %v867_v54  ;;  %v6874_v55 = vmul.f32 %v5878_v36, %v6548_v34  ;;  %v8577_v18 = vmax.f32 %v6697_v58, %v6739_v9  ;;  %v1592_v56 = vmax.f32 %v6807_v62, %v1560_v40  ;;  %v6892_v24 = vld [vmem:[#allocation3 + $0x63] sm:$0xff] }
 0x149   : > { %v1471_v37 = vmax.f32 %v1407_v42, %v1439_v48  ;;  %v1561_v47 = vld [vmem:[#allocation3 + $0x53] sm:$0xff]  ;;  %1367 = vst.msk [vmem:[#allocation3 + $0xa8] sm:$0xff] %vm225_vm1, %v1319_v46  ;;  %1368 = vst.msk [vmem:[#allocation3 + $0xb0] sm:$0xff] %vm225_vm1, %v1320_v2  ;;  %5547 = vmatprep.mubr.msk.f32.mxu1 %vm225_vm1, %v867_v54  ;;  %v5882_v34 = vpop.eup %5881  ;;  %v869_v60 = vmul.f32 %v5880_v15, %v6555_v44  ;;  %5891 = vrcp.f32 %v777_v59  ;;  %v6894_v28 = vld [vmem:[#allocation3 + $0x6b] sm:$0xff] }
 0x14a   : > { %v6880_v63 = vmax.f32 %v8577_v18, %v6837_v61  ;;  %v1500_v1 = vld [vmem:[#allocation3 + $0x7a] sm:$0xff]  ;;  %v1593_v51 = vmax.f32 %v6819_v4, %v1561_v47  ;;  %v1502_v27 = vld [vmem:[#allocation3 + $0x92] sm:$0xff]  ;;  %v6890_v42 = vmax.f32 %v1469_v25, %v1501_v29  ;;  %v5884_v48 = vpop.eup %5883  ;;  %904 = vst.msk [vmem:[#allocation2 + $0x15a] sm:$0xff] %vm225_vm1, %v6874_v55  ;;  %v6899_v62 = vmul.f32 %v5882_v34, %v6559_v16  ;;  %v6909_v54 = vld [vmem:[#allocation3 + $0x83] sm:$0xff] }
 0x14b   : > { %v6888_v58 = vmax.f32 %v1468_v20, %v1500_v1  ;;  %v1503_v20 = vld [vmem:[#allocation3 + $0x9a] sm:$0xff]  ;;  %v6905_v25 = vmax.f32 %v1470_v5, %v1502_v27  ;;  %v5886_v2 = vpop.eup %5885  ;;  %903 = vst.msk [vmem:[#allocation2 + $0x152] sm:$0xff] %vm225_vm1, %v869_v60  ;;  %v780_v36 = vadd.f32 1.0, %v5884_v48  ;;  %v1624_v5 = vld [vmem:[#allocation3 + $0x4c] sm:$0xff] }
 0x14c   : > { %v6907_v39 = vld [vmem:[#allocation3 + $0x7b] sm:$0xff]  ;;  %v6912_v16 = vmax.f32 %v1471_v37, %v1503_v20  ;;  %5548 = vmatmul.mubr.msk.f32.gmra.mrb[6].mxu1 %vm225_vm1, %v868_v3  ;;  %v995_v1 = vld [vmem:[#allocation2 + $0x130] sm:$0xf]  ;;  %906 = vst.msk [vmem:[#allocation2 + $0x172] sm:$0xff] %vm225_vm1, %v6899_v62  ;;  %v6927_v48 = vmax.f32 %v1592_v56, %v1624_v5  ;;  %v5888_v40 = vpop.eup %5887  ;;  %v779_v44 = vadd.f32 1.0, %v5886_v2 }
 0x14d   : > { %v1622_v46 = vld [vmem:[#allocation3 + $0x34] sm:$0xff]  ;;  %v1623_v47 = vld [vmem:[#allocation3 + $0x3c] sm:$0xff]  ;;  %v1088_v29 = vld [vmem:[#allocation2 + $0x130] sm:$0xf]  ;;  %5550 = vmatprep.mubr.msk.f32.mxu1 %vm225_vm1, %v869_v60  ;;  %5893 = vrcp.f32 %v780_v36 }
 0x14e   : > { %v1625_v15 = vld [vmem:[#allocation3 + $0x54] sm:$0xff]  ;;  %v6923_v37 = vmax.f32 %v1590_v7, %v1622_v46  ;;  %v6925_v27 = vmax.f32 %v1591_v53, %v1623_v47  ;;  %v1182_v3 = vld [vmem:[#allocation2 + $0x130] sm:$0xf]  ;;  %v6932_v4 = vld [vmem:[#allocation2 + $0x120] sm:$0xff]  ;;  %v5890_v53 = vpop.eup %5889  ;;  %v871_v47 = vmul.f32 %v5888_v40, %v6562_v8  ;;  %2339 = vst.msk [vmem:[#allocation2 + $0x7a] sm:$0xff] %vm225_vm1, %v6927_v48  ;;  %v1136_v8 = vmax.f32 %v1040_v0, %v1088_v29 }
 0x14f   : > { %v946_v18 = vld [vmem:[#allocation2 + $0x118] sm:$0xf]  ;;  %v6929_v20 = vmax.f32 %v1593_v51, %v1625_v15  ;;  %v1276_v59 = vld [vmem:[#allocation2 + $0x130] sm:$0xf]  ;;  %v1230_v56 = vmax.f32 %v6826_v33, %v1182_v3  ;;  %v6942_v60 = vld [vmem:[#allocation2 + $0x128] sm:$0xff]  ;;  %5895 = vrcp.f32 %v779_v44  ;;  %v1041_v5 = vmax.f32 %v6835_v30, %v6932_v4 }
 0x150   : > { %v6921_v34 = vld [vmem:[#allocation3 + $0x93] sm:$0xff]  ;;  %v1324_v51 = vmax.f32 %v1227_v14, %v1276_v59  ;;  %v998_v46 = vld [vmem:[#allocation2 + $0x148] sm:$0xf]  ;;  %v6945_v36 = vld [vmem:[#allocation3 + $0x9b] sm:$0xff]  ;;  %2337 = vst.msk [vmem:[#allocation2 + $0x62] sm:$0xff] %vm225_vm1, %v6923_v37  ;;  %v1043_v22 = vmax.f32 %v946_v18, %v995_v1  ;;  %v6961_v59 = vmul.f32 %v5890_v53, %v6570_v43  ;;  %5551 = vmatmul.mubr.msk.f32.gmra.mrb[8].mxu1 %vm225_vm1, %v6874_v55 }
 0x151   : > { %2338 = vst.msk [vmem:[#allocation2 + $0x6a] sm:$0xff] %vm225_vm1, %v6925_v27  ;;  %2340 = vst.msk [vmem:[#allocation2 + $0x82] sm:$0xff] %vm225_vm1, %v6929_v20  ;;  %v1091_v57 = vld [vmem:[#allocation2 + $0x148] sm:$0xf]  ;;  %v949_v40 = vld [vmem:[#allocation2 + $0x130] sm:$0xf]  ;;  %v1042_v38 = vmax.f32 %v6837_v61, %v6942_v60  ;;  %5553 = vmatprep.mubr.msk.f32.mxu1 %vm225_vm1, %v871_v47  ;;  %v6984_v53 = vmax.f32 %v1038_v6, %v6932_v4 }
 0x152   : > { %v1185_v33 = vld [vmem:[#allocation2 + $0x148] sm:$0xf]  ;;  %1372 = vst.msk [vmem:[#allocation3 + $0xd0] sm:$0xf] %vm228_vm2, %v1324_v51  ;;  %v6970_v0 = vld [vmem:[#allocation2 + $0x138] sm:$0xff]  ;;  %v6972_v15 = vld [vmem:[#allocation2 + $0x140] sm:$0xff]  ;;  %v1046_v44 = vmax.f32 %v949_v40, %v998_v46  ;;  %v1139_v18 = vmax.f32 %v1043_v22, %v1091_v57 }
 0x153   : > { %v1279_v14 = vld [vmem:[#allocation2 + $0x148] sm:$0xf]  ;;  %905 = vst.msk [vmem:[#allocation2 + $0x16a] sm:$0xff] %vm225_vm1, %v871_v47  ;;  %v1233_v1 = vmax.f32 %v1136_v8, %v1185_v33  ;;  %v1001_v29 = vld [vmem:[#allocation2 + $0x160] sm:$0xf]  ;;  %908 = vst.msk [vmem:[#allocation2 + $0x18a] sm:$0xff] %vm225_vm1, %v6961_v59  ;;  %v1045_v51 = vmax.f32 %v6942_v60, %v6972_v15  ;;  %v1137_v46 = vmax.f32 %v1041_v5, %v6970_v0  ;;  %v5892_v17 = vpop.eup %5891 }
 0x154   : > { %v1327_v26 = vmax.f32 %v1230_v56, %v1279_v14  ;;  %v952_v55 = vld [vmem:[#allocation2 + $0x148] sm:$0xf]  ;;  %v1094_v3 = vld [vmem:[#allocation2 + $0x160] sm:$0xf]  ;;  %v1044_v56 = vmax.f32 %v6932_v4, %v6970_v0  ;;  %v6993_v47 = vmax.f32 %v1042_v38, %v6972_v15  ;;  %v6995_v57 = vld [vmem:[#allocation2 + $0x150] sm:$0xff]  ;;  %5554 = vmatmul.mubr.msk.f32.gmra.mrb[10].mxu1 %vm225_vm1, %v6899_v62 }
 0x155   : > { %v1188_v22 = vld [vmem:[#allocation2 + $0x160] sm:$0xf]  ;;  %v1049_v6 = vmax.f32 %v952_v55, %v1001_v29  ;;  %v1142_v33 = vmax.f32 %v1046_v44, %v1094_v3  ;;  %v6999_v43 = vld [vmem:[#allocation2 + $0x178] sm:$0xf]  ;;  %v1047_v5 = vmax.f32 %v6970_v0, %v6995_v57  ;;  %v8578_v55 = vmax.f32 %v6739_v9, %v6837_v61 }
 0x156   : > { %1375 = vst.msk [vmem:[#allocation3 + $0xe8] sm:$0xf] %vm228_vm2, %v1327_v26  ;;  %v1282_v8 = vld [vmem:[#allocation2 + $0x160] sm:$0xf]  ;;  %v1236_v14 = vmax.f32 %v1139_v18, %v1188_v22  ;;  %v6997_v26 = vld [vmem:[#allocation2 + $0x158] sm:$0xff]  ;;  %v7006_v38 = vmax.f32 %v1044_v56, %v6995_v57  ;;  %v1228_v18 = vmax.f32 %v6869_v35, %v6932_v4  ;;  %v1234_v3 = vmax.f32 %v1137_v46, %v6995_v57  ;;  %v1408_v22 = vld [vmem:[#allocation3 + $0xa8] sm:$0xff] }
 0x157   : > { %v1330_v40 = vmax.f32 %v1233_v1, %v1282_v8  ;;  %v1097_v2 = vld [vmem:[#allocation2 + $0x178] sm:$0xf]  ;;  %v1135_v44 = vmax.f32 %v8578_v55, %v6942_v60  ;;  %v7014_v1 = vld [vmem:[#allocation2 + $0x160] sm:$0xf]  ;;  %v1048_v62 = vmax.f32 %v6972_v15, %v6997_v26  ;;  %v7020_v29 = vmax.f32 %v1045_v51, %v6997_v26  ;;  %v1440_v8 = vld [vmem:[#allocation3 + $0xa9] sm:$0xff]  ;;  %v5894_v52 = vpop.eup %5893 }
 0x158   : > { %v1191_v7 = vld [vmem:[#allocation2 + $0x178] sm:$0xf]  ;;  %v1235_v9 = vmax.f32 %v6993_v47, %v6997_v26  ;;  %v1052_v35 = vmax.f32 %v7014_v1, %v6999_v43  ;;  %v7027_v55 = vmax.f32 %v1049_v6, %v1097_v2  ;;  %v8580_v2 = vmax.f32 %v6786_v12, %v6837_v61 }
 0x159   : > { %v1285_v21 = vld [vmem:[#allocation2 + $0x178] sm:$0xf]  ;;  %1378 = vst.msk [vmem:[#allocation3 + $0x100] sm:$0xf] %vm228_vm2, %v1330_v40  ;;  %v873_v40 = vmul.f32 %v5892_v17, %v6639_v45  ;;  %v1239_v32 = vmax.f32 %v1142_v33, %v1191_v7  ;;  %v1325_v45 = vmax.f32 %v1228_v18, %v6970_v0  ;;  %v1229_v7 = vmax.f32 %v6880_v63, %v6942_v60 }
 0x15a   : > { %v1333_v56 = vmax.f32 %v1236_v14, %v1285_v21  ;;  %v7031_v51 = vld [vmem:[#allocation2 + $0x168] sm:$0xff]  ;;  %v7033_v46 = vld [vmem:[#allocation2 + $0x170] sm:$0xff]  ;;  %v8579_v21 = vmax.f32 %v6780_v41, %v6835_v30  ;;  %v1323_v6 = vmax.f32 %v8580_v2, %v6942_v60  ;;  %v1231_v17 = vmax.f32 %v6984_v53, %v6970_v0  ;;  %v5896_v41 = vpop.eup %5895 }
 0x15b   : > { %907 = vst.msk [vmem:[#allocation2 + $0x182] sm:$0xff] %vm225_vm1, %v873_v40  ;;  %v1232_v33 = vmax.f32 %v1135_v44, %v6972_v15  ;;  %v1472_v14 = vmax.f32 %v1408_v22, %v1440_v8  ;;  %5556 = vmatprep.mubr.msk.f32.mxu1 %vm225_vm1, %v873_v40  ;;  %v1050_v12 = vmax.f32 %v6995_v57, %v7031_v51  ;;  %1373 = vst.msk [vmem:[#allocation3 + $0xd8] sm:$0xff] %vm225_vm1, %v1325_v45  ;;  %v1409_v60 = vld [vmem:[#allocation3 + $0xb0] sm:$0xff]  ;;  %v1626_v53 = vld [vmem:[#allocation3 + $0x64] sm:$0xff] }
 0x15c   : > { %1381 = vst.msk [vmem:[#allocation3 + $0x118] sm:$0xf] %vm228_vm2, %v1333_v56  ;;  %v1322_v47 = vmax.f32 %v8579_v21, %v6932_v4  ;;  %v1051_v30 = vmax.f32 %v6997_v26, %v7033_v46  ;;  %v7056_v61 = vmax.f32 %v1047_v5, %v7031_v51  ;;  %v1331_v63 = vmax.f32 %v1234_v3, %v7031_v51  ;;  %v1288_v4 = vld [vmem:[#allocation2 + $0x190] sm:$0xf]  ;;  %v1628_v22 = vld [vmem:[#allocation3 + $0x7c] sm:$0xff]  ;;  %v1629_v8 = vld [vmem:[#allocation3 + $0x84] sm:$0xff] }
 0x15d   : > { %1371 = vst.msk [vmem:[#allocation3 + $0xc8] sm:$0xff] %vm225_vm1, %v1323_v6  ;;  %v1441_v0 = vld [vmem:[#allocation3 + $0xb1] sm:$0xff]  ;;  %5557 = vmatmul.mubr.msk.f32.gmra.mrb[12].mxu1 %vm225_vm1, %v6961_v59  ;;  %v7065_v44 = vmax.f32 %v1048_v62, %v7033_v46  ;;  %v1237_v5 = vmax.f32 %v7006_v38, %v7031_v51  ;;  %v1336_v18 = vmax.f32 %v1239_v32, %v1288_v4  ;;  %v7070_v21 = vld [vmem:[#allocation3] sm:$0xff] }
 0x15e   : > { %1370 = vst.msk [vmem:[#allocation3 + $0xc0] sm:$0xff] %vm225_vm1, %v1322_v47  ;;  %v876_v3 = vmul.f32 %v5894_v52, %v6650_v23  ;;  %v1627_v56 = vld [vmem:[#allocation3 + $0x6c] sm:$0xff]  ;;  %v1630_v40 = vld [vmem:[#allocation3 + $0x94] sm:$0xff]  ;;  %1379 = vst.msk [vmem:[#allocation3 + $0x108] sm:$0xff] %vm225_vm1, %v1331_v63  ;;  %v875_v59 = vmul.f32 %v5896_v41, %v6653_v49  ;;  %v1326_v62 = vmax.f32 %v1229_v7, %v6972_v15 }
 0x15f   : > { %v1100_v47 = vld [vmem:[#allocation2 + $0x190] sm:$0xf]  ;;  %v1328_v2 = vmax.f32 %v1231_v17, %v6995_v57  ;;  %v1329_v6 = vmax.f32 %v1232_v33, %v6997_v26  ;;  %v1631_v45 = vld [vmem:[#allocation3 + $0x9c] sm:$0xff]  ;;  %1384 = vst.msk [vmem:[#allocation3 + $0x130] sm:$0xf] %vm228_vm2, %v1336_v18  ;;  %v1332_v49 = vmax.f32 %v1235_v9, %v7033_v46  ;;  %v1473_v41 = vmax.f32 %v1409_v60, %v1441_v0  ;;  %v7091_v33 = vld [vmem:[#allocation3 + $0x8] sm:$0xff] }
 0x160   : > { %v1504_v32 = vld [vmem:[#allocation3 + $0xaa] sm:$0xff]  ;;  %v7077_v52 = vld [vmem:[#allocation3 + $0x1] sm:$0xff]  ;;  %v7079_v23 = vld [vmem:[#allocation3 + $0x18] sm:$0xff]  ;;  %910 = vst.msk [vmem:[#allocation2 + $0x1a2] sm:$0xff] %vm225_vm1, %v876_v3  ;;  %v8581_v7 = vmax.f32 %v6828_v13, %v6892_v24  ;;  %v8583_v13 = vmax.f32 %v6888_v58, %v6907_v39  ;;  %v8584_v0 = vmax.f32 %v6890_v42, %v6909_v54  ;;  %v8585_v18 = vmax.f32 %v6905_v25, %v6921_v34 }
 0x161   : > { %v7081_v4 = vld [vmem:[#allocation2 + $0x190] sm:$0xf]  ;;  %v1536_v15 = vmax.f32 %v1472_v14, %v1504_v32  ;;  %909 = vst.msk [vmem:[#allocation2 + $0x19a] sm:$0xff] %vm225_vm1, %v875_v59  ;;  %1374 = vst.msk [vmem:[#allocation3 + $0xe0] sm:$0xff] %vm225_vm1, %v1326_v62  ;;  %v8582_v14 = vmax.f32 %v6847_v31, %v6894_v28  ;;  %v7121_v31 = vld [vmem:[#allocation3 + $0x19] sm:$0xff]  ;;  %5559 = vmatprep.mubr.msk.f32.mxu1 %vm225_vm1, %v875_v59  ;;  %v1238_v58 = vmax.f32 %v7020_v29, %v7033_v46 }
 0x162   : > { %v7089_v17 = vmax.f32 %v8581_v7, %v1626_v53  ;;  %v7093_v63 = vld [vmem:[#allocation3 + $0x9] sm:$0xff]  ;;  %1376 = vst.msk [vmem:[#allocation3 + $0xf0] sm:$0xff] %vm225_vm1, %v1328_v2  ;;  %1377 = vst.msk [vmem:[#allocation3 + $0xf8] sm:$0xff] %vm225_vm1, %v1329_v6  ;;  %v7107_v24 = vmax.f32 %v8583_v13, %v1628_v22  ;;  %v7112_v53 = vmax.f32 %v8584_v0, %v1629_v8  ;;  %v7119_v2 = vld [vmem:[#allocation2 + $0x78] sm:$0xff]  ;;  %5560 = vmatmul.mubr.msk.f32.gmra.mrb[14].mxu1 %vm225_vm1, %v876_v3 }
 0x163   : > { %v1568_v9 = vld [vmem:[#allocation3 + $0xab] sm:$0xff]  ;;  %v7102_v60 = vmax.f32 %v8582_v14, %v1627_v56  ;;  %v7117_v62 = vmax.f32 %v8585_v18, %v1630_v40  ;;  %v7129_v42 = vmax.f32 %v1052_v35, %v1100_v47  ;;  %1380 = vst.msk [vmem:[#allocation3 + $0x110] sm:$0xff] %vm225_vm1, %v1332_v49  ;;  %v8586_v39 = vmax.f32 %v6912_v16, %v6945_v36  ;;  %v7142_v43 = vld [vmem:[#allocation2 + $0x180] sm:$0xff]  ;;  %v7166_v40 = vld [vmem:[#allocation3 + $0xb3] sm:$0xff] }
 0x164   : > { %v1505_v28 = vld [vmem:[#allocation3 + $0xb2] sm:$0xff]  ;;  %v1600_v25 = vmax.f32 %v1536_v15, %v1568_v9  ;;  %2341 = vst.msk [vmem:[#allocation2 + $0x92] sm:$0xff] %vm225_vm1, %v7089_v17  ;;  %v1242_v34 = vmax.f32 %v7027_v55, %v7081_v4  ;;  %v7144_v1 = vld [vmem:[#allocation2 + $0x188] sm:$0xff]  ;;  %2343 = vst.msk [vmem:[#allocation2 + $0xaa] sm:$0xff] %vm225_vm1, %v7107_v24  ;;  %v1458_v36 = vmax.f32 %v7070_v21, %v7077_v52 }
 0x165   : > { %v7135_v54 = vmax.f32 %v8586_v39, %v1631_v45  ;;  %v7146_v29 = vmax.f32 %v1473_v41, %v1505_v28  ;;  %v1632_v35 = vld [vmem:[#allocation3 + $0xac] sm:$0xff]  ;;  %2342 = vst.msk [vmem:[#allocation2 + $0x9a] sm:$0xff] %vm225_vm1, %v7102_v60  ;;  %2344 = vst.msk [vmem:[#allocation2 + $0xb2] sm:$0xff] %vm225_vm1, %v7112_v53  ;;  %v7156_v16 = vld [vmem:[#allocation2 + $0x60] sm:$0xff]  ;;  %v1459_v55 = vmax.f32 %v7091_v33, %v7093_v63 }
 0x166   : > { %2345 = vst.msk [vmem:[#allocation2 + $0xc2] sm:$0xff] %vm225_vm1, %v7117_v62  ;;  %v1053_v3 = vmax.f32 %v7031_v51, %v7142_v43  ;;  %v1054_v56 = vmax.f32 %v7033_v46, %v7144_v1  ;;  %v1410_v22 = vld [vmem:[#allocation3 + $0xc0] sm:$0xff]  ;;  %v1411_v8 = vld [vmem:[#allocation3 + $0xc8] sm:$0xff]  ;;  %v2473_v47 = vmax.f32 %v7156_v16, %v7119_v2  ;;  %v1460_v6 = vmax.f32 %v7079_v23, %v7121_v31  ;;  %v7197_v26 = vld [vmem:[#allocation3 + $0xd8] sm:$0xff] }
 0x167   : > { %2346 = vst.msk [vmem:[#allocation2 + $0xca] sm:$0xff] %vm225_vm1, %v7135_v54  ;;  %v1490_v21 = vld [vmem:[#allocation3 + $0x2] sm:$0xff]  ;;  %v1491_v59 = vld [vmem:[#allocation3 + $0xa] sm:$0xff]  ;;  %v1146_v45 = vmax.f32 %v1050_v12, %v7142_v43  ;;  %v7184_v52 = vmax.f32 %v1051_v30, %v7144_v1  ;;  %v1334_v4 = vmax.f32 %v1237_v5, %v7142_v43  ;;  %v1335_v23 = vmax.f32 %v1238_v58, %v7144_v1  ;;  %v1492_v38 = vld [vmem:[#allocation3 + $0x1a] sm:$0xff] }
 0x168   : > { %v7174_v32 = vld [vmem:[#allocation3 + $0x20] sm:$0xff]  ;;  %v1443_v15 = vld [vmem:[#allocation3 + $0xc9] sm:$0xff]  ;;  %v1240_v57 = vmax.f32 %v7056_v61, %v7142_v43  ;;  %v7199_v63 = vmax.f32 %v1600_v25, %v1632_v35  ;;  %v1241_v51 = vmax.f32 %v7065_v44, %v7144_v1  ;;  %v1601_v13 = vmax.f32 %v7146_v29, %v7166_v40  ;;  %v1101_v44 = vld [vmem:[#allocation2 + $0x198] sm:$0xff] }
 0x169   : > { %v1294_v49 = vld [vmem:[#allocation2 + $0x1c0] sm:$0xf]  ;;  %v7195_v12 = vld [vmem:[#allocation2 + $0x1b0] sm:$0xff]  ;;  %v1475_v30 = vmax.f32 %v1411_v8, %v1443_v15  ;;  %1382 = vst.msk [vmem:[#allocation3 + $0x120] sm:$0xff] %vm225_vm1, %v1334_v4  ;;  %v1197_v5 = vld [vmem:[#allocation2 + $0x1a8] sm:$0xf]  ;;  %v7209_v0 = vmax.f32 %v1458_v36, %v1490_v21  ;;  %v7211_v18 = vmax.f32 %v1459_v55, %v1491_v59  ;;  %v7218_v39 = vmax.f32 %v1460_v6, %v1492_v38 }
 0x16a   : > { %v1442_v41 = vld [vmem:[#allocation3 + $0xc1] sm:$0xff]  ;;  %1383 = vst.msk [vmem:[#allocation3 + $0x128] sm:$0xff] %vm225_vm1, %v1335_v23  ;;  %v1507_v14 = vld [vmem:[#allocation3 + $0xca] sm:$0xff]  ;;  %v1245_v31 = vmax.f32 %v7129_v42, %v1197_v5  ;;  %2347 = vst.msk [vmem:[#allocation2 + $0xda] sm:$0xff] %vm225_vm1, %v7199_v63  ;;  %v7222_v1 = vmax.f32 %v1053_v3, %v1101_v44  ;;  %v1243_v29 = vmax.f32 %v1146_v45, %v1101_v44 }
 0x16b   : > { %v7191_v7 = vld [vmem:[#allocation3 + $0x21] sm:$0xff]  ;;  %v1474_v46 = vmax.f32 %v1410_v22, %v1442_v41  ;;  %v1414_v35 = vld [vmem:[#allocation3 + $0xf0] sm:$0xff]  ;;  %v1415_v36 = vld [vmem:[#allocation3 + $0xf8] sm:$0xff]  ;;  %v1337_v40 = vmax.f32 %v1240_v57, %v1101_v44 }
 0x16c   : > { %v1506_v33 = vld [vmem:[#allocation3 + $0xc2] sm:$0xff]  ;;  %v1461_v43 = vmax.f32 %v7174_v32, %v7191_v7  ;;  %v1417_v55 = vld [vmem:[#allocation3 + $0x110] sm:$0xff]  ;;  %v1342_v22 = vmax.f32 %v1245_v31, %v1294_v49  ;;  %v1444_v59 = vld [vmem:[#allocation3 + $0xd9] sm:$0xff]  ;;  %v1340_v41 = vmax.f32 %v1243_v29, %v7195_v12 }
 0x16d   : > { %v1291_v9 = vld [vmem:[#allocation2 + $0x1a8] sm:$0xf]  ;;  %v7214_v28 = vld [vmem:[#allocation2 + $0x1a0] sm:$0xff]  ;;  %v7224_v42 = vmax.f32 %v1474_v46, %v1506_v33  ;;  %v1446_v6 = vld [vmem:[#allocation3 + $0xf1] sm:$0xff]  ;;  %1385 = vst.msk [vmem:[#allocation3 + $0x138] sm:$0xff] %vm225_vm1, %v1337_v40 }
 0x16e   : > { %v7205_v61 = vld [vmem:[#allocation3 + $0x108] sm:$0xff]  ;;  %v1339_v58 = vmax.f32 %v1242_v34, %v1291_v9  ;;  %v1413_v25 = vld [vmem:[#allocation3 + $0xe0] sm:$0xff]  ;;  %v7226_v34 = vmax.f32 %v1475_v30, %v1507_v14  ;;  %v7230_v8 = vmax.f32 %v1054_v56, %v7214_v28  ;;  %v1338_v21 = vmax.f32 %v1241_v51, %v7214_v28  ;;  %v1633_v45 = vld [vmem:[#allocation3 + $0xb4] sm:$0xff]  ;;  %1390 = vst.msk [vmem:[#allocation3 + $0x160] sm:$0xf] %vm228_vm2, %v1342_v22 }
 0x16f   : > { %v1445_v3 = vld [vmem:[#allocation3 + $0xe1] sm:$0xff]  ;;  %v1244_v23 = vmax.f32 %v7184_v52, %v7214_v28  ;;  %v1447_v15 = vld [vmem:[#allocation3 + $0xf9] sm:$0xff]  ;;  %v1448_v49 = vld [vmem:[#allocation3 + $0x109] sm:$0xff]  ;;  %v1476_v30 = vmax.f32 %v7197_v26, %v1444_v59  ;;  %v1478_v57 = vmax.f32 %v1414_v35, %v1446_v6  ;;  %v1246_v26 = vmax.f32 %v7222_v1, %v7195_v12  ;;  %1388 = vst.msk [vmem:[#allocation3 + $0x150] sm:$0xff] %vm225_vm1, %v1340_v41 }
 0x170   : > { %1387 = vst.msk [vmem:[#allocation3 + $0x148] sm:$0xf] %vm228_vm2, %v1339_v58  ;;  %v1554_v4 = vld [vmem:[#allocation3 + $0x3] sm:$0xff]  ;;  %v1449_v46 = vld [vmem:[#allocation3 + $0x111] sm:$0xff]  ;;  %v1477_v56 = vmax.f32 %v1413_v25, %v1445_v3  ;;  %v1479_v38 = vmax.f32 %v1415_v36, %v1447_v15  ;;  %v1480_v52 = vmax.f32 %v7205_v61, %v1448_v49  ;;  %v1508_v5 = vld [vmem:[#allocation3 + $0xda] sm:$0xff]  ;;  %v7248_v35 = vmax.f32 %v1601_v13, %v1633_v45 }
 0x171   : > { %v7237_v33 = vld [vmem:[#allocation2 + $0x1b8] sm:$0xff]  ;;  %1386 = vst.msk [vmem:[#allocation3 + $0x140] sm:$0xff] %vm225_vm1, %v1338_v21  ;;  %v1481_v51 = vmax.f32 %v1417_v55, %v1449_v46  ;;  %v1509_v9 = vld [vmem:[#allocation3 + $0xe2] sm:$0xff]  ;;  %v1555_v31 = vld [vmem:[#allocation3 + $0xb] sm:$0xff]  ;;  %v7246_v29 = vmax.f32 %v1476_v30, %v1508_v5  ;;  %v1586_v61 = vmax.f32 %v7209_v0, %v1554_v4 }
 0x172   : > { %v1618_v14 = vld [vmem:[#allocation3 + $0x4] sm:$0xff]  ;;  %v1556_v58 = vld [vmem:[#allocation3 + $0x1b] sm:$0xff]  ;;  %v1510_v44 = vld [vmem:[#allocation3 + $0xf2] sm:$0xff]  ;;  %v7251_v21 = vmax.f32 %v1477_v56, %v1509_v9  ;;  %2348 = vst.msk [vmem:[#allocation2 + $0xe2] sm:$0xff] %vm225_vm1, %v7248_v35  ;;  %v1587_v4 = vmax.f32 %v7211_v18, %v1555_v31  ;;  %v1247_v7 = vmax.f32 %v7230_v8, %v7237_v33 }
 0x173   : > { %v1511_v28 = vld [vmem:[#allocation3 + $0xfa] sm:$0xff]  ;;  %v1512_v25 = vld [vmem:[#allocation3 + $0x10a] sm:$0xff]  ;;  %v1493_v36 = vld [vmem:[#allocation3 + $0x22] sm:$0xff]  ;;  %v7253_v59 = vmax.f32 %v1478_v57, %v1510_v44  ;;  %v1650_v0 = vmax.f32 %v1586_v61, %v1618_v14  ;;  %v1588_v46 = vmax.f32 %v7218_v39, %v1556_v58  ;;  %v1341_v14 = vmax.f32 %v1244_v23, %v7237_v33 }
 0x174   : > { %v1418_v55 = vld [vmem:[#allocation3 + $0x120] sm:$0xff]  ;;  %v1419_v22 = vld [vmem:[#allocation3 + $0x128] sm:$0xff]  ;;  %v7255_v3 = vmax.f32 %v1479_v38, %v1511_v28  ;;  %v7257_v6 = vmax.f32 %v1480_v52, %v1512_v25  ;;  %v1513_v13 = vld [vmem:[#allocation3 + $0x112] sm:$0xff]  ;;  %v1525_v28 = vmax.f32 %v1461_v43, %v1493_v36 }
 0x175   : > { %v1450_v40 = vld [vmem:[#allocation3 + $0x121] sm:$0xff]  ;;  %v1451_v15 = vld [vmem:[#allocation3 + $0x129] sm:$0xff]  ;;  %v7265_v38 = vmax.f32 %v1481_v51, %v1513_v13  ;;  %v7277_v58 = vld [vmem:[#allocation3 + $0xf3] sm:$0xff]  ;;  %5464 = vmatprep.mubr.msk.f32.mxu0 %vm225_vm1, %v1650_v0  ;;  %2333 = vst.msk [vmem:[#allocation2 + $0x32] sm:$0xff] %vm225_vm1, %v1650_v0 }
 0x176   : > { %v7259_v41 = vld [vmem:[#allocation3 + $0xc3] sm:$0xff]  ;;  %v1482_v49 = vmax.f32 %v1418_v55, %v1450_v40  ;;  %v1483_v56 = vmax.f32 %v1419_v22, %v1451_v15  ;;  %v7267_v52 = vld [vmem:[#allocation3 + $0xcb] sm:$0xff]  ;;  %v7269_v5 = vld [vmem:[#allocation3 + $0xdb] sm:$0xff]  ;;  %v1606_v22 = vmax.f32 %v7253_v59, %v7277_v58  ;;  %1389 = vst.msk [vmem:[#allocation3 + $0x158] sm:$0xff] %vm225_vm1, %v1341_v14 }
 0x177   : > { %v1514_v45 = vld [vmem:[#allocation3 + $0x122] sm:$0xff]  ;;  %v1515_v57 = vld [vmem:[#allocation3 + $0x12a] sm:$0xff]  ;;  %v1602_v25 = vmax.f32 %v7224_v42, %v7259_v41  ;;  %v1603_v61 = vmax.f32 %v7226_v34, %v7267_v52  ;;  %v7291_v36 = vld [vmem:[#allocation3 + $0x113] sm:$0xff]  ;;  %v1604_v42 = vmax.f32 %v7246_v29, %v7269_v5 }
 0x178   : > { %v1295_v30 = vld [vmem:[#allocation2 + $0x1c8] sm:$0xff]  ;;  %v1620_v44 = vld [vmem:[#allocation3 + $0x1c] sm:$0xff]  ;;  %v1296_v18 = vld [vmem:[#allocation2 + $0x1d0] sm:$0xff]  ;;  %v7275_v31 = vmax.f32 %v1482_v49, %v1514_v45  ;;  %v7289_v43 = vmax.f32 %v1483_v56, %v1515_v57  ;;  %v1609_v59 = vmax.f32 %v7265_v38, %v7291_v36 }
 0x179   : > { %v1619_v9 = vld [vmem:[#allocation3 + $0xc] sm:$0xff]  ;;  %v1573_v39 = vld [vmem:[#allocation3 + $0xe3] sm:$0xff]  ;;  %v7279_v51 = vld [vmem:[#allocation3 + $0xfb] sm:$0xff]  ;;  %v1652_v13 = vmax.f32 %v1588_v46, %v1620_v44  ;;  %v1343_v52 = vmax.f32 %v1246_v26, %v1295_v30  ;;  %v1344_v38 = vmax.f32 %v1247_v7, %v1296_v18 }
 0x17a   : > { %v1557_v32 = vld [vmem:[#allocation3 + $0x23] sm:$0xff]  ;;  %v1576_v23 = vld [vmem:[#allocation3 + $0x10b] sm:$0xff]  ;;  %v1605_v34 = vmax.f32 %v7251_v21, %v1573_v39  ;;  %v1420_v40 = vld [vmem:[#allocation3 + $0x138] sm:$0xff]  ;;  %v1607_v33 = vmax.f32 %v7255_v3, %v7279_v51  ;;  %v1651_v49 = vmax.f32 %v1587_v4, %v1619_v9 }
 0x17b   : > { %v7293_v55 = vld [vmem:[#allocation3 + $0x123] sm:$0xff]  ;;  %v1452_v8 = vld [vmem:[#allocation3 + $0x139] sm:$0xff]  ;;  %v1608_v15 = vmax.f32 %v7257_v6, %v1576_v23  ;;  %v1579_v21 = vld [vmem:[#allocation3 + $0x12b] sm:$0xff]  ;;  %v1589_v57 = vmax.f32 %v1525_v28, %v1557_v32  ;;  %2335 = vst.msk [vmem:[#allocation2 + $0x4a] sm:$0xff] %vm225_vm1, %v1652_v13 }
 0x17c   : > { %v1421_v41 = vld [vmem:[#allocation3 + $0x140] sm:$0xff]  ;;  %v1484_v29 = vmax.f32 %v1420_v40, %v1452_v8  ;;  %v1610_v6 = vmax.f32 %v7275_v31, %v7293_v55  ;;  %v1611_v4 = vmax.f32 %v7289_v43, %v1579_v21  ;;  %5465 = vmatmul.mubr.msk.f32.vlgmr.msra.gmra.mrb[32].mxu0 %vm225_vm1, %v1651_v49  ;;  %2334 = vst.msk [vmem:[#allocation2 + $0x3a] sm:$0xff] %vm225_vm1, %v1651_v49  ;;  %v1635_v26 = vld [vmem:[#allocation3 + $0xcc] sm:$0xff]  ;;  %1391 = vst.msk [vmem:[#allocation3 + $0x168] sm:$0xff] %vm225_vm1, %v1343_v52 }
 0x17d   : > { %v1621_v45 = vld [vmem:[#allocation3 + $0x24] sm:$0xff]  ;;  %v1516_v56 = vld [vmem:[#allocation3 + $0x13a] sm:$0xff]  ;;  %5467 = vmatprep.mubr.msk.f32.mxu0 %vm225_vm1, %v1652_v13  ;;  %v1640_v32 = vld [vmem:[#allocation3 + $0x10c] sm:$0xff]  ;;  %v7325_v7 = vmax.f32 %v1603_v61, %v1635_v26  ;;  %1392 = vst.msk [vmem:[#allocation3 + $0x170] sm:$0xff] %vm225_vm1, %v1344_v38 }
 0x17e   : > { %v1453_v0 = vld [vmem:[#allocation3 + $0x141] sm:$0xff]  ;;  %v1548_v12 = vmax.f32 %v1484_v29, %v1516_v56  ;;  %v1653_v31 = vmax.f32 %v1589_v57, %v1621_v45  ;;  %v1638_v18 = vld [vmem:[#allocation3 + $0xf4] sm:$0xff]  ;;  %v7338_v13 = vmax.f32 %v1608_v15, %v1640_v32 }
 0x17f   : > { %v1485_v5 = vmax.f32 %v1421_v41, %v1453_v0  ;;  %v1517_v14 = vld [vmem:[#allocation3 + $0x142] sm:$0xff]  ;;  %v6025_v39 = vld [vmem:[%s8523_s3] sm:$0x3]  ;;  %v1641_v55 = vld [vmem:[#allocation3 + $0x114] sm:$0xff]  ;;  %v7334_v8 = vmax.f32 %v1606_v22, %v1638_v18  ;;  %2350 = vst.msk [vmem:[#allocation2 + $0xfa] sm:$0xff] %vm225_vm1, %v7325_v7 }
 0x180   : > { %v1580_v3 = vld [vmem:[#allocation3 + $0x13b] sm:$0xff]  ;;  %v1634_v46 = vld [vmem:[#allocation3 + $0xc4] sm:$0xff]  ;;  %5513 = vmatpush3.msk.msra.mxu0 %vm1780_vm4, %v6025_v39  ;;  %v1643_v41 = vld [vmem:[#allocation3 + $0x12c] sm:$0xff]  ;;  %8587 = vst [vmem:[#allocation24_spill] sm:$0xff] %v7338_v13  ;;  %v7343_v45 = vmax.f32 %v1609_v59, %v1641_v55 }
 0x181   : > { %v7312_v9 = vld [vmem:[#allocation2 + $0x80] sm:$0xff]  ;;  %v7317_v28 = vmax.f32 %v1602_v25, %v1634_v46  ;;  %v1549_v58 = vmax.f32 %v1485_v5, %v1517_v14  ;;  %v7331_v23 = vld [vmem:[#allocation2 + $0x68] sm:$0xff]  ;;  %v1612_v36 = vmax.f32 %v1548_v12, %v1580_v3  ;;  %2336 = vst.msk [vmem:[#allocation2 + $0x52] sm:$0xff] %vm225_vm1, %v1653_v31  ;;  %v7347_v29 = vmax.f32 %v1611_v4, %v1643_v41  ;;  %v7355_v22 = vld [vmem:[#allocation2 + $0x90] sm:$0xff] }
 0x182   : > { %v1581_v1 = vld [vmem:[#allocation3 + $0x143] sm:$0xff]  ;;  %8588 = vst [vmem:[#allocation25_spill] sm:$0xff] %v7343_v45  ;;  %5468 = vmatmul.mubr.msk.f32.gmra.mrb[34].mxu0 %vm225_vm1, %v1653_v31  ;;  %2353 = vst.msk [vmem:[#allocation2 + $0x122] sm:$0xff] %vm225_vm1, %v7334_v8  ;;  %v7366_v15 = vld [vmem:[#allocation2 + $0x98] sm:$0xff]  ;;  %v2474_v59 = vmax.f32 %v7331_v23, %v7312_v9  ;;  %v2476_v57 = vmax.f32 %v7119_v2, %v7355_v22  ;;  %v7380_v52 = vmax.f32 %v2473_v47, %v7355_v22 }
 0x183   : > { %v1636_v30 = vld [vmem:[#allocation3 + $0xdc] sm:$0xff]  ;;  %v1637_v44 = vld [vmem:[#allocation3 + $0xe4] sm:$0xff]  ;;  %2349 = vst.msk [vmem:[#allocation2 + $0xf2] sm:$0xff] %vm225_vm1, %v7317_v28  ;;  %v1613_v61 = vmax.f32 %v1549_v58, %v1581_v1  ;;  %8590 = vst [vmem:[#allocation27_spill] sm:$0xff] %v7347_v29  ;;  %5470 = vmatprep.mubr.msk.f32.mxu0 %vm225_vm1, %v6923_v37  ;;  %v2477_v37 = vmax.f32 %v7312_v9, %v7366_v15 }
 0x184   : > { %v1639_v51 = vld [vmem:[#allocation3 + $0xfc] sm:$0xff]  ;;  %v7327_v43 = vmax.f32 %v1604_v42, %v1636_v30  ;;  %v7329_v25 = vmax.f32 %v1605_v34, %v1637_v44  ;;  %v1642_v40 = vld [vmem:[#allocation3 + $0x124] sm:$0xff]  ;;  %2355 = vst.msk [vmem:[#allocation2 + $0x13a] sm:$0xff] %vm225_vm1, %v7338_v13  ;;  %v7370_v21 = vld [vmem:[#allocation2 + $0xb0] sm:$0xff]  ;;  %v2570_v30 = vmax.f32 %v2474_v59, %v7366_v15 }
 0x185   : > { %v7336_v49 = vmax.f32 %v1607_v33, %v1639_v51  ;;  %v1644_v42 = vld [vmem:[#allocation3 + $0x13c] sm:$0xff]  ;;  %v1645_v34 = vld [vmem:[#allocation3 + $0x144] sm:$0xff]  ;;  %v7345_v0 = vmax.f32 %v1610_v6, %v1642_v40  ;;  %8593 = vst [vmem:[#allocation30_spill] sm:$0xff] %v7370_v21  ;;  %2356 = vst.msk [vmem:[#allocation2 + $0x142] sm:$0xff] %vm225_vm1, %v7343_v45  ;;  %v2480_v4 = vmax.f32 %v7366_v15, %v7370_v21 }
 0x186   : > { %2351 = vst.msk [vmem:[#allocation2 + $0x10a] sm:$0xff] %vm225_vm1, %v7327_v43  ;;  %2352 = vst.msk [vmem:[#allocation2 + $0x112] sm:$0xff] %vm225_vm1, %v7329_v25  ;;  %v7358_v33 = vmax.f32 %v1612_v36, %v1644_v42  ;;  %v7368_v56 = vld [vmem:[#allocation2 + $0xa8] sm:$0xff]  ;;  %v7384_v5 = vmax.f32 %v1613_v61, %v1645_v34  ;;  %v7392_v14 = vld [vmem:[#allocation2 + $0xc0] sm:$0xff]  ;;  %v2573_v39 = vmax.f32 %v2477_v37, %v7370_v21  ;;  %5471 = vmatmul.mubr.msk.f32.gmra.mrb[36].mxu0 %vm225_vm1, %v6925_v27 }
 0x187   : > { %8589 = vst [vmem:[#allocation26_spill] sm:$0xff] %v7345_v0  ;;  %2354 = vst.msk [vmem:[#allocation2 + $0x12a] sm:$0xff] %vm225_vm1, %v7336_v49  ;;  %v7394_v3 = vld [vmem:[#allocation2 + $0xc8] sm:$0xff]  ;;  %v7396_v47 = vld [vmem:[#allocation2 + $0xd8] sm:$0xff]  ;;  %v2479_v6 = vmax.f32 %v7355_v22, %v7368_v56  ;;  %v2482_v12 = vmax.f32 %v7368_v56, %v7392_v14  ;;  %v2572_v31 = vmax.f32 %v2476_v57, %v7368_v56  ;;  %5473 = vmatprep.mubr.msk.f32.mxu0 %vm225_vm1, %v6927_v48 }
 0x188   : > { %8591 = vst [vmem:[#allocation28_spill] sm:$0xff] %v7358_v33  ;;  %8592 = vst [vmem:[#allocation29_spill] sm:$0xff] %v7368_v56  ;;  %v7404_v46 = vld [vmem:[#allocation2 + $0x178] sm:$0xf]  ;;  %v7408_v38 = vld [vmem:[#allocation2 + $0xe0] sm:$0xff]  ;;  %v2483_v1 = vmax.f32 %v7370_v21, %v7394_v3  ;;  %v2485_v26 = vmax.f32 %v7392_v14, %v7396_v47  ;;  %v2576_v18 = vmax.f32 %v2480_v4, %v7394_v3 }
 0x189   : > { %8594 = vst [vmem:[#allocation31_spill] sm:$0xff] %v7384_v5  ;;  %2357 = vst.msk [vmem:[#allocation2 + $0x152] sm:$0xff] %vm225_vm1, %v7345_v0  ;;  %v2486_v44 = vmax.f32 %v7394_v3, %v7408_v38  ;;  %v2575_v58 = vmax.f32 %v2479_v6, %v7392_v14  ;;  %v2578_v51 = vmax.f32 %v2482_v12, %v7396_v47  ;;  %v7439_v4 = vld [vmem:[#allocation2 + $0x120] sm:$0xff] }
 0x18a   : > { %2358 = vst.msk [vmem:[#allocation2 + $0x15a] sm:$0xff] %vm225_vm1, %v7347_v29  ;;  %8595 = vst [vmem:[#allocation32_spill] sm:$0xff] %v7404_v46  ;;  %v2579_v32 = vmax.f32 %v2483_v1, %v7408_v38  ;;  %v2665_v36 = vmax.f32 %v7380_v52, %v7368_v56  ;;  %v2395_v55 = vld [vmem:[#allocation2 + $0xf0] sm:$0xff]  ;;  %v2666_v40 = vmax.f32 %v2570_v30, %v7370_v21  ;;  %v2396_v42 = vld [vmem:[#allocation2 + $0xf8] sm:$0xff]  ;;  %5474 = vmatmul.mubr.msk.f32.gmra.mrb[38].mxu0 %vm225_vm1, %v6929_v20 }
 0x18b   : > { %2359 = vst.msk [vmem:[#allocation2 + $0x16a] sm:$0xff] %vm225_vm1, %v7358_v33  ;;  %2360 = vst.msk [vmem:[#allocation2 + $0x172] sm:$0xff] %vm225_vm1, %v7384_v5  ;;  %v2668_v41 = vmax.f32 %v2572_v31, %v7392_v14  ;;  %v2669_v61 = vmax.f32 %v2573_v39, %v7394_v3  ;;  %v2671_v27 = vmax.f32 %v2575_v58, %v7396_v47  ;;  %v7443_v12 = vld [vmem:[#allocation2 + $0x138] sm:$0xff]  ;;  %5476 = vmatprep.mubr.msk.f32.mxu0 %vm225_vm1, %v7089_v17 }
 0x18c   : > { %v2488_v57 = vmax.f32 %v7396_v47, %v2395_v55  ;;  %v2581_v37 = vmax.f32 %v2485_v26, %v2395_v55  ;;  %v2672_v52 = vmax.f32 %v2576_v18, %v7408_v38  ;;  %v2674_v6 = vmax.f32 %v2578_v51, %v2395_v55  ;;  %v7448_v58 = vld [vmem:[#allocation2 + $0x140] sm:$0xff] }
 0x18d   : > { %v2398_v34 = vld [vmem:[#allocation2 + $0x108] sm:$0xff]  ;;  %v2399_v59 = vld [vmem:[#allocation2 + $0x110] sm:$0xff]  ;;  %v2489_v1 = vmax.f32 %v7408_v38, %v2396_v42  ;;  %v2582_v39 = vmax.f32 %v2486_v44, %v2396_v42  ;;  %v2675_v46 = vmax.f32 %v2579_v32, %v2396_v42 }
 0x18e   : > { %v7441_v48 = vld [vmem:[#allocation2 + $0x128] sm:$0xff]  ;;  %v2491_v30 = vmax.f32 %v2395_v55, %v2398_v34  ;;  %v2492_v31 = vmax.f32 %v2396_v42, %v2399_v59  ;;  %v2494_v26 = vmax.f32 %v2398_v34, %v7439_v4  ;;  %v2584_v51 = vmax.f32 %v2488_v57, %v2398_v34  ;;  %5477 = vmatmul.mubr.msk.f32.gmra.mrb[40].mxu0 %vm225_vm1, %v7102_v60  ;;  %v7473_v60 = vld [vmem:[#allocation2 + $0x38] sm:$0xff] }
 0x18f   : > { %v2495_v18 = vmax.f32 %v2399_v59, %v7441_v48  ;;  %v2585_v5 = vmax.f32 %v2489_v1, %v2399_v59  ;;  %v2677_v45 = vmax.f32 %v2581_v37, %v2398_v34  ;;  %v2678_v21 = vmax.f32 %v2582_v39, %v2399_v59  ;;  %5479 = vmatprep.mubr.msk.f32.mxu0 %vm225_vm1, %v7107_v24 }
 0x190   : > { %v2587_v33 = vmax.f32 %v2491_v30, %v7439_v4  ;;  %v2588_v29 = vmax.f32 %v2492_v31, %v7441_v48  ;;  %v2638_v44 = vld [vmem:[#allocation2 + $0x150] sm:$0xff]  ;;  %v2590_v20 = vmax.f32 %v2494_v26, %v7443_v12  ;;  %v2680_v56 = vmax.f32 %v2584_v51, %v7439_v4  ;;  %v7518_v51 = vld [vmem:[#allocation2 + $0x40] sm:$0xf] }
 0x191   : > { %v2639_v0 = vld [vmem:[#allocation2 + $0x158] sm:$0xff]  ;;  %v2591_v13 = vmax.f32 %v2495_v18, %v7448_v58  ;;  %v2681_v32 = vmax.f32 %v2585_v5, %v7441_v48  ;;  %v2761_v1 = vmax.f32 %v2665_v36, %v7392_v14  ;;  %v2762_v26 = vmax.f32 %v2666_v40, %v7394_v3  ;;  %v7469_v5 = vld [vmem:[#allocation2 + $0x28] sm:$0xf] }
 0x192   : > { %v2683_v57 = vmax.f32 %v2587_v33, %v7443_v12  ;;  %v2684_v17 = vmax.f32 %v2588_v29, %v7448_v58  ;;  %v2686_v30 = vmax.f32 %v2590_v20, %v2638_v44  ;;  %v2734_v31 = vld [vmem:[#allocation2 + $0x168] sm:$0xff]  ;;  %v2764_v39 = vmax.f32 %v2668_v41, %v7396_v47  ;;  %v2735_v33 = vld [vmem:[#allocation2 + $0x170] sm:$0xff]  ;;  %v2511_v41 = vld [vmem:[#allocation2 + $0x40] sm:$0xf]  ;;  %5480 = vmatmul.mubr.msk.f32.gmra.mrb[42].mxu0 %vm225_vm1, %v7112_v53 }
 0x193   : > { %v2687_v37 = vmax.f32 %v2591_v13, %v2639_v0  ;;  %v2765_v29 = vmax.f32 %v2669_v61, %v7408_v38  ;;  %v2767_v18 = vmax.f32 %v2671_v27, %v2395_v55  ;;  %v2768_v14 = vmax.f32 %v2672_v52, %v2396_v42  ;;  %2809 = vst.msk [vmem:[#allocation3 + $0x60] sm:$0xff] %vm225_vm1, %v2761_v1  ;;  %v7475_v13 = vld [vmem:[#allocation2 + $0x50] sm:$0xff]  ;;  %v7484_v55 = vld [vmem:[#allocation2 + $0x40] sm:$0xf]  ;;  %v8599_v20 = vld [vmem:[#allocation11_spill] sm:$0xff] }
 0x194   : > { %v2770_v36 = vmax.f32 %v2674_v6, %v2398_v34  ;;  %v2771_v3 = vmax.f32 %v2675_v46, %v2399_v59  ;;  %v2773_v47 = vmax.f32 %v2677_v45, %v7439_v4  ;;  %v2774_v40 = vmax.f32 %v2678_v21, %v7441_v48  ;;  %2810 = vst.msk [vmem:[#allocation3 + $0x68] sm:$0xff] %vm225_vm1, %v2762_v26  ;;  %v7482_v38 = vld [vmem:[#allocation2 + $0x30] sm:$0xff]  ;;  %v7493_v45 = vld [vmem:[#allocation2 + $0x48] sm:$0xff]  ;;  %v2607_v6 = vld [vmem:[#allocation2 + $0x58] sm:$0xf] }
 0x195   : > { %v2776_v24 = vmax.f32 %v2680_v56, %v7443_v12  ;;  %2812 = vst.msk [vmem:[#allocation3 + $0x78] sm:$0xff] %vm225_vm1, %v2764_v39  ;;  %v2777_v61 = vmax.f32 %v2681_v32, %v7448_v58  ;;  %v2779_v27 = vmax.f32 %v2683_v57, %v2638_v44  ;;  %v2780_v42 = vmax.f32 %v2684_v17, %v2639_v0  ;;  %v7495_v56 = vld [vmem:[#allocation2 + $0x58] sm:$0xf]  ;;  %v6026_v0 = vld [vmem:[#allocation2 + $0x20] sm:$0xff]  ;;  %v8598_v44 = vld [vmem:[#allocation10_spill] sm:$0xff] }
 0x196   : > { %v2782_v46 = vmax.f32 %v2686_v30, %v2734_v31  ;;  %2813 = vst.msk [vmem:[#allocation3 + $0x80] sm:$0xff] %vm225_vm1, %v2765_v29  ;;  %2815 = vst.msk [vmem:[#allocation3 + $0x90] sm:$0xff] %vm225_vm1, %v2767_v18  ;;  %v2783_v21 = vmax.f32 %v2687_v37, %v2735_v33  ;;  %v2465_v34 = vmax.f32 %v6026_v0, %v7473_v60  ;;  %5482 = vmatprep.mubr.msk.f32.mxu0 %vm225_vm1, %v7117_v62  ;;  %v2703_v57 = vld [vmem:[#allocation2 + $0x70] sm:$0xf]  ;;  %v6027_v17 = vld [vmem:[#allocation2 + $0x18] sm:$0xff] }
 0x197   : > { %2816 = vst.msk [vmem:[#allocation3 + $0x98] sm:$0xff] %vm225_vm1, %v2768_v14  ;;  %2818 = vst.msk [vmem:[#allocation3 + $0xa8] sm:$0xff] %vm225_vm1, %v2770_v36  ;;  %v8596_v53 = vmax.f32 %v6336_v10, %v6338_v11  ;;  %v2468_v52 = vmax.f32 %v7473_v60, %v7475_v13  ;;  %v8597_v10 = vmax.f32 %v6347_v19, %v6349_v50  ;;  %v7524_v30 = vld [vmem:[#allocation2 + $0x70] sm:$0xf]  ;;  %v7531_v31 = vld [vmem:[#allocation2 + $0x58] sm:$0xf]  ;;  %5483 = vmatmul.mubr.msk.f32.gmra.mrb[44].mxu0 %vm225_vm1, %v7135_v54 }
 0x198   : > { %2819 = vst.msk [vmem:[#allocation3 + $0xb0] sm:$0xff] %vm225_vm1, %v2771_v3  ;;  %2821 = vst.msk [vmem:[#allocation3 + $0xc0] sm:$0xff] %vm225_vm1, %v2773_v47  ;;  %v8600_v32 = vmax.f32 %v8598_v44, %v8599_v20  ;;  %v2464_v1 = vmax.f32 %v6027_v17, %v7482_v38  ;;  %v2466_v37 = vmax.f32 %v7469_v5, %v7484_v55  ;;  %v7533_v26 = vld [vmem:[#allocation2 + $0x70] sm:$0xf]  ;;  %v7535_v39 = vld [vmem:[#allocation2 + $0x88] sm:$0xf]  ;;  %5485 = vmatprep.mubr.msk.f32.mxu0 %vm225_vm1, %v7199_v63 }
 0x199   : > { %2822 = vst.msk [vmem:[#allocation3 + $0xc8] sm:$0xff] %vm225_vm1, %v2774_v40  ;;  %2824 = vst.msk [vmem:[#allocation3 + $0xd8] sm:$0xff] %vm225_vm1, %v2776_v24  ;;  %v2558_v59 = vmax.f32 %v8596_v53, %v7473_v60  ;;  %v2557_v11 = vmax.f32 %v8597_v10, %v7482_v38  ;;  %v2561_v19 = vmax.f32 %v2465_v34, %v7475_v13  ;;  %v7545_v36 = vld [vmem:[#allocation2 + $0x88] sm:$0xf]  ;;  %v7547_v3 = vld [vmem:[#allocation2 + $0xa0] sm:$0xf] }
 0x19a   : > { %2825 = vst.msk [vmem:[#allocation3 + $0xe0] sm:$0xff] %vm225_vm1, %v2777_v61  ;;  %2827 = vst.msk [vmem:[#allocation3 + $0xf0] sm:$0xff] %vm225_vm1, %v2779_v27  ;;  %v2559_v62 = vmax.f32 %v8600_v32, %v2511_v41  ;;  %v2467_v33 = vmax.f32 %v7482_v38, %v7493_v45  ;;  %v2469_v29 = vmax.f32 %v7518_v51, %v7495_v56  ;;  %v2514_v40 = vld [vmem:[#allocation2 + $0x58] sm:$0xf]  ;;  %v2517_v24 = vld [vmem:[#allocation2 + $0x70] sm:$0xf] }
 0x19b   : > { %2828 = vst.msk [vmem:[#allocation3 + $0xf8] sm:$0xff] %vm225_vm1, %v2780_v42  ;;  %2830 = vst.msk [vmem:[#allocation3 + $0x108] sm:$0xff] %vm225_vm1, %v2782_v46  ;;  %v2654_v50 = vmax.f32 %v2558_v59, %v7475_v13  ;;  %v2653_v5 = vmax.f32 %v2557_v11, %v7493_v45  ;;  %v2560_v14 = vmax.f32 %v2464_v1, %v7493_v45  ;;  %v2853_v38 = vld [vmem:[#allocation3 + $0x60] sm:$0xff]  ;;  %v2520_v27 = vld [vmem:[#allocation2 + $0x88] sm:$0xf]  ;;  %5486 = vmatmul.mubr.msk.f32.gmra.mrb[46].mxu0 %vm225_vm1, %v7248_v35 }
 0x19c   : > { %2831 = vst.msk [vmem:[#allocation3 + $0x110] sm:$0xff] %vm225_vm1, %v2783_v21  ;;  %v2655_v18 = vmax.f32 %v2559_v62, %v2607_v6  ;;  %v2470_v47 = vmax.f32 %v7493_v45, %v7156_v16  ;;  %v2657_v55 = vmax.f32 %v2561_v19, %v7331_v23  ;;  %v2471_v41 = vmax.f32 %v7475_v13, %v7331_v23  ;;  %v2523_v42 = vld [vmem:[#allocation2 + $0xa0] sm:$0xf]  ;;  %v2855_v46 = vld [vmem:[#allocation3 + $0x78] sm:$0xff]  ;;  %v7569_v32 = vld [vmem:[#allocation2 + $0x70] sm:$0xf] }
 0x19d   : > { %v2750_v54 = vmax.f32 %v2654_v50, %v7331_v23  ;;  %v2472_v61 = vmax.f32 %v7531_v31, %v7524_v30  ;;  %v2885_v45 = vld [vmem:[#allocation3 + $0x61] sm:$0xff]  ;;  %v2749_v21 = vmax.f32 %v2653_v5, %v7156_v16  ;;  %v2656_v63 = vmax.f32 %v2560_v14, %v7156_v16  ;;  %v2526_v53 = vld [vmem:[#allocation2 + $0xb8] sm:$0xf]  ;;  %v2857_v59 = vld [vmem:[#allocation3 + $0x90] sm:$0xff]  ;;  %5488 = vmatprep.mubr.msk.f32.mxu0 %vm225_vm1, %v7317_v28 }
 0x19e   : > { %v2949_v56 = vld [vmem:[#allocation3 + $0x62] sm:$0xff]  ;;  %v2751_v0 = vmax.f32 %v2655_v18, %v2703_v57  ;;  %v2475_v34 = vmax.f32 %v7533_v26, %v7535_v39  ;;  %v2887_v10 = vld [vmem:[#allocation3 + $0x79] sm:$0xff]  ;;  %v2917_v11 = vmax.f32 %v2853_v38, %v2885_v45  ;;  %v2753_v51 = vmax.f32 %v2657_v55, %v7312_v9  ;;  %v2889_v17 = vld [vmem:[#allocation3 + $0x91] sm:$0xff] }
 0x19f   : > { %v2859_v6 = vld [vmem:[#allocation3 + $0xa8] sm:$0xff]  ;;  %2798 = vst.msk [vmem:[#allocation3 + $0x8] sm:$0xff] %vm225_vm1, %v2750_v54  ;;  %v2478_v44 = vmax.f32 %v7545_v36, %v7547_v3  ;;  %v7567_v20 = vmax.f32 %v2466_v37, %v2514_v40  ;;  %v2861_v62 = vld [vmem:[#allocation3 + $0xc0] sm:$0xff]  ;;  %v2919_v1 = vmax.f32 %v2855_v46, %v2887_v10  ;;  %2797 = vst.msk [vmem:[#allocation3] sm:$0xff] %vm225_vm1, %v2749_v21  ;;  %5489 = vmatmul.mubr.msk.f32.gmra.mrb[48].mxu0 %vm225_vm1, %v7325_v7 }
 0x1a0   : > { %v2863_v57 = vld [vmem:[#allocation3 + $0xd8] sm:$0xff]  ;;  %2799 = vst.msk [vmem:[#allocation3 + $0x10] sm:$0xf] %vm228_vm2, %v2751_v0  ;;  %v2752_v30 = vmax.f32 %v2656_v63, %v7119_v2  ;;  %v7577_v19 = vmax.f32 %v2467_v33, %v7156_v16  ;;  %v7583_v37 = vmax.f32 %v2468_v52, %v7331_v23  ;;  %v2891_v35 = vld [vmem:[#allocation3 + $0xa9] sm:$0xff]  ;;  %v2921_v39 = vmax.f32 %v2857_v59, %v2889_v17  ;;  %v7597_v23 = vld [vmem:[#allocation2 + $0x80] sm:$0xff] }
 0x1a1   : > { %v7585_v50 = vld [vmem:[#allocation2 + $0x78] sm:$0xff]  ;;  %v2865_v31 = vld [vmem:[#allocation3 + $0xf0] sm:$0xff]  ;;  %v7587_v5 = vmax.f32 %v2917_v11, %v2949_v56  ;;  %2801 = vst.msk [vmem:[#allocation3 + $0x20] sm:$0xff] %vm225_vm1, %v2753_v51  ;;  %v7592_v16 = vmax.f32 %v2469_v29, %v2517_v24  ;;  %v7595_v33 = vmax.f32 %v2470_v47, %v7119_v2  ;;  %v2893_v60 = vld [vmem:[#allocation3 + $0xc1] sm:$0xff]  ;;  %v2923_v18 = vmax.f32 %v2859_v6, %v2891_v35 }
 0x1a2   : > { %v2867_v26 = vld [vmem:[#allocation3 + $0x108] sm:$0xff]  ;;  %v2895_v13 = vld [vmem:[#allocation3 + $0xd9] sm:$0xff]  ;;  %v2897_v52 = vld [vmem:[#allocation3 + $0xf1] sm:$0xff]  ;;  %2800 = vst.msk [vmem:[#allocation3 + $0x18] sm:$0xff] %vm225_vm1, %v2752_v30  ;;  %v7601_v14 = vmax.f32 %v2471_v41, %v7312_v9  ;;  %v7603_v36 = vmax.f32 %v2472_v61, %v2520_v27  ;;  %v7605_v28 = vmax.f32 %v2475_v34, %v2523_v42  ;;  %v2925_v2 = vmax.f32 %v2861_v62, %v2893_v60 }
 0x1a3   : > { %v7607_v29 = vld [vmem:[#allocation2 + $0x88] sm:$0xf]  ;;  %v2927_v47 = vmax.f32 %v2863_v57, %v2895_v13  ;;  %v2929_v40 = vmax.f32 %v2865_v31, %v2897_v52  ;;  %v2951_v24 = vld [vmem:[#allocation3 + $0x7a] sm:$0xff]  ;;  %v2953_v38 = vld [vmem:[#allocation3 + $0x92] sm:$0xff]  ;;  %v7609_v54 = vmax.f32 %v2478_v44, %v2526_v53  ;;  %v2658_v61 = vmax.f32 %v7567_v20, %v7569_v32  ;;  %5491 = vmatprep.mubr.msk.f32.mxu0 %vm225_vm1, %v7327_v43 }
 0x1a4   : > { %v2899_v3 = vld [vmem:[#allocation3 + $0x109] sm:$0xff]  ;;  %v2959_v56 = vld [vmem:[#allocation3 + $0xda] sm:$0xff]  ;;  %v2983_v9 = vmax.f32 %v2919_v1, %v2951_v24  ;;  %v2985_v41 = vmax.f32 %v2921_v39, %v2953_v38  ;;  %v2961_v27 = vld [vmem:[#allocation3 + $0xf2] sm:$0xff]  ;;  %v2659_v59 = vmax.f32 %v7577_v19, %v7585_v50  ;;  %v2660_v57 = vmax.f32 %v7583_v37, %v7597_v23  ;;  %5492 = vmatmul.mubr.msk.f32.gmra.mrb[50].mxu0 %vm225_vm1, %v7329_v25 }
 0x1a5   : > { %v2931_v55 = vmax.f32 %v2867_v26, %v2899_v3  ;;  %v2955_v46 = vld [vmem:[#allocation3 + $0xaa] sm:$0xff]  ;;  %v2957_v45 = vld [vmem:[#allocation3 + $0xc2] sm:$0xff]  ;;  %v2991_v63 = vmax.f32 %v2927_v47, %v2959_v56  ;;  %v2993_v6 = vmax.f32 %v2929_v40, %v2961_v27  ;;  %v3017_v11 = vld [vmem:[#allocation3 + $0x93] sm:$0xff]  ;;  %v2661_v19 = vmax.f32 %v7592_v16, %v7607_v29  ;;  %5494 = vmatprep.mubr.msk.f32.mxu0 %vm225_vm1, %v7334_v8 }
 0x1a6   : > { %v2963_v42 = vld [vmem:[#allocation3 + $0x10a] sm:$0xff]  ;;  %v2987_v21 = vmax.f32 %v2923_v18, %v2955_v46  ;;  %v2989_v0 = vmax.f32 %v2925_v2, %v2957_v45  ;;  %v7617_v53 = vld [vmem:[#allocation2 + $0xa0] sm:$0xf]  ;;  %v7622_v62 = vld [vmem:[#allocation2 + $0xb8] sm:$0xf]  ;;  %v3049_v31 = vmax.f32 %v2985_v41, %v3017_v11  ;;  %v2662_v3 = vmax.f32 %v7595_v33, %v7355_v22 }
 0x1a7   : > { %v3013_v34 = vld [vmem:[#allocation3 + $0x63] sm:$0xff]  ;;  %v2995_v10 = vmax.f32 %v2931_v55, %v2963_v42  ;;  %v3015_v7 = vld [vmem:[#allocation3 + $0x7b] sm:$0xff]  ;;  %v3019_v51 = vld [vmem:[#allocation3 + $0xab] sm:$0xff]  ;;  %v2663_v29 = vmax.f32 %v7601_v14, %v7366_v15 }
 0x1a8   : > { %v3045_v44 = vmax.f32 %v7587_v5, %v3013_v34  ;;  %v3021_v17 = vld [vmem:[#allocation3 + $0xc3] sm:$0xff]  ;;  %v3023_v1 = vld [vmem:[#allocation3 + $0xdb] sm:$0xff]  ;;  %v3025_v43 = vld [vmem:[#allocation3 + $0xf3] sm:$0xff]  ;;  %v3047_v30 = vmax.f32 %v2983_v9, %v3015_v7  ;;  %v3051_v26 = vmax.f32 %v2987_v21, %v3019_v51  ;;  %v2664_v21 = vmax.f32 %v7603_v36, %v7617_v53  ;;  %5495 = vmatmul.mubr.msk.f32.gmra.mrb[52].mxu0 %vm225_vm1, %v7336_v49 }
 0x1a9   : > { %v7626_v35 = vld [vmem:[#allocation2 + $0xd0] sm:$0xf]  ;;  %v2706_v50 = vld [vmem:[#allocation2 + $0x88] sm:$0xf]  ;;  %v3053_v60 = vmax.f32 %v2989_v0, %v3021_v17  ;;  %v3055_v5 = vmax.f32 %v2991_v63, %v3023_v1  ;;  %v3057_v13 = vmax.f32 %v2993_v6, %v3025_v43  ;;  %v3079_v18 = vld [vmem:[#allocation3 + $0x7c] sm:$0xff]  ;;  %v2667_v6 = vmax.f32 %v7605_v28, %v7622_v62 }
 0x1aa   : > { %v3027_v39 = vld [vmem:[#allocation3 + $0x10b] sm:$0xff]  ;;  %v2709_v2 = vld [vmem:[#allocation2 + $0xa0] sm:$0xf]  ;;  %v3081_v40 = vld [vmem:[#allocation3 + $0x94] sm:$0xff]  ;;  %v7636_v16 = vmax.f32 %v3047_v30, %v3079_v18  ;;  %v2670_v11 = vmax.f32 %v7609_v54, %v7626_v35  ;;  %v2754_v28 = vmax.f32 %v2658_v61, %v2706_v50  ;;  %v2755_v51 = vmax.f32 %v2659_v59, %v7355_v22 }
 0x1ab   : > { %v3077_v52 = vld [vmem:[#allocation3 + $0x64] sm:$0xff]  ;;  %v3059_v47 = vmax.f32 %v2995_v10, %v3027_v39  ;;  %v3083_v24 = vld [vmem:[#allocation3 + $0xac] sm:$0xff]  ;;  %v2712_v46 = vld [vmem:[#allocation2 + $0xb8] sm:$0xf]  ;;  %v7642_v9 = vmax.f32 %v3049_v31, %v3081_v40  ;;  %v2756_v22 = vmax.f32 %v2660_v57, %v7366_v15  ;;  %v2757_v20 = vmax.f32 %v2661_v19, %v2709_v2 }
 0x1ac   : > { %v3085_v38 = vld [vmem:[#allocation3 + $0xc4] sm:$0xff]  ;;  %v7634_v55 = vmax.f32 %v3045_v44, %v3077_v52  ;;  %v2715_v45 = vld [vmem:[#allocation2 + $0xd0] sm:$0xf]  ;;  %v3087_v25 = vld [vmem:[#allocation3 + $0xdc] sm:$0xff]  ;;  %v7644_v41 = vmax.f32 %v3051_v26, %v3083_v24  ;;  %3501 = vst.msk [vmem:[#allocation2 + $0xaa] sm:$0xff] %vm225_vm1, %v7636_v16  ;;  %v2760_v50 = vmax.f32 %v2664_v21, %v2712_v46 }
 0x1ad   : > { %v3089_v56 = vld [vmem:[#allocation3 + $0xf4] sm:$0xff]  ;;  %v3091_v33 = vld [vmem:[#allocation3 + $0x10c] sm:$0xff]  ;;  %v7646_v27 = vmax.f32 %v3053_v60, %v3085_v38  ;;  %v7652_v14 = vmax.f32 %v3055_v5, %v3087_v25  ;;  %v2845_v8 = vld [vmem:[#allocation3] sm:$0xff]  ;;  %3503 = vst.msk [vmem:[#allocation2 + $0xc2] sm:$0xff] %vm225_vm1, %v7642_v9  ;;  %v2763_v39 = vmax.f32 %v2667_v6, %v2715_v45 }
 0x1ae   : > { %v7648_v42 = vld [vmem:[#allocation2 + $0xb8] sm:$0xf]  ;;  %v7654_v0 = vmax.f32 %v3057_v13, %v3089_v56  ;;  %v7656_v63 = vmax.f32 %v3059_v47, %v3091_v33  ;;  %3499 = vst.msk [vmem:[#allocation2 + $0x92] sm:$0xff] %vm225_vm1, %v7634_v55  ;;  %v2877_v34 = vld [vmem:[#allocation3 + $0x1] sm:$0xff]  ;;  %3505 = vst.msk [vmem:[#allocation2 + $0xda] sm:$0xff] %vm225_vm1, %v7644_v41 }
 0x1af   : > { %v2718_v10 = vld [vmem:[#allocation2 + $0xe8] sm:$0xf]  ;;  %3507 = vst.msk [vmem:[#allocation2 + $0xf2] sm:$0xff] %vm225_vm1, %v7646_v27  ;;  %v2909_v36 = vmax.f32 %v2845_v8, %v2877_v34  ;;  %v2385_v7 = vld [vmem:[#allocation2 + $0xa0] sm:$0xf]  ;;  %v1422_v44 = vld [vmem:[#allocation3 + $0x150] sm:$0xff] }
 0x1b0   : > { %v2846_v53 = vld [vmem:[#allocation3 + $0x8] sm:$0xff]  ;;  %v1454_v62 = vld [vmem:[#allocation3 + $0x151] sm:$0xff]  ;;  %3509 = vst.msk [vmem:[#allocation2 + $0x10a] sm:$0xff] %vm225_vm1, %v7652_v14  ;;  %3511 = vst.msk [vmem:[#allocation2 + $0x122] sm:$0xff] %vm225_vm1, %v7654_v0  ;;  %v2766_v19 = vmax.f32 %v2670_v11, %v2718_v10  ;;  %v2481_v60 = vmax.f32 %v2385_v7, %v7648_v42 }
 0x1b1   : > { %3513 = vst.msk [vmem:[#allocation2 + $0x13a] sm:$0xff] %vm225_vm1, %v7656_v63  ;;  %v2941_v54 = vld [vmem:[#allocation3 + $0x2] sm:$0xff]  ;;  %v8602_v61 = vld [vmem:[#allocation30_spill] sm:$0xff]  ;;  %v2847_v26 = vld [vmem:[#allocation3 + $0x18] sm:$0xff]  ;;  %v1486_v5 = vmax.f32 %v1422_v44, %v1454_v62 }
 0x1b2   : > { %v2878_v17 = vld [vmem:[#allocation3 + $0x9] sm:$0xff]  ;;  %v2759_v59 = vmax.f32 %v2663_v29, %v8602_v61  ;;  %v8603_v1 = vld [vmem:[#allocation24_spill] sm:$0xff]  ;;  %v2973_v30 = vmax.f32 %v2909_v36, %v2941_v54  ;;  %2802 = vst.msk [vmem:[#allocation3 + $0x28] sm:$0xf] %vm228_vm2, %v2754_v28  ;;  %2805 = vst.msk [vmem:[#allocation3 + $0x40] sm:$0xf] %vm228_vm2, %v2757_v20 }
 0x1b3   : > { %v8601_v49 = vld [vmem:[#allocation29_spill] sm:$0xff]  ;;  %5497 = vmatprep.mubr.msk.f32.mxu0 %vm225_vm1, %v8603_v1  ;;  %v2529_v43 = vld [vmem:[#allocation2 + $0xd0] sm:$0xf]  ;;  %v2910_v31 = vmax.f32 %v2846_v53, %v2878_v17  ;;  %v2879_v35 = vld [vmem:[#allocation3 + $0x19] sm:$0xff]  ;;  %2803 = vst.msk [vmem:[#allocation3 + $0x30] sm:$0xff] %vm225_vm1, %v2755_v51 }
 0x1b4   : > { %v2758_v32 = vmax.f32 %v2662_v3, %v8601_v49  ;;  %v2625_v15 = vld [vmem:[#allocation2 + $0xe8] sm:$0xf]  ;;  %v2911_v57 = vmax.f32 %v2847_v26, %v2879_v35  ;;  %2804 = vst.msk [vmem:[#allocation3 + $0x38] sm:$0xff] %vm225_vm1, %v2756_v22  ;;  %2807 = vst.msk [vmem:[#allocation3 + $0x50] sm:$0xff] %vm225_vm1, %v2759_v59  ;;  %v1518_v13 = vld [vmem:[#allocation3 + $0x152] sm:$0xff]  ;;  %v2577_v56 = vmax.f32 %v2481_v60, %v2529_v43 }
 0x1b5   : > { %v3005_v37 = vld [vmem:[#allocation3 + $0x3] sm:$0xff]  ;;  %v3006_v2 = vld [vmem:[#allocation3 + $0xb] sm:$0xff]  ;;  %v2943_v47 = vld [vmem:[#allocation3 + $0x1a] sm:$0xff]  ;;  %2808 = vst.msk [vmem:[#allocation3 + $0x58] sm:$0xf] %vm228_vm2, %v2760_v50  ;;  %v1550_v33 = vmax.f32 %v1486_v5, %v1518_v13 }
 0x1b6   : > { %v2942_v23 = vld [vmem:[#allocation3 + $0xa] sm:$0xff]  ;;  %2806 = vst.msk [vmem:[#allocation3 + $0x48] sm:$0xff] %vm225_vm1, %v2758_v32  ;;  %v3037_v52 = vmax.f32 %v2973_v30, %v3005_v37  ;;  %v2721_v24 = vld [vmem:[#allocation2 + $0x100] sm:$0xf]  ;;  %v2975_v29 = vmax.f32 %v2911_v57, %v2943_v47  ;;  %v1582_v6 = vld [vmem:[#allocation3 + $0x153] sm:$0xff]  ;;  %v2673_v28 = vmax.f32 %v2577_v56, %v2625_v15 }
 0x1b7   : > { %v3069_v18 = vld [vmem:[#allocation3 + $0x4] sm:$0xff]  ;;  %v2974_v3 = vmax.f32 %v2910_v31, %v2942_v23  ;;  %2811 = vst.msk [vmem:[#allocation3 + $0x70] sm:$0xf] %vm228_vm2, %v2763_v39  ;;  %v3070_v38 = vld [vmem:[#allocation3 + $0xc] sm:$0xff]  ;;  %v3007_v46 = vld [vmem:[#allocation3 + $0x1b] sm:$0xff]  ;;  %v1614_v51 = vmax.f32 %v1550_v33, %v1582_v6 }
 0x1b8   : > { %v8604_v40 = vld [vmem:[#allocation25_spill] sm:$0xff]  ;;  %2814 = vst.msk [vmem:[#allocation3 + $0x88] sm:$0xf] %vm228_vm2, %v2766_v19  ;;  %v7704_v45 = vld [vmem:[#allocation3 + $0x20] sm:$0xff]  ;;  %v8605_v25 = vld [vmem:[#allocation26_spill] sm:$0xff]  ;;  %v3101_v8 = vmax.f32 %v3037_v52, %v3069_v18  ;;  %v3039_v11 = vmax.f32 %v2975_v29, %v3007_v46  ;;  %v2769_v26 = vmax.f32 %v2673_v28, %v2721_v24 }
 0x1b9   : > { %5498 = vmatmul.mubr.msk.f32.gmra.mrb[54].mxu0 %vm225_vm1, %v8604_v40  ;;  %v3541_v42 = vld [vmem:[#allocation2 + $0x90] sm:$0xff]  ;;  %v3544_v21 = vld [vmem:[#allocation2 + $0xa8] sm:$0xff]  ;;  %v3038_v34 = vmax.f32 %v2974_v3, %v3006_v2  ;;  %v3547_v10 = vld [vmem:[#allocation2 + $0xc0] sm:$0xff] }
 0x1ba   : > { %5500 = vmatprep.mubr.msk.f32.mxu0 %vm225_vm1, %v8605_v25  ;;  %v3550_v36 = vld [vmem:[#allocation2 + $0xd8] sm:$0xff]  ;;  %v3553_v53 = vld [vmem:[#allocation2 + $0xf0] sm:$0xff]  ;;  %v3637_v7 = vmax.f32 %v3541_v42, %v3544_v21  ;;  %v3601_v44 = vld [vmem:[#allocation2 + $0x108] sm:$0xff]  ;;  %v3640_v62 = vmax.f32 %v3544_v21, %v3547_v10  ;;  %5564 = vmatprep.mubr.msk.f32.mxu1 %vm225_vm1, %v3101_v8  ;;  %3491 = vst.msk [vmem:[#allocation2 + $0x32] sm:$0xff] %vm225_vm1, %v3101_v8 }
 0x1bb   : > { %v3643_v54 = vmax.f32 %v3547_v10, %v3550_v36  ;;  %v3646_v17 = vmax.f32 %v3550_v36, %v3553_v53  ;;  %v7708_v22 = vld [vmem:[#allocation2 + $0x120] sm:$0xff]  ;;  %v3102_v20 = vmax.f32 %v3038_v34, %v3070_v38  ;;  %v3649_v32 = vmax.f32 %v3553_v53, %v3601_v44  ;;  %v2849_v1 = vld [vmem:[#allocation3 + $0x30] sm:$0xff]  ;;  %v2854_v43 = vld [vmem:[#allocation3 + $0x68] sm:$0xff]  ;;  %2817 = vst.msk [vmem:[#allocation3 + $0xa0] sm:$0xf] %vm228_vm2, %v2769_v26 }
 0x1bc   : > { %v3071_v49 = vld [vmem:[#allocation3 + $0x1c] sm:$0xff]  ;;  %v3733_v61 = vmax.f32 %v3637_v7, %v3547_v10  ;;  %v1646_v35 = vld [vmem:[#allocation3 + $0x154] sm:$0xff]  ;;  %v3736_v50 = vmax.f32 %v3640_v62, %v3550_v36  ;;  %v6028_v52 = vld [vmem:[%s8523_s3 + $0x6] sm:$0x3] }
 0x1bd   : > { %v3103_v59 = vmax.f32 %v3039_v11, %v3071_v49  ;;  %v2880_v30 = vld [vmem:[#allocation3 + $0x21] sm:$0xff]  ;;  %v8606_v31 = vld [vmem:[#allocation27_spill] sm:$0xff]  ;;  %v3739_v39 = vmax.f32 %v3643_v54, %v3553_v53  ;;  %v7714_v15 = vmax.f32 %v3646_v17, %v3601_v44  ;;  %5565 = vmatmul.mubr.msk.f32.vlgmr.msra.gmra.mrb[16].mxu1 %vm225_vm1, %v3102_v20  ;;  %3492 = vst.msk [vmem:[#allocation2 + $0x3a] sm:$0xff] %vm225_vm1, %v3102_v20  ;;  %v2852_v57 = vld [vmem:[#allocation3 + $0x50] sm:$0xff] }
 0x1be   : > { %5501 = vmatmul.mubr.msk.f32.gmra.mrb[56].mxu0 %vm225_vm1, %v8606_v31  ;;  %v2850_v37 = vld [vmem:[#allocation3 + $0x38] sm:$0xff]  ;;  %v2851_v23 = vld [vmem:[#allocation3 + $0x48] sm:$0xff]  ;;  %v2856_v19 = vld [vmem:[#allocation3 + $0x80] sm:$0xff]  ;;  %v2912_v60 = vmax.f32 %v7704_v45, %v2880_v30  ;;  %v7720_v5 = vmax.f32 %v3649_v32, %v7708_v22  ;;  %v3829_v13 = vmax.f32 %v3733_v61, %v3550_v36  ;;  %5613 = vmatpush3.msk.msra.mxu1 %vm1780_vm4, %v6028_v52 }
 0x1bf   : > { %5567 = vmatprep.mubr.msk.f32.mxu1 %vm225_vm1, %v3103_v59  ;;  %v2881_v18 = vld [vmem:[#allocation3 + $0x31] sm:$0xff]  ;;  %v2882_v3 = vld [vmem:[#allocation3 + $0x39] sm:$0xff]  ;;  %v2883_v2 = vld [vmem:[#allocation3 + $0x49] sm:$0xff]  ;;  %3493 = vst.msk [vmem:[#allocation2 + $0x4a] sm:$0xff] %vm225_vm1, %v3103_v59  ;;  %v1678_v47 = vmax.f32 %v1614_v51, %v1646_v35  ;;  %v3832_v40 = vmax.f32 %v3736_v50, %v3553_v53  ;;  %v3835_v24 = vmax.f32 %v3739_v39, %v3601_v44 }
 0x1c0   : > { %v3838_v38 = vmax.f32 %v7714_v15, %v7708_v22  ;;  %v2884_v29 = vld [vmem:[#allocation3 + $0x51] sm:$0xff]  ;;  %v2886_v46 = vld [vmem:[#allocation3 + $0x69] sm:$0xff]  ;;  %v2888_v45 = vld [vmem:[#allocation3 + $0x81] sm:$0xff]  ;;  %v2913_v25 = vmax.f32 %v2849_v1, %v2881_v18  ;;  %v3925_v33 = vmax.f32 %v3829_v13, %v3553_v53  ;;  %v2914_v42 = vmax.f32 %v2850_v37, %v2882_v3 }
 0x1c1   : > { %v8607_v56 = vld [vmem:[#allocation28_spill] sm:$0xff]  ;;  %v2915_v21 = vmax.f32 %v2851_v23, %v2883_v2  ;;  %v8608_v34 = vld [vmem:[#allocation31_spill] sm:$0xff]  ;;  %2361 = vst.msk [vmem:[#allocation2 + $0x182] sm:$0xff] %vm225_vm1, %v1678_v47  ;;  %v3928_v6 = vmax.f32 %v3832_v40, %v3601_v44  ;;  %v3931_v10 = vmax.f32 %v3835_v24, %v7708_v22  ;;  %v2916_v36 = vmax.f32 %v2852_v57, %v2884_v29  ;;  %v2947_v51 = vld [vmem:[#allocation3 + $0x4a] sm:$0xff] }
 0x1c2   : > { %5503 = vmatprep.mubr.msk.f32.mxu0 %vm225_vm1, %v8607_v56  ;;  %v2944_v8 = vld [vmem:[#allocation3 + $0x22] sm:$0xff]  ;;  %v2918_v7 = vmax.f32 %v2854_v43, %v2886_v46  ;;  %v2945_v11 = vld [vmem:[#allocation3 + $0x32] sm:$0xff]  ;;  %v2946_v28 = vld [vmem:[#allocation3 + $0x3a] sm:$0xff]  ;;  %3973 = vst.msk [vmem:[#allocation3 + $0x90] sm:$0xff] %vm225_vm1, %v3925_v33  ;;  %v2920_v53 = vmax.f32 %v2856_v19, %v2888_v45 }
 0x1c3   : > { %5504 = vmatmul.mubr.msk.f32.gmra.mrb[58].mxu0 %vm225_vm1, %v8608_v34  ;;  %v2948_v62 = vld [vmem:[#allocation3 + $0x52] sm:$0xff]  ;;  %v2950_v54 = vld [vmem:[#allocation3 + $0x6a] sm:$0xff]  ;;  %v2952_v17 = vld [vmem:[#allocation3 + $0x82] sm:$0xff]  ;;  %v2976_v20 = vmax.f32 %v2912_v60, %v2944_v8  ;;  %v2977_v49 = vmax.f32 %v2913_v25, %v2945_v11  ;;  %v2978_v32 = vmax.f32 %v2914_v42, %v2946_v28  ;;  %3976 = vst.msk [vmem:[#allocation3 + $0xa8] sm:$0xff] %vm225_vm1, %v3928_v6 }
 0x1c4   : > { %5506 = vmatprep.mubr.msk.f32.mxu0 %vm225_vm1, %v1678_v47  ;;  %3979 = vst.msk [vmem:[#allocation3 + $0xc0] sm:$0xff] %vm225_vm1, %v3931_v10  ;;  %v2979_v44 = vmax.f32 %v2915_v21, %v2947_v51  ;;  %v2980_v61 = vmax.f32 %v2916_v36, %v2948_v62  ;;  %v2982_v59 = vmax.f32 %v2918_v7, %v2950_v54  ;;  %v3008_v1 = vld [vmem:[#allocation3 + $0x23] sm:$0xff]  ;;  %v3009_v43 = vld [vmem:[#allocation3 + $0x33] sm:$0xff]  ;;  %v3010_v30 = vld [vmem:[#allocation3 + $0x3b] sm:$0xff] }
 0x1c5   : > { %v2436_v31 = vld [vmem:[#allocation2 + $0xd0] sm:$0xf]  ;;  %v2858_v26 = vld [vmem:[#allocation3 + $0x98] sm:$0xff]  ;;  %v2984_v35 = vmax.f32 %v2920_v53, %v2952_v17  ;;  %v3040_v23 = vmax.f32 %v2976_v20, %v3008_v1  ;;  %v3041_v57 = vmax.f32 %v2977_v49, %v3009_v43  ;;  %v3042_v19 = vmax.f32 %v2978_v32, %v3010_v30  ;;  %v3016_v13 = vld [vmem:[#allocation3 + $0x83] sm:$0xff] }
 0x1c6   : > { %v3011_v50 = vld [vmem:[#allocation3 + $0x4b] sm:$0xff]  ;;  %v3012_v39 = vld [vmem:[#allocation3 + $0x53] sm:$0xff]  ;;  %v3074_v24 = vld [vmem:[#allocation3 + $0x3c] sm:$0xff] }
 0x1c7   : > { %v3014_v37 = vld [vmem:[#allocation3 + $0x6b] sm:$0xff]  ;;  %v2388_v60 = vld [vmem:[#allocation2 + $0xb8] sm:$0xf]  ;;  %v3043_v52 = vmax.f32 %v2979_v44, %v3011_v50  ;;  %v3044_v18 = vmax.f32 %v2980_v61, %v3012_v39  ;;  %v3048_v40 = vmax.f32 %v2984_v35, %v3016_v13  ;;  %v3106_v42 = vmax.f32 %v3042_v19, %v3074_v24  ;;  %v2628_v53 = vld [vmem:[#allocation2 + $0x100] sm:$0xf] }
 0x1c8   : > { %v3072_v3 = vld [vmem:[#allocation3 + $0x24] sm:$0xff]  ;;  %v3073_v2 = vld [vmem:[#allocation3 + $0x34] sm:$0xff]  ;;  %v3046_v47 = vmax.f32 %v2982_v59, %v3014_v37  ;;  %v3075_v29 = vld [vmem:[#allocation3 + $0x4c] sm:$0xff]  ;;  %v2484_v7 = vmax.f32 %v2388_v60, %v2436_v31 }
 0x1c9   : > { %v3076_v46 = vld [vmem:[#allocation3 + $0x54] sm:$0xff]  ;;  %v3104_v45 = vmax.f32 %v3040_v23, %v3072_v3  ;;  %v3105_v25 = vmax.f32 %v3041_v57, %v3073_v2  ;;  %v3078_v56 = vld [vmem:[#allocation3 + $0x6c] sm:$0xff]  ;;  %v3080_v33 = vld [vmem:[#allocation3 + $0x84] sm:$0xff]  ;;  %v3107_v21 = vmax.f32 %v3043_v52, %v3075_v29  ;;  %3496 = vst.msk [vmem:[#allocation2 + $0x6a] sm:$0xff] %vm225_vm1, %v3106_v42 }
 0x1ca   : > { %v3108_v8 = vmax.f32 %v3044_v18, %v3076_v46  ;;  %v2890_v34 = vld [vmem:[#allocation3 + $0x99] sm:$0xff]  ;;  %v7741_v6 = vmax.f32 %v3046_v47, %v3078_v56  ;;  %v7743_v10 = vmax.f32 %v3048_v40, %v3080_v33  ;;  %v3528_v11 = vld [vmem:[#allocation2 + $0x28] sm:$0xf]  ;;  %v7759_v37 = vld [vmem:[#allocation2 + $0xd0] sm:$0xf] }
 0x1cb   : > { %5568 = vmatmul.mubr.msk.f32.gmra.mrb[18].mxu1 %vm225_vm1, %v3104_v45  ;;  %3494 = vst.msk [vmem:[#allocation2 + $0x52] sm:$0xff] %vm225_vm1, %v3104_v45  ;;  %3495 = vst.msk [vmem:[#allocation2 + $0x62] sm:$0xff] %vm225_vm1, %v3105_v25  ;;  %v2922_v36 = vmax.f32 %v2858_v26, %v2890_v34  ;;  %v2954_v28 = vld [vmem:[#allocation3 + $0x9a] sm:$0xff]  ;;  %v2532_v51 = vld [vmem:[#allocation2 + $0xe8] sm:$0xf] }
 0x1cc   : > { %3497 = vst.msk [vmem:[#allocation2 + $0x7a] sm:$0xff] %vm225_vm1, %v3107_v21  ;;  %3498 = vst.msk [vmem:[#allocation2 + $0x82] sm:$0xff] %vm225_vm1, %v3108_v8  ;;  %5570 = vmatprep.mubr.msk.f32.mxu1 %vm225_vm1, %v3105_v25  ;;  %v3530_v62 = vld [vmem:[#allocation2 + $0x38] sm:$0xff]  ;;  %v3576_v54 = vld [vmem:[#allocation2 + $0x40] sm:$0xf]  ;;  %v2580_v20 = vmax.f32 %v2484_v7, %v2532_v51 }
 0x1cd   : > { %3500 = vst.msk [vmem:[#allocation2 + $0x9a] sm:$0xff] %vm225_vm1, %v7741_v6  ;;  %3502 = vst.msk [vmem:[#allocation2 + $0xb2] sm:$0xff] %vm225_vm1, %v7743_v10  ;;  %v2986_v17 = vmax.f32 %v2922_v36, %v2954_v28  ;;  %v1423_v49 = vld [vmem:[#allocation3 + $0x158] sm:$0xff]  ;;  %v1424_v30 = vld [vmem:[#allocation3 + $0x168] sm:$0xff]  ;;  %v3624_v60 = vmax.f32 %v3528_v11, %v3576_v54 }
 0x1ce   : > { %v3018_v32 = vld [vmem:[#allocation3 + $0x9b] sm:$0xff]  ;;  %v2676_v1 = vmax.f32 %v2580_v20, %v2628_v53  ;;  %v1456_v31 = vld [vmem:[#allocation3 + $0x169] sm:$0xff] }
 0x1cf   : > { %v2724_v44 = vld [vmem:[#allocation2 + $0x118] sm:$0xf]  ;;  %5571 = vmatmul.mubr.msk.f32.gmra.mrb[20].mxu1 %vm225_vm1, %v3106_v42  ;;  %v3050_v59 = vmax.f32 %v2986_v17, %v3018_v32  ;;  %v6029_v26 = vld [vmem:[#allocation2 + $0x20] sm:$0xff]  ;;  %v8609_v50 = vld [vmem:[#allocation13_spill] sm:$0xff]  ;;  %v1488_v19 = vmax.f32 %v1424_v30, %v1456_v31 }
 0x1d0   : > { %v1455_v61 = vld [vmem:[#allocation3 + $0x159] sm:$0xff]  ;;  %v3623_v35 = vmax.f32 %v6029_v26, %v3530_v62  ;;  %v3716_v39 = vmax.f32 %v8609_v50, %v3530_v62  ;;  %5573 = vmatprep.mubr.msk.f32.mxu1 %vm225_vm1, %v3107_v21  ;;  %v2772_v18 = vmax.f32 %v2676_v1, %v2724_v44  ;;  %v1520_v47 = vld [vmem:[#allocation3 + $0x16a] sm:$0xff] }
 0x1d1   : > { %v1487_v43 = vmax.f32 %v1423_v49, %v1455_v61  ;;  %v3082_v23 = vld [vmem:[#allocation3 + $0x9c] sm:$0xff]  ;;  %v1584_v40 = vld [vmem:[#allocation3 + $0x16b] sm:$0xff]  ;;  %v1552_v45 = vmax.f32 %v1488_v19, %v1520_v47 }
 0x1d2   : > { %v1519_v57 = vld [vmem:[#allocation3 + $0x15a] sm:$0xff]  ;;  %v7761_v52 = vmax.f32 %v3050_v59, %v3082_v23  ;;  %v3533_v24 = vld [vmem:[#allocation2 + $0x50] sm:$0xff]  ;;  %v3581_v25 = vld [vmem:[#allocation2 + $0x68] sm:$0xff]  ;;  %2820 = vst.msk [vmem:[#allocation3 + $0xb8] sm:$0xf] %vm228_vm2, %v2772_v18 }
 0x1d3   : > { %v3531_v13 = vld [vmem:[#allocation2 + $0x40] sm:$0xf]  ;;  %v1551_v3 = vmax.f32 %v1487_v43, %v1519_v57  ;;  %v3672_v29 = vld [vmem:[#allocation2 + $0x58] sm:$0xf]  ;;  %v3626_v56 = vmax.f32 %v3530_v62, %v3533_v24  ;;  %v3719_v42 = vmax.f32 %v3623_v35, %v3533_v24  ;;  %v3768_v34 = vld [vmem:[#allocation2 + $0x70] sm:$0xf]  ;;  %v3812_v36 = vmax.f32 %v3716_v39, %v3533_v24  ;;  %5574 = vmatmul.mubr.msk.f32.gmra.mrb[22].mxu1 %vm225_vm1, %v3108_v8 }
 0x1d4   : > { %v1583_v2 = vld [vmem:[#allocation3 + $0x15b] sm:$0xff]  ;;  %v3720_v21 = vmax.f32 %v3624_v60, %v3672_v29  ;;  %3504 = vst.msk [vmem:[#allocation2 + $0xca] sm:$0xff] %vm225_vm1, %v7761_v52  ;;  %v3629_v7 = vmax.f32 %v3533_v24, %v3581_v25  ;;  %v3864_v11 = vld [vmem:[#allocation2 + $0x88] sm:$0xf]  ;;  %5576 = vmatprep.mubr.msk.f32.mxu1 %vm225_vm1, %v7634_v55  ;;  %v1616_v62 = vmax.f32 %v1552_v45, %v1584_v40  ;;  %v1648_v54 = vld [vmem:[#allocation3 + $0x16c] sm:$0xff] }
 0x1d5   : > { %v3579_v46 = vld [vmem:[#allocation2 + $0x58] sm:$0xf]  ;;  %v3677_v33 = vld [vmem:[#allocation2 + $0x80] sm:$0xff]  ;;  %v1615_v51 = vmax.f32 %v1551_v3, %v1583_v2  ;;  %v7769_v17 = vld [vmem:[#allocation2 + $0x190] sm:$0xf]  ;;  %v3722_v20 = vmax.f32 %v3626_v56, %v3581_v25  ;;  %v3815_v8 = vmax.f32 %v3719_v42, %v3581_v25  ;;  %v3908_v44 = vmax.f32 %v3812_v36, %v3581_v25 }
 0x1d6   : > { %v3627_v28 = vmax.f32 %v3531_v13, %v3579_v46  ;;  %v1647_v53 = vld [vmem:[#allocation3 + $0x15c] sm:$0xff]  ;;  %v3816_v32 = vmax.f32 %v3720_v21, %v3768_v34  ;;  %v3675_v61 = vld [vmem:[#allocation2 + $0x70] sm:$0xf]  ;;  %v3771_v59 = vld [vmem:[#allocation2 + $0x88] sm:$0xf]  ;;  %v3725_v1 = vmax.f32 %v3629_v7, %v3677_v33  ;;  %v1680_v39 = vmax.f32 %v1616_v62, %v1648_v54 }
 0x1d7   : > { %v3773_v49 = vld [vmem:[#allocation2 + $0x98] sm:$0xff]  ;;  %v3582_v31 = vld [vmem:[#allocation2 + $0x70] sm:$0xf]  ;;  %v3678_v26 = vld [vmem:[#allocation2 + $0x88] sm:$0xf]  ;;  %v1679_v50 = vmax.f32 %v1615_v51, %v1647_v53  ;;  %v3818_v23 = vmax.f32 %v3722_v20, %v3677_v33  ;;  %v3911_v19 = vmax.f32 %v3815_v8, %v3677_v33  ;;  %3956 = vst.msk [vmem:[#allocation3 + $0x8] sm:$0xff] %vm225_vm1, %v3908_v44  ;;  %5577 = vmatmul.mubr.msk.f32.gmra.mrb[24].mxu1 %vm225_vm1, %v7741_v6 }
 0x1d8   : > { %v3723_v43 = vmax.f32 %v3627_v28, %v3675_v61  ;;  %v3534_v30 = vld [vmem:[#allocation2 + $0x58] sm:$0xf]  ;;  %v2439_v35 = vld [vmem:[#allocation2 + $0xe8] sm:$0xf]  ;;  %v2860_v55 = vld [vmem:[#allocation3 + $0xb0] sm:$0xff]  ;;  %v3912_v60 = vmax.f32 %v3816_v32, %v3864_v11  ;;  %v3821_v2 = vmax.f32 %v3725_v1, %v3773_v49  ;;  %5579 = vmatprep.mubr.msk.f32.mxu1 %vm225_vm1, %v7636_v16  ;;  %2363 = vst.msk [vmem:[#allocation2 + $0x19a] sm:$0xff] %vm225_vm1, %v1680_v39 }
 0x1d9   : > { %v3869_v57 = vld [vmem:[#allocation2 + $0xb0] sm:$0xff]  ;;  %v3867_v13 = vld [vmem:[#allocation2 + $0xa0] sm:$0xf]  ;;  %v3630_v18 = vmax.f32 %v3534_v30, %v3582_v31  ;;  %v3585_v24 = vld [vmem:[#allocation2 + $0x88] sm:$0xf]  ;;  %5507 = vmatmul.mubr.msk.f32.gmra.mrb[60].mxu0 %vm225_vm1, %v1679_v50  ;;  %2362 = vst.msk [vmem:[#allocation2 + $0x18a] sm:$0xff] %vm225_vm1, %v1679_v50  ;;  %v3914_v45 = vmax.f32 %v3818_v23, %v3773_v49  ;;  %v2487_v62 = vmax.f32 %v7759_v37, %v2439_v35 }
 0x1da   : > { %v3774_v3 = vld [vmem:[#allocation2 + $0xa0] sm:$0xf]  ;;  %v3819_v47 = vmax.f32 %v3723_v43, %v3771_v59  ;;  %v3537_v40 = vld [vmem:[#allocation2 + $0x70] sm:$0xf]  ;;  %v1103_v46 = vld [vmem:[#allocation2 + $0x1a8] sm:$0xf]  ;;  %5509 = vmatprep.mubr.msk.f32.mxu0 %vm225_vm1, %v1680_v39  ;;  %v3917_v42 = vmax.f32 %v3821_v2, %v3869_v57 }
 0x1db   : > { %v3681_v29 = vld [vmem:[#allocation2 + $0xa0] sm:$0xf]  ;;  %3960 = vst.msk [vmem:[#allocation3 + $0x28] sm:$0xf] %vm228_vm2, %v3912_v60  ;;  %v3726_v6 = vmax.f32 %v3630_v18, %v3678_v26  ;;  %v3633_v25 = vmax.f32 %v3537_v40, %v3585_v24  ;;  %v3870_v34 = vld [vmem:[#allocation2 + $0xb8] sm:$0xf]  ;;  %5580 = vmatmul.mubr.msk.f32.gmra.mrb[26].mxu1 %vm225_vm1, %v7743_v10 }
 0x1dc   : > { %3959 = vst.msk [vmem:[#allocation3 + $0x20] sm:$0xff] %vm225_vm1, %v3911_v19  ;;  %v7782_v56 = vld [vmem:[#allocation2 + $0x180] sm:$0xff]  ;;  %v3915_v21 = vmax.f32 %v3819_v47, %v3867_v13  ;;  %v3777_v36 = vld [vmem:[#allocation2 + $0xb8] sm:$0xf]  ;;  %3962 = vst.msk [vmem:[#allocation3 + $0x38] sm:$0xff] %vm225_vm1, %v3914_v45  ;;  %5582 = vmatprep.mubr.msk.f32.mxu1 %vm225_vm1, %v7642_v9 }
 0x1dd   : > { %v8610_v16 = vld [vmem:[#allocation32_spill] sm:$0xff]  ;;  %v2892_v7 = vld [vmem:[#allocation3 + $0xb1] sm:$0xff]  ;;  %v3822_v11 = vmax.f32 %v3726_v6, %v3774_v3  ;;  %v3729_v28 = vmax.f32 %v3633_v25, %v3681_v29  ;;  %v7789_v53 = vld [vmem:[#allocation2 + $0x168] sm:$0xff]  ;;  %3965 = vst.msk [vmem:[#allocation3 + $0x50] sm:$0xff] %vm225_vm1, %v3917_v42  ;;  %v2498_v3 = vmax.f32 %v7441_v48, %v7448_v58 }
 0x1de   : > { %v1055_v33 = vmax.f32 %v8610_v16, %v7769_v17  ;;  %v2924_v51 = vmax.f32 %v2860_v55, %v2892_v7  ;;  %3963 = vst.msk [vmem:[#allocation3 + $0x40] sm:$0xf] %vm228_vm2, %v3915_v21  ;;  %v3873_v54 = vld [vmem:[#allocation2 + $0xd0] sm:$0xf]  ;;  %v2506_v20 = vmax.f32 %v7789_v53, %v7782_v56  ;;  %v2535_v49 = vld [vmem:[#allocation2 + $0x100] sm:$0xf] }
 0x1df   : > { %v2956_v17 = vld [vmem:[#allocation3 + $0xb2] sm:$0xff]  ;;  %v3918_v32 = vmax.f32 %v3822_v11, %v3870_v34  ;;  %v3825_v10 = vmax.f32 %v3729_v28, %v3777_v36  ;;  %v2583_v61 = vmax.f32 %v2487_v62, %v2535_v49  ;;  %v2442_v35 = vld [vmem:[#allocation2 + $0x100] sm:$0xf]  ;;  %5583 = vmatmul.mubr.msk.f32.gmra.mrb[28].mxu1 %vm225_vm1, %v7761_v52  ;;  %v2394_v60 = vld [vmem:[#allocation2 + $0xe8] sm:$0xf] }
 0x1e0   : > { %v1151_v8 = vmax.f32 %v1055_v33, %v1103_v46  ;;  %v2988_v44 = vmax.f32 %v2924_v51, %v2956_v17  ;;  %v2631_v59 = vld [vmem:[#allocation2 + $0x118] sm:$0xf]  ;;  %v7798_v1 = vld [vmem:[#allocation2 + $0x1b0] sm:$0xff]  ;;  %v1200_v9 = vld [vmem:[#allocation2 + $0x1c0] sm:$0xf]  ;;  %5585 = vmatprep.mubr.msk.f32.mxu1 %vm225_vm1, %v7644_v41  ;;  %v2490_v29 = vmax.f32 %v2394_v60, %v2442_v35 }
 0x1e1   : > { %v3020_v37 = vld [vmem:[#allocation3 + $0xb3] sm:$0xff]  ;;  %3966 = vst.msk [vmem:[#allocation3 + $0x58] sm:$0xf] %vm228_vm2, %v3918_v32  ;;  %v3921_v30 = vmax.f32 %v3825_v10, %v3873_v54  ;;  %v2679_v55 = vmax.f32 %v2583_v61, %v2631_v59  ;;  %v3540_v52 = vld [vmem:[#allocation2 + $0x88] sm:$0xf] }
 0x1e2   : > { %v2727_v43 = vld [vmem:[#allocation2 + $0x130] sm:$0xf]  ;;  %v3052_v31 = vmax.f32 %v2988_v44, %v3020_v37  ;;  %v7801_v26 = vld [vmem:[#allocation2 + $0x198] sm:$0xff]  ;;  %v1248_v23 = vmax.f32 %v1151_v8, %v1200_v9  ;;  %v3588_v2 = vld [vmem:[#allocation2 + $0xa0] sm:$0xf] }
 0x1e3   : > { %v3084_v50 = vld [vmem:[#allocation3 + $0xb4] sm:$0xff]  ;;  %v2602_v39 = vmax.f32 %v2506_v20, %v7801_v26  ;;  %3969 = vst.msk [vmem:[#allocation3 + $0x70] sm:$0xf] %vm228_vm2, %v3921_v30  ;;  %v2775_v18 = vmax.f32 %v2679_v55, %v2727_v43  ;;  %v2634_v45 = vld [vmem:[#allocation2 + $0x130] sm:$0xf]  ;;  %v7820_v25 = vld [vmem:[#allocation2 + $0x188] sm:$0xff]  ;;  %v3636_v34 = vmax.f32 %v3540_v52, %v3588_v2 }
 0x1e4   : > { %v1297_v57 = vld [vmem:[#allocation2 + $0x1d8] sm:$0xf]  ;;  %v3116_v13 = vmax.f32 %v3052_v31, %v3084_v50  ;;  %v7814_v24 = vld [vmem:[#allocation2 + $0x170] sm:$0xff]  ;;  %v6030_v16 = vld [vmem:[#allocation2 + $0x1c8] sm:$0xff] }
 0x1e5   : > { %v7806_v19 = vld [vmem:[#allocation2 + $0x158] sm:$0xff]  ;;  %v2698_v47 = vmax.f32 %v2602_v39, %v7798_v1  ;;  %v1345_v40 = vmax.f32 %v1248_v23, %v1297_v57  ;;  %2823 = vst.msk [vmem:[#allocation3 + $0xd0] sm:$0xf] %vm228_vm2, %v2775_v18  ;;  %v2397_v42 = vld [vmem:[#allocation2 + $0x100] sm:$0xf]  ;;  %v2862_v8 = vld [vmem:[#allocation3 + $0xc8] sm:$0xff] }
 0x1e6   : > { %3506 = vst.msk [vmem:[#allocation2 + $0xe2] sm:$0xff] %vm225_vm1, %v3116_v13  ;;  %v2445_v41 = vld [vmem:[#allocation2 + $0x118] sm:$0xf]  ;;  %5586 = vmatmul.mubr.msk.f32.gmra.mrb[30].mxu1 %vm225_vm1, %v3116_v13  ;;  %v2594_v6 = vmax.f32 %v2498_v3, %v7806_v19  ;;  %v3780_v36 = vld [vmem:[#allocation2 + $0xd0] sm:$0xf] }
 0x1e7   : > { %v2538_v46 = vld [vmem:[#allocation2 + $0x118] sm:$0xf]  ;;  %v2794_v33 = vmax.f32 %v2698_v47, %v6030_v16  ;;  %1393 = vst.msk [vmem:[#allocation3 + $0x178] sm:$0xf] %vm228_vm2, %v1345_v40  ;;  %5588 = vmatprep.mubr.msk.f32.mxu1 %vm225_vm1, %v7646_v27  ;;  %v2730_v7 = vld [vmem:[#allocation2 + $0x148] sm:$0xf]  ;;  %v2493_v28 = vmax.f32 %v2397_v42, %v2445_v41  ;;  %v2501_v41 = vmax.f32 %v7448_v58, %v7806_v19 }
 0x1e8   : > { %v3684_v48 = vld [vmem:[#allocation2 + $0xb8] sm:$0xf]  ;;  %v2586_v21 = vmax.f32 %v2490_v29, %v2538_v46  ;;  %v2448_v11 = vld [vmem:[#allocation2 + $0x130] sm:$0xf]  ;;  %v2690_v51 = vmax.f32 %v2594_v6, %v7814_v24  ;;  %v2637_v20 = vld [vmem:[#allocation2 + $0x148] sm:$0xf]  ;;  %v2504_v46 = vmax.f32 %v7806_v19, %v7814_v24 }
 0x1e9   : > { %2842 = vst.msk [vmem:[#allocation3 + $0x168] sm:$0xff] %vm225_vm1, %v2794_v33  ;;  %v2400_v62 = vld [vmem:[#allocation2 + $0x118] sm:$0xf]  ;;  %v2541_v17 = vld [vmem:[#allocation2 + $0x130] sm:$0xf]  ;;  %v3732_v49 = vmax.f32 %v3636_v34, %v3684_v48  ;;  %v2864_v42 = vld [vmem:[#allocation3 + $0xe0] sm:$0xff]  ;;  %v7845_v19 = vmax.f32 %v2501_v41, %v7814_v24 }
 0x1ea   : > { %v2682_v54 = vmax.f32 %v2586_v21, %v2634_v45  ;;  %v2589_v32 = vmax.f32 %v2493_v28, %v2541_v17  ;;  %v2496_v10 = vmax.f32 %v2400_v62, %v2448_v11  ;;  %v2786_v44 = vmax.f32 %v2690_v51, %v7820_v25  ;;  %v2733_v61 = vld [vmem:[#allocation2 + $0x160] sm:$0xf]  ;;  %v2544_v59 = vld [vmem:[#allocation2 + $0x148] sm:$0xf]  ;;  %v1425_v30 = vld [vmem:[#allocation3 + $0x170] sm:$0xff] }
 0x1eb   : > { %v2640_v37 = vld [vmem:[#allocation2 + $0x160] sm:$0xf]  ;;  %v3828_v43 = vmax.f32 %v3732_v49, %v3780_v36  ;;  %v2451_v35 = vld [vmem:[#allocation2 + $0x148] sm:$0xf]  ;;  %v7829_v9 = vld [vmem:[#allocation2 + $0x10] sm:$0xf] }
 0x1ec   : > { %v2778_v27 = vmax.f32 %v2682_v54, %v2730_v7  ;;  %v2685_v31 = vmax.f32 %v2589_v32, %v2637_v20  ;;  %v2592_v55 = vmax.f32 %v2496_v10, %v2544_v59  ;;  %2834 = vst.msk [vmem:[#allocation3 + $0x128] sm:$0xff] %vm225_vm1, %v2786_v44  ;;  %v7831_v50 = vld [vmem:[#allocation2 + $0x28] sm:$0xf]  ;;  %v2736_v57 = vld [vmem:[#allocation2 + $0x178] sm:$0xf]  ;;  %v3086_v54 = vld [vmem:[#allocation3 + $0xcc] sm:$0xff] }
 0x1ed   : > { %v3876_v39 = vld [vmem:[#allocation2 + $0xe8] sm:$0xf]  ;;  %v3543_v18 = vld [vmem:[#allocation2 + $0xa0] sm:$0xf]  ;;  %v3591_v3 = vld [vmem:[#allocation2 + $0xb8] sm:$0xf]  ;;  %v3621_v51 = vmax.f32 %v7829_v9, %v7831_v50 }
 0x1ee   : > { %v2894_v23 = vld [vmem:[#allocation3 + $0xc9] sm:$0xff]  ;;  %2826 = vst.msk [vmem:[#allocation3 + $0xe8] sm:$0xf] %vm228_vm2, %v2778_v27  ;;  %v3924_v60 = vmax.f32 %v3828_v43, %v3876_v39  ;;  %v2781_v2 = vmax.f32 %v2685_v31, %v2733_v61  ;;  %v2688_v47 = vmax.f32 %v2592_v55, %v2640_v37  ;;  %v1457_v29 = vld [vmem:[#allocation3 + $0x171] sm:$0xff]  ;;  %v3639_v58 = vmax.f32 %v3543_v18, %v3591_v3  ;;  %v2547_v28 = vld [vmem:[#allocation2 + $0x160] sm:$0xf] }
 0x1ef   : > { %v2926_v13 = vmax.f32 %v2862_v8, %v2894_v23  ;;  %v3687_v52 = vld [vmem:[#allocation2 + $0xd0] sm:$0xf]  ;;  %v1489_v48 = vmax.f32 %v1425_v30, %v1457_v29  ;;  %v7839_v16 = vld [vmem:[#allocation2 + $0x178] sm:$0xf]  ;;  %v7849_v17 = vld [vmem:[#allocation2 + $0xe8] sm:$0xf]  ;;  %v2507_v27 = vmax.f32 %v7814_v24, %v7820_v25  ;;  %v2497_v31 = vmax.f32 %v7439_v4, %v7443_v12 }
 0x1f0   : > { %v2958_v40 = vld [vmem:[#allocation3 + $0xca] sm:$0xff]  ;;  %3972 = vst.msk [vmem:[#allocation3 + $0x88] sm:$0xf] %vm228_vm2, %v3924_v60  ;;  %2829 = vst.msk [vmem:[#allocation3 + $0x100] sm:$0xf] %vm228_vm2, %v2781_v2  ;;  %v2784_v34 = vmax.f32 %v2688_v47, %v2736_v57  ;;  %v1521_v11 = vld [vmem:[#allocation3 + $0x172] sm:$0xff]  ;;  %v7852_v10 = vmax.f32 %v3639_v58, %v3687_v52  ;;  %v7861_v23 = vmax.f32 %v2504_v46, %v7820_v25 }
 0x1f1   : > { %v2403_v45 = vld [vmem:[#allocation2 + $0x130] sm:$0xf]  ;;  %v2990_v6 = vmax.f32 %v2926_v13, %v2958_v40  ;;  %v1553_v20 = vmax.f32 %v1489_v48, %v1521_v11  ;;  %v3546_v49 = vld [vmem:[#allocation2 + $0xb8] sm:$0xf]  ;;  %v2406_v37 = vld [vmem:[#allocation2 + $0x148] sm:$0xf]  ;;  %v2693_v3 = vmax.f32 %v7845_v19, %v7820_v25 }
 0x1f2   : > { %v7841_v33 = vld [vmem:[#allocation2 + $0x190] sm:$0xf]  ;;  %v2499_v36 = vmax.f32 %v2403_v45, %v2451_v35  ;;  %2832 = vst.msk [vmem:[#allocation3 + $0x118] sm:$0xf] %vm228_vm2, %v2784_v34  ;;  %v2643_v32 = vld [vmem:[#allocation2 + $0x178] sm:$0xf]  ;;  %v3831_v18 = vmax.f32 %v7852_v10, %v7849_v17 }
 0x1f3   : > { %v3594_v21 = vld [vmem:[#allocation2 + $0xd0] sm:$0xf]  ;;  %v2508_v61 = vmax.f32 %v7839_v16, %v7841_v33  ;;  %v2866_v59 = vld [vmem:[#allocation3 + $0xf8] sm:$0xff]  ;;  %v2454_v43 = vld [vmem:[#allocation2 + $0x160] sm:$0xf] }
 0x1f4   : > { %v3022_v7 = vld [vmem:[#allocation3 + $0xcb] sm:$0xff]  ;;  %v2595_v8 = vmax.f32 %v2499_v36, %v2547_v28  ;;  %v1585_v44 = vld [vmem:[#allocation3 + $0x173] sm:$0xff]  ;;  %v3642_v2 = vmax.f32 %v3546_v49, %v3594_v21  ;;  %v2502_v45 = vmax.f32 %v2406_v37, %v2454_v43  ;;  %v7875_v21 = vld [vmem:[#allocation2 + $0x160] sm:$0xf] }
 0x1f5   : > { %v3054_v62 = vmax.f32 %v2990_v6, %v3022_v7  ;;  %v2739_v30 = vld [vmem:[#allocation2 + $0x190] sm:$0xf]  ;;  %v1617_v55 = vmax.f32 %v1553_v20, %v1585_v44  ;;  %v1649_v39 = vld [vmem:[#allocation3 + $0x174] sm:$0xff]  ;;  %v2896_v57 = vld [vmem:[#allocation3 + $0xe1] sm:$0xff] }
 0x1f6   : > { %v3690_v60 = vld [vmem:[#allocation2 + $0xe8] sm:$0xf]  ;;  %v2691_v13 = vmax.f32 %v2595_v8, %v2643_v32  ;;  %v2928_v52 = vmax.f32 %v2864_v42, %v2896_v57  ;;  %v7867_v47 = vld [vmem:[#allocation2 + $0x178] sm:$0xf]  ;;  %v2545_v40 = vld [vmem:[#allocation2 + $0x150] sm:$0xff] }
 0x1f7   : > { %v3118_v35 = vmax.f32 %v3054_v62, %v3086_v54  ;;  %v2550_v4 = vld [vmem:[#allocation2 + $0x178] sm:$0xf]  ;;  %v1681_v29 = vmax.f32 %v1617_v55, %v1649_v39  ;;  %v2960_v41 = vld [vmem:[#allocation3 + $0xe2] sm:$0xff]  ;;  %v2593_v6 = vmax.f32 %v2497_v31, %v2545_v40  ;;  %v7871_v34 = vmax.f32 %v3642_v2, %v3690_v60  ;;  %v2868_v42 = vld [vmem:[#allocation3 + $0x110] sm:$0xff] }
 0x1f8   : > { %v2787_v46 = vmax.f32 %v2691_v13, %v2739_v30  ;;  %v2992_v48 = vmax.f32 %v2928_v52, %v2960_v41  ;;  %v2898_v36 = vld [vmem:[#allocation3 + $0xf9] sm:$0xff]  ;;  %v2500_v7 = vmax.f32 %v7443_v12, %v2545_v40  ;;  %v2503_v58 = vmax.f32 %v2545_v40, %v7789_v53  ;;  %v3024_v11 = vld [vmem:[#allocation3 + $0xe3] sm:$0xff]  ;;  %v7887_v20 = vld [vmem:[#allocation2 + $0x30] sm:$0xff] }
 0x1f9   : > { %3508 = vst.msk [vmem:[#allocation2 + $0xfa] sm:$0xff] %vm225_vm1, %v3118_v35  ;;  %5589 = vmatmul.mubr.msk.f32.gmra.mrb[0].mxu1 %vm225_vm1, %v3118_v35  ;;  %5510 = vmatmul.mubr.msk.f32.gmra.mrb[62].mxu0 %vm225_vm1, %v1681_v29  ;;  %2364 = vst.msk [vmem:[#allocation2 + $0x1a2] sm:$0xff] %vm225_vm1, %v1681_v29  ;;  %v2930_v28 = vmax.f32 %v2866_v59, %v2898_v36  ;;  %v7882_v62 = vmax.f32 %v2502_v45, %v2550_v4  ;;  %v8611_v12 = vld [vmem:[#allocation5_spill] sm:$0xff]  ;;  %v2962_v8 = vld [vmem:[#allocation3 + $0xfa] sm:$0xff] }
 0x1fa   : > { %5591 = vmatprep.mubr.msk.f32.mxu1 %vm225_vm1, %v7652_v14  ;;  %2835 = vst.msk [vmem:[#allocation3 + $0x130] sm:$0xf] %vm228_vm2, %v2787_v46  ;;  %v2689_v54 = vmax.f32 %v2593_v6, %v7789_v53  ;;  %v2505_v14 = vmax.f32 %v7875_v21, %v7867_v47  ;;  %5514 = vmatprep.mubr.msk.f32.mxu0 %vm225_vm1, %v8611_v12  ;;  %v7891_v32 = vld [vmem:[#allocation2 + $0xe8] sm:$0xf]  ;;  %v2900_v44 = vld [vmem:[#allocation3 + $0x111] sm:$0xff]  ;;  %v8612_v30 = vld [vmem:[#allocation12_spill] sm:$0xff] }
 0x1fb   : > { %v3056_v49 = vmax.f32 %v2992_v48, %v3024_v11  ;;  %v7893_v59 = vld [vmem:[#allocation2 + $0x190] sm:$0xf]  ;;  %v2596_v37 = vmax.f32 %v2500_v7, %v7789_v53  ;;  %v2599_v43 = vmax.f32 %v2503_v58, %v7782_v56  ;;  %v3715_v31 = vmax.f32 %v8612_v30, %v7887_v20  ;;  %v3088_v35 = vld [vmem:[#allocation3 + $0xe4] sm:$0xff]  ;;  %v6031_v52 = vld [vmem:[#allocation2 + $0x18] sm:$0xff] }
 0x1fc   : > { %v2994_v55 = vmax.f32 %v2930_v28, %v2962_v8  ;;  %v2932_v39 = vmax.f32 %v2868_v42, %v2900_v44  ;;  %v2785_v57 = vmax.f32 %v2689_v54, %v7782_v56  ;;  %v7900_v60 = vld [vmem:[#allocation2 + $0x48] sm:$0xff]  ;;  %v7902_v13 = vld [vmem:[#allocation2 + $0x60] sm:$0xff]  ;;  %v3622_v2 = vmax.f32 %v6031_v52, %v7887_v20  ;;  %v2964_v53 = vld [vmem:[#allocation3 + $0x112] sm:$0xff] }
 0x1fd   : > { %v3120_v47 = vmax.f32 %v3056_v49, %v3088_v35  ;;  %v3026_v4 = vld [vmem:[#allocation3 + $0xfb] sm:$0xff]  ;;  %v2692_v40 = vmax.f32 %v2596_v37, %v7782_v56  ;;  %v2695_v29 = vmax.f32 %v2599_v43, %v7801_v26  ;;  %v3811_v41 = vmax.f32 %v3715_v31, %v7900_v60  ;;  %v2553_v36 = vld [vmem:[#allocation2 + $0x190] sm:$0xf]  ;;  %v2870_v37 = vld [vmem:[#allocation3 + $0x128] sm:$0xff] }
 0x1fe   : > { %v3669_v46 = vld [vmem:[#allocation2 + $0x40] sm:$0xf]  ;;  %v3058_v6 = vmax.f32 %v2994_v55, %v3026_v4  ;;  %v2996_v48 = vmax.f32 %v2932_v39, %v2964_v53  ;;  %2833 = vst.msk [vmem:[#allocation3 + $0x120] sm:$0xff] %vm225_vm1, %v2785_v57  ;;  %v3765_v21 = vld [vmem:[#allocation2 + $0x58] sm:$0xf]  ;;  %v7915_v56 = vmax.f32 %v3622_v2, %v7900_v60  ;;  %v7939_v17 = vmax.f32 %v2505_v14, %v2553_v36  ;;  %v8615_v39 = vld [vmem:[#allocation6_spill] sm:$0xff] }
 0x1ff   : > { %v8613_v45 = vld [vmem:[#allocation4_spill] sm:$0xff]  ;;  %v3717_v42 = vmax.f32 %v3621_v51, %v3669_v46  ;;  %3510 = vst.msk [vmem:[#allocation2 + $0x112] sm:$0xff] %vm225_vm1, %v3120_v47  ;;  %v8614_v11 = vld [vmem:[#allocation7_spill] sm:$0xff]  ;;  %v7922_v54 = vld [vmem:[#allocation2 + $0xd0] sm:$0xf]  ;;  %5592 = vmatmul.mubr.msk.f32.gmra.mrb[2].mxu1 %vm225_vm1, %v3120_v47  ;;  %v2788_v9 = vmax.f32 %v2692_v40, %v7801_v26  ;;  %v2791_v50 = vmax.f32 %v2695_v29, %v7798_v1 }
 0x200   : > { %5515 = vmatmul.mubr.msk.f32.vlgmr.msra.gmra.mrb[32].mxu0 %vm225_vm1, %v8613_v45  ;;  %v3879_v7 = vld [vmem:[#allocation2 + $0x100] sm:$0xf]  ;;  %v3907_v51 = vmax.f32 %v3811_v41, %v7902_v13  ;;  %v3645_v8 = vmax.f32 %v7922_v54, %v7891_v32  ;;  %v3028_v44 = vld [vmem:[#allocation3 + $0x113] sm:$0xff]  ;;  %5594 = vmatprep.mubr.msk.f32.mxu1 %vm225_vm1, %v7654_v0  ;;  %v2694_v26 = vmax.f32 %v7882_v62, %v7893_v59  ;;  %v2556_v30 = vld [vmem:[#allocation2 + $0x1a8] sm:$0xf] }
 0x201   : > { %v7917_v58 = vld [vmem:[#allocation2 + $0x1c0] sm:$0xf]  ;;  %5517 = vmatprep.mubr.msk.f32.mxu0 %vm225_vm1, %v8614_v11  ;;  %v3927_v12 = vmax.f32 %v3831_v18, %v3879_v7  ;;  %v3861_v43 = vld [vmem:[#allocation2 + $0x70] sm:$0xf]  ;;  %v2748_v31 = vld [vmem:[#allocation2 + $0x1d8] sm:$0xf]  ;;  %v3060_v35 = vmax.f32 %v2996_v48, %v3028_v44  ;;  %v3813_v10 = vmax.f32 %v3717_v42, %v3765_v21  ;;  %v3814_v0 = vmax.f32 %v7915_v56, %v7902_v13 }
 0x202   : > { %v3090_v28 = vld [vmem:[#allocation3 + $0xfc] sm:$0xff]  ;;  %v2902_v55 = vld [vmem:[#allocation3 + $0x129] sm:$0xff]  ;;  %2836 = vst.msk [vmem:[#allocation3 + $0x138] sm:$0xff] %vm225_vm1, %v2788_v9  ;;  %2839 = vst.msk [vmem:[#allocation3 + $0x150] sm:$0xff] %vm225_vm1, %v2791_v50  ;;  %v2604_v62 = vmax.f32 %v2508_v61, %v2556_v30 }
 0x203   : > { %v3122_v49 = vmax.f32 %v3058_v6, %v3090_v28  ;;  %v2555_v1 = vld [vmem:[#allocation2 + $0x1a0] sm:$0xff]  ;;  %3955 = vst.msk [vmem:[#allocation3] sm:$0xff] %vm225_vm1, %v3907_v51  ;;  %v3092_v57 = vld [vmem:[#allocation3 + $0x114] sm:$0xff]  ;;  %v2934_v33 = vmax.f32 %v2870_v37, %v2902_v55  ;;  %v2742_v61 = vld [vmem:[#allocation2 + $0x1a8] sm:$0xf]  ;;  %v3909_v19 = vmax.f32 %v3813_v10, %v3861_v43 }
 0x204   : > { %3975 = vst.msk [vmem:[#allocation3 + $0xa0] sm:$0xf] %vm228_vm2, %v3927_v12  ;;  %v2603_v18 = vmax.f32 %v2507_v27, %v2555_v1  ;;  %v2696_v32 = vmax.f32 %v7861_v23, %v2555_v1  ;;  %v2789_v14 = vmax.f32 %v2693_v3, %v2555_v1  ;;  %v3786_v59 = vld [vmem:[#allocation2 + $0x100] sm:$0xf]  ;;  %5518 = vmatmul.mubr.msk.f32.gmra.mrb[34].mxu0 %vm225_vm1, %v8615_v39  ;;  %v7958_v52 = vld [vmem:[#allocation2 + $0x78] sm:$0xff]  ;;  %v8616_v27 = vld [vmem:[#allocation9_spill] sm:$0xff] }
 0x205   : > { %3512 = vst.msk [vmem:[#allocation2 + $0x12a] sm:$0xff] %vm225_vm1, %v3122_v49  ;;  %v3693_v24 = vld [vmem:[#allocation2 + $0x100] sm:$0xf]  ;;  %5520 = vmatprep.mubr.msk.f32.mxu0 %vm225_vm1, %v8616_v27  ;;  %v3124_v16 = vmax.f32 %v3060_v35, %v3092_v57  ;;  %5595 = vmatmul.mubr.msk.f32.gmra.mrb[4].mxu1 %vm225_vm1, %v3122_v49  ;;  %v2649_v25 = vld [vmem:[#allocation2 + $0x1a8] sm:$0xf]  ;;  %v7963_v23 = vld [vmem:[#allocation2 + $0x1b8] sm:$0xff]  ;;  %v2700_v2 = vmax.f32 %v2604_v62, %v7917_v58 }
 0x206   : > { %v2699_v3 = vmax.f32 %v2603_v18, %v7963_v23  ;;  %v2792_v47 = vmax.f32 %v2696_v32, %v7963_v23  ;;  %2837 = vst.msk [vmem:[#allocation3 + $0x140] sm:$0xff] %vm225_vm1, %v2789_v14  ;;  %v3552_v4 = vld [vmem:[#allocation2 + $0xe8] sm:$0xf]  ;;  %v3600_v53 = vld [vmem:[#allocation2 + $0x100] sm:$0xf]  ;;  %5597 = vmatprep.mubr.msk.f32.mxu1 %vm225_vm1, %v7656_v63  ;;  %v2790_v29 = vmax.f32 %v2694_v26, %v2742_v61  ;;  %v7976_v56 = vld [vmem:[#allocation2 + $0x1d0] sm:$0xff] }
 0x207   : > { %v2966_v40 = vld [vmem:[#allocation3 + $0x12a] sm:$0xff]  ;;  %v2745_v41 = vld [vmem:[#allocation2 + $0x1c0] sm:$0xf]  ;;  %v3834_v46 = vmax.f32 %v7871_v34, %v3786_v59  ;;  %3514 = vst.msk [vmem:[#allocation2 + $0x142] sm:$0xff] %vm225_vm1, %v3124_v16  ;;  %v2697_v42 = vmax.f32 %v7939_v17, %v2649_v25  ;;  %v3910_v21 = vmax.f32 %v3814_v0, %v7958_v52  ;;  %v2796_v7 = vmax.f32 %v2700_v2, %v2748_v31  ;;  %v3882_v34 = vld [vmem:[#allocation2 + $0x118] sm:$0xf] }
 0x208   : > { %v2998_v45 = vmax.f32 %v2934_v33, %v2966_v40  ;;  %v3030_v6 = vld [vmem:[#allocation3 + $0x12b] sm:$0xff]  ;;  %v2869_v48 = vld [vmem:[#allocation3 + $0x120] sm:$0xff]  ;;  %3957 = vst.msk [vmem:[#allocation3 + $0x10] sm:$0xf] %vm228_vm2, %v3909_v19  ;;  %v2795_v63 = vmax.f32 %v2699_v3, %v7976_v56  ;;  %v3741_v58 = vmax.f32 %v3645_v8, %v3693_v24  ;;  %v3789_v11 = vld [vmem:[#allocation2 + $0x118] sm:$0xf]  ;;  %v3648_v51 = vmax.f32 %v3552_v4, %v3600_v53 }
 0x209   : > { %v2901_v36 = vld [vmem:[#allocation3 + $0x121] sm:$0xff]  ;;  %2840 = vst.msk [vmem:[#allocation3 + $0x158] sm:$0xff] %vm225_vm1, %v2792_v47  ;;  %v3696_v28 = vld [vmem:[#allocation2 + $0x118] sm:$0xf]  ;;  %v3930_v50 = vmax.f32 %v3834_v46, %v3882_v34  ;;  %3958 = vst.msk [vmem:[#allocation3 + $0x18] sm:$0xff] %vm225_vm1, %v3910_v21  ;;  %5598 = vmatmul.mubr.msk.f32.gmra.mrb[6].mxu1 %vm225_vm1, %v3124_v16  ;;  %v2793_v30 = vmax.f32 %v2697_v42, %v2745_v41  ;;  %v3625_v31 = vmax.f32 %v7887_v20, %v7900_v60 }
 0x20a   : > { %v8617_v54 = vld [vmem:[#allocation8_spill] sm:$0xff]  ;;  %2838 = vst.msk [vmem:[#allocation3 + $0x148] sm:$0xf] %vm228_vm2, %v2790_v29  ;;  %v2933_v9 = vmax.f32 %v2869_v48, %v2901_v36  ;;  %v8618_v12 = vld [vmem:[#allocation15_spill] sm:$0xff]  ;;  %v3062_v49 = vmax.f32 %v2998_v45, %v3030_v6  ;;  %2844 = vst.msk [vmem:[#allocation3 + $0x178] sm:$0xf] %vm228_vm2, %v2796_v7  ;;  %v3837_v8 = vmax.f32 %v3741_v58, %v3789_v11 }
 0x20b   : > { %5521 = vmatmul.mubr.msk.f32.gmra.mrb[36].mxu0 %vm225_vm1, %v8617_v54  ;;  %v2965_v44 = vld [vmem:[#allocation3 + $0x122] sm:$0xff]  ;;  %2843 = vst.msk [vmem:[#allocation3 + $0x170] sm:$0xff] %vm225_vm1, %v2795_v63  ;;  %v3094_v37 = vld [vmem:[#allocation3 + $0x12c] sm:$0xff]  ;;  %v3603_v26 = vld [vmem:[#allocation2 + $0x118] sm:$0xf]  ;;  %v3744_v55 = vmax.f32 %v3648_v51, %v3696_v28  ;;  %v3721_v20 = vmax.f32 %v3625_v31, %v7902_v13 }
 0x20c   : > { %5523 = vmatprep.mubr.msk.f32.mxu0 %vm225_vm1, %v8618_v12  ;;  %v2997_v43 = vmax.f32 %v2933_v9, %v2965_v44  ;;  %v3029_v1 = vld [vmem:[#allocation3 + $0x123] sm:$0xff]  ;;  %3978 = vst.msk [vmem:[#allocation3 + $0xb8] sm:$0xf] %vm228_vm2, %v3930_v50  ;;  %v3885_v35 = vld [vmem:[#allocation2 + $0x130] sm:$0xf]  ;;  %v3126_v10 = vmax.f32 %v3062_v49, %v3094_v37  ;;  %v2871_v0 = vld [vmem:[#allocation3 + $0x138] sm:$0xff] }
 0x20d   : > { %v3792_v17 = vld [vmem:[#allocation2 + $0x130] sm:$0xf]  ;;  %v3933_v18 = vmax.f32 %v3837_v8, %v3885_v35  ;;  %v3555_v62 = vld [vmem:[#allocation2 + $0x100] sm:$0xf]  ;;  %2841 = vst.msk [vmem:[#allocation3 + $0x160] sm:$0xf] %vm228_vm2, %v2793_v30  ;;  %v3817_v53 = vmax.f32 %v3721_v20, %v7958_v52 }
 0x20e   : > { %v3699_v32 = vld [vmem:[#allocation2 + $0x130] sm:$0xf]  ;;  %v3061_v59 = vmax.f32 %v2997_v43, %v3029_v1  ;;  %v7995_v39 = vld [vmem:[#allocation3 + $0x20] sm:$0xff]  ;;  %v3840_v24 = vmax.f32 %v3744_v55, %v3792_v17  ;;  %3516 = vst.msk [vmem:[#allocation2 + $0x15a] sm:$0xff] %vm225_vm1, %v3126_v10  ;;  %v3651_v27 = vmax.f32 %v3555_v62, %v3603_v26  ;;  %v8620_v16 = vld [vmem:[#allocation17_spill] sm:$0xff] }
 0x20f   : > { %v8619_v14 = vld [vmem:[#allocation14_spill] sm:$0xff]  ;;  %v2872_v33 = vld [vmem:[#allocation3 + $0x140] sm:$0xff]  ;;  %3981 = vst.msk [vmem:[#allocation3 + $0xd0] sm:$0xf] %vm228_vm2, %v3933_v18  ;;  %v3888_v19 = vld [vmem:[#allocation2 + $0x148] sm:$0xf] }
 0x210   : > { %5524 = vmatmul.mubr.msk.f32.gmra.mrb[38].mxu0 %vm225_vm1, %v8619_v14  ;;  %v7998_v57 = vld [vmem:[#allocation2 + $0x90] sm:$0xff]  ;;  %v3093_v61 = vld [vmem:[#allocation3 + $0x124] sm:$0xff]  ;;  %v2903_v25 = vld [vmem:[#allocation3 + $0x139] sm:$0xff]  ;;  %v3936_v40 = vmax.f32 %v3840_v24, %v3888_v19  ;;  %v3747_v29 = vmax.f32 %v3651_v27, %v3699_v32 }
 0x211   : > { %5526 = vmatprep.mubr.msk.f32.mxu0 %vm225_vm1, %v8620_v16  ;;  %v3795_v3 = vld [vmem:[#allocation2 + $0x148] sm:$0xf]  ;;  %v3125_v2 = vmax.f32 %v3061_v59, %v3093_v61  ;;  %v2935_v47 = vmax.f32 %v2871_v0, %v2903_v25  ;;  %v2967_v46 = vld [vmem:[#allocation3 + $0x13a] sm:$0xff]  ;;  %v2873_v45 = vld [vmem:[#allocation3 + $0x150] sm:$0xff]  ;;  %v3913_v21 = vmax.f32 %v3817_v53, %v7998_v57 }
 0x212   : > { %v4038_v4 = vld [vmem:[#allocation3 + $0x21] sm:$0xff]  ;;  %v3606_v48 = vld [vmem:[#allocation2 + $0x130] sm:$0xf]  ;;  %3984 = vst.msk [vmem:[#allocation3 + $0xe8] sm:$0xf] %vm228_vm2, %v3936_v40  ;;  %v3843_v63 = vmax.f32 %v3747_v29, %v3795_v3  ;;  %v8622_v34 = vld [vmem:[#allocation19_spill] sm:$0xff] }
 0x213   : > { %v2904_v41 = vld [vmem:[#allocation3 + $0x141] sm:$0xff]  ;;  %5600 = vmatprep.mubr.msk.f32.mxu1 %vm225_vm1, %v3125_v2  ;;  %v2999_v42 = vmax.f32 %v2935_v47, %v2967_v46  ;;  %3515 = vst.msk [vmem:[#allocation2 + $0x152] sm:$0xff] %vm225_vm1, %v3125_v2  ;;  %v2905_v11 = vld [vmem:[#allocation3 + $0x151] sm:$0xff]  ;;  %v4070_v54 = vmax.f32 %v7995_v39, %v4038_v4  ;;  %3961 = vst.msk [vmem:[#allocation3 + $0x30] sm:$0xff] %vm225_vm1, %v3913_v21 }
 0x214   : > { %v2936_v6 = vmax.f32 %v2872_v33, %v2904_v41  ;;  %v8621_v36 = vld [vmem:[#allocation16_spill] sm:$0xff]  ;;  %5601 = vmatmul.mubr.msk.f32.gmra.mrb[8].mxu1 %vm225_vm1, %v3126_v10  ;;  %v8014_v28 = vld [vmem:[#allocation3 + $0x168] sm:$0xff]  ;;  %v8017_v9 = vld [vmem:[#allocation2 + $0x138] sm:$0xff]  ;;  %v2937_v8 = vmax.f32 %v2873_v45, %v2905_v11 }
 0x215   : > { %5527 = vmatmul.mubr.msk.f32.gmra.mrb[40].mxu0 %vm225_vm1, %v8621_v36  ;;  %v2968_v7 = vld [vmem:[#allocation3 + $0x142] sm:$0xff]  ;;  %v3558_v12 = vld [vmem:[#allocation2 + $0x118] sm:$0xf]  ;;  %v8623_v10 = vld [vmem:[#allocation18_spill] sm:$0xff]  ;;  %v3841_v40 = vmax.f32 %v7720_v5, %v8017_v9  ;;  %v3628_v36 = vmax.f32 %v7900_v60, %v7902_v13 }
 0x216   : > { %5529 = vmatprep.mubr.msk.f32.mxu0 %vm225_vm1, %v8622_v34  ;;  %v3031_v58 = vld [vmem:[#allocation3 + $0x13b] sm:$0xff]  ;;  %v3000_v50 = vmax.f32 %v2936_v6, %v2968_v7  ;;  %v3032_v51 = vld [vmem:[#allocation3 + $0x143] sm:$0xff]  ;;  %v2969_v1 = vld [vmem:[#allocation3 + $0x152] sm:$0xff]  ;;  %v3654_v59 = vmax.f32 %v3558_v12, %v3606_v48 }
 0x217   : > { %v3702_v49 = vld [vmem:[#allocation2 + $0x148] sm:$0xf]  ;;  %v3063_v44 = vmax.f32 %v2999_v42, %v3031_v58  ;;  %v2874_v37 = vld [vmem:[#allocation3 + $0x158] sm:$0xff]  ;;  %v3891_v31 = vld [vmem:[#allocation2 + $0x160] sm:$0xf]  ;;  %v3001_v0 = vmax.f32 %v2937_v8, %v2969_v1 }
 0x218   : > { %v4102_v26 = vld [vmem:[#allocation3 + $0x22] sm:$0xff]  ;;  %v2906_v30 = vld [vmem:[#allocation3 + $0x159] sm:$0xff]  ;;  %v3064_v35 = vmax.f32 %v3000_v50, %v3032_v51  ;;  %v3939_v14 = vmax.f32 %v3843_v63, %v3891_v31  ;;  %v2876_v4 = vld [vmem:[#allocation3 + $0x170] sm:$0xff]  ;;  %v8036_v29 = vmax.f32 %v3654_v59, %v3702_v49  ;;  %v8061_v31 = vmax.f32 %v3628_v36, %v7958_v52 }
 0x219   : > { %v3095_v43 = vld [vmem:[#allocation3 + $0x13c] sm:$0xff]  ;;  %v3096_v55 = vld [vmem:[#allocation3 + $0x144] sm:$0xff]  ;;  %5530 = vmatmul.mubr.msk.f32.gmra.mrb[42].mxu0 %vm225_vm1, %v8623_v10  ;;  %v3033_v18 = vld [vmem:[#allocation3 + $0x153] sm:$0xff]  ;;  %v2938_v62 = vmax.f32 %v2874_v37, %v2906_v30  ;;  %v8028_v61 = vmax.f32 %v4070_v54, %v4102_v26 }
 0x21a   : > { %v3127_v17 = vmax.f32 %v3063_v44, %v3095_v43  ;;  %v4003_v32 = vld [vmem:[#allocation3] sm:$0xff]  ;;  %v8624_v39 = vld [vmem:[#allocation21_spill] sm:$0xff]  ;;  %v3128_v25 = vmax.f32 %v3064_v35, %v3096_v55  ;;  %v3065_v19 = vmax.f32 %v3001_v0, %v3033_v18  ;;  %v3097_v3 = vld [vmem:[#allocation3 + $0x154] sm:$0xff]  ;;  %3987 = vst.msk [vmem:[#allocation3 + $0x100] sm:$0xf] %vm228_vm2, %v3939_v14  ;;  %v3631_v44 = vmax.f32 %v7902_v13, %v7958_v52 }
 0x21b   : > { %5532 = vmatprep.mubr.msk.f32.mxu0 %vm225_vm1, %v8624_v39  ;;  %v2970_v20 = vld [vmem:[#allocation3 + $0x15a] sm:$0xff]  ;;  %v8024_v24 = vld [vmem:[#allocation2 + $0x128] sm:$0xff]  ;;  %v2908_v53 = vld [vmem:[#allocation3 + $0x171] sm:$0xff] }
 0x21c   : > { %v8026_v27 = vld [vmem:[#allocation2 + $0x140] sm:$0xff]  ;;  %v2907_v16 = vld [vmem:[#allocation3 + $0x169] sm:$0xff]  ;;  %5603 = vmatprep.mubr.msk.f32.mxu1 %vm225_vm1, %v3127_v17  ;;  %3517 = vst.msk [vmem:[#allocation2 + $0x16a] sm:$0xff] %vm225_vm1, %v3127_v17  ;;  %v3002_v2 = vmax.f32 %v2938_v62, %v2970_v20  ;;  %v2940_v6 = vmax.f32 %v2876_v4, %v2908_v53  ;;  %3518 = vst.msk [vmem:[#allocation2 + $0x172] sm:$0xff] %vm225_vm1, %v3128_v25  ;;  %v3129_v42 = vmax.f32 %v3065_v19, %v3097_v3 }
 0x21d   : > { %v4004_v33 = vld [vmem:[#allocation3 + $0x8] sm:$0xff]  ;;  %v2939_v47 = vmax.f32 %v8014_v28, %v2907_v16  ;;  %v8038_v41 = vld [vmem:[#allocation2 + $0x160] sm:$0xf]  ;;  %5604 = vmatmul.mubr.msk.f32.gmra.mrb[10].mxu1 %vm225_vm1, %v3128_v25  ;;  %v3656_v7 = vmax.f32 %v8024_v24, %v8026_v27  ;;  %v2972_v58 = vld [vmem:[#allocation3 + $0x172] sm:$0xff] }
 0x21e   : > { %v3034_v46 = vld [vmem:[#allocation3 + $0x15b] sm:$0xff]  ;;  %v8040_v48 = vld [vmem:[#allocation3 + $0x23] sm:$0xff]  ;;  %v3035_v50 = vld [vmem:[#allocation3 + $0x16b] sm:$0xff]  ;;  %v3004_v51 = vmax.f32 %v2940_v6, %v2972_v58  ;;  %5606 = vmatprep.mubr.msk.f32.mxu1 %vm225_vm1, %v3129_v42  ;;  %3519 = vst.msk [vmem:[#allocation2 + $0x182] sm:$0xff] %vm225_vm1, %v3129_v42  ;;  %v3846_v35 = vmax.f32 %v8036_v29, %v8038_v41 }
 0x21f   : > { %v3098_v45 = vld [vmem:[#allocation3 + $0x15c] sm:$0xff]  ;;  %v3066_v63 = vmax.f32 %v3002_v2, %v3034_v46  ;;  %v2971_v34 = vld [vmem:[#allocation3 + $0x16a] sm:$0xff]  ;;  %v3036_v26 = vld [vmem:[#allocation3 + $0x173] sm:$0xff]  ;;  %v4198_v30 = vmax.f32 %v8028_v61, %v8040_v48  ;;  %v8075_v48 = vmax.f32 %v3631_v44, %v7998_v57 }
 0x220   : > { %v8625_v21 = vld [vmem:[#allocation20_spill] sm:$0xff]  ;;  %v8626_v28 = vld [vmem:[#allocation23_spill] sm:$0xff]  ;;  %v3003_v60 = vmax.f32 %v2939_v47, %v2971_v34  ;;  %v4036_v49 = vld [vmem:[#allocation3 + $0x9] sm:$0xff]  ;;  %v3068_v13 = vmax.f32 %v3004_v51, %v3036_v26 }
 0x221   : > { %5533 = vmatmul.mubr.msk.f32.gmra.mrb[44].mxu0 %vm225_vm1, %v8625_v21  ;;  %v4035_v11 = vld [vmem:[#allocation3 + $0x1] sm:$0xff]  ;;  %v8052_v54 = vld [vmem:[#allocation2 + $0x158] sm:$0xff]  ;;  %v3130_v8 = vmax.f32 %v3066_v63, %v3098_v45  ;;  %v3099_v37 = vld [vmem:[#allocation3 + $0x16c] sm:$0xff]  ;;  %v4068_v1 = vmax.f32 %v4004_v33, %v4036_v49 }
 0x222   : > { %5535 = vmatprep.mubr.msk.f32.mxu0 %vm225_vm1, %v8626_v28  ;;  %v4067_v12 = vmax.f32 %v4003_v32, %v4035_v11  ;;  %v4099_v43 = vld [vmem:[#allocation3 + $0x2] sm:$0xff]  ;;  %v3067_v55 = vmax.f32 %v3003_v60, %v3035_v50  ;;  %v4100_v10 = vld [vmem:[#allocation3 + $0xa] sm:$0xff]  ;;  %v4005_v0 = vld [vmem:[#allocation3 + $0x18] sm:$0xff]  ;;  %v8068_v62 = vmax.f32 %v3656_v7, %v8052_v54  ;;  %v3659_v19 = vmax.f32 %v8026_v27, %v8052_v54 }
 0x223   : > { %v4037_v18 = vld [vmem:[#allocation3 + $0x19] sm:$0xff]  ;;  %5607 = vmatmul.mubr.msk.f32.gmra.mrb[12].mxu1 %vm225_vm1, %v3130_v8  ;;  %3520 = vst.msk [vmem:[#allocation2 + $0x18a] sm:$0xff] %vm225_vm1, %v3130_v8  ;;  %v8627_v32 = vld [vmem:[#allocation22_spill] sm:$0xff]  ;;  %v4163_v59 = vld [vmem:[#allocation3 + $0x3] sm:$0xff]  ;;  %v4132_v39 = vmax.f32 %v4068_v1, %v4100_v10  ;;  %v3634_v11 = vmax.f32 %v7958_v52, %v7998_v57  ;;  %v3820_v8 = vmax.f32 %v8061_v31, %v7998_v57 }
 0x224   : > { %v4131_v17 = vmax.f32 %v4067_v12, %v4099_v43  ;;  %v3100_v14 = vld [vmem:[#allocation3 + $0x174] sm:$0xff]  ;;  %v4069_v20 = vmax.f32 %v4005_v0, %v4037_v18  ;;  %v4230_v16 = vld [vmem:[#allocation3 + $0x24] sm:$0xff]  ;;  %v3131_v61 = vmax.f32 %v3067_v55, %v3099_v37  ;;  %v4228_v63 = vld [vmem:[#allocation3 + $0xc] sm:$0xff] }
 0x225   : > { %5536 = vmatmul.mubr.msk.f32.gmra.mrb[46].mxu0 %vm225_vm1, %v8627_v32  ;;  %v4007_v33 = vld [vmem:[#allocation3 + $0x30] sm:$0xff]  ;;  %v3132_v25 = vmax.f32 %v3068_v13, %v3100_v14  ;;  %v4101_v47 = vld [vmem:[#allocation3 + $0x1a] sm:$0xff]  ;;  %v4227_v53 = vld [vmem:[#allocation3 + $0x4] sm:$0xff]  ;;  %v8082_v34 = vmax.f32 %v4198_v30, %v4230_v16 }
 0x226   : > { %v4195_v3 = vmax.f32 %v4131_v17, %v4163_v59  ;;  %v4164_v2 = vld [vmem:[#allocation3 + $0xb] sm:$0xff]  ;;  %v4133_v41 = vmax.f32 %v4069_v20, %v4101_v47  ;;  %v4008_v45 = vld [vmem:[#allocation3 + $0x38] sm:$0xff]  ;;  %5609 = vmatprep.mubr.msk.f32.mxu1 %vm225_vm1, %v3131_v61  ;;  %3521 = vst.msk [vmem:[#allocation2 + $0x19a] sm:$0xff] %vm225_vm1, %v3131_v61 }
 0x227   : > { %v4039_v4 = vld [vmem:[#allocation3 + $0x31] sm:$0xff]  ;;  %v4196_v29 = vmax.f32 %v4132_v39, %v4164_v2  ;;  %v4040_v6 = vld [vmem:[#allocation3 + $0x39] sm:$0xff]  ;;  %3522 = vst.msk [vmem:[#allocation2 + $0x1a2] sm:$0xff] %vm225_vm1, %v3132_v25  ;;  %5610 = vmatmul.mubr.msk.f32.gmra.mrb[14].mxu1 %vm225_vm1, %v3132_v25  ;;  %v3868_v1 = vld [vmem:[#allocation2 + $0xa8] sm:$0xff] }
 0x228   : > { %v4071_v46 = vmax.f32 %v4007_v33, %v4039_v4  ;;  %v3894_v36 = vld [vmem:[#allocation2 + $0x178] sm:$0xf]  ;;  %v8077_v42 = vld [vmem:[#allocation2 + $0x170] sm:$0xff]  ;;  %v4259_v21 = vmax.f32 %v4195_v3, %v4227_v53  ;;  %v4072_v58 = vmax.f32 %v4008_v45, %v4040_v6  ;;  %v4229_v51 = vld [vmem:[#allocation3 + $0x1c] sm:$0xff]  ;;  %v3916_v18 = vmax.f32 %v3820_v8, %v3868_v1 }
 0x229   : > { %v4165_v7 = vld [vmem:[#allocation3 + $0x1b] sm:$0xff]  ;;  %v3942_v28 = vmax.f32 %v3846_v35, %v3894_v36  ;;  %v3848_v60 = vmax.f32 %v8068_v62, %v8077_v42  ;;  %v3662_v50 = vmax.f32 %v8052_v54, %v8077_v42  ;;  %v4103_v12 = vld [vmem:[#allocation3 + $0x32] sm:$0xff]  ;;  %v3755_v37 = vmax.f32 %v3659_v19, %v8077_v42  ;;  %v3536_v3 = vld [vmem:[#allocation2 + $0x68] sm:$0xff] }
 0x22a   : > { %v4167_v49 = vld [vmem:[#allocation3 + $0x33] sm:$0xff]  ;;  %5614 = vmatprep.mubr.msk.f32.mxu1 %vm225_vm1, %v4259_v21  ;;  %v4197_v52 = vmax.f32 %v4133_v41, %v4165_v7  ;;  %v4135_v26 = vmax.f32 %v4071_v46, %v4103_v12  ;;  %v4260_v13 = vmax.f32 %v4196_v29, %v4228_v63  ;;  %v4168_v10 = vld [vmem:[#allocation3 + $0x3b] sm:$0xff]  ;;  %v3823_v57 = vmax.f32 %v8075_v48, %v3868_v1  ;;  %v3896_v31 = vld [vmem:[#allocation2 + $0x188] sm:$0xff] }
 0x22b   : > { %v4104_v44 = vld [vmem:[#allocation3 + $0x3a] sm:$0xff]  ;;  %v4010_v30 = vld [vmem:[#allocation3 + $0x50] sm:$0xff]  ;;  %3990 = vst.msk [vmem:[#allocation3 + $0x118] sm:$0xf] %vm228_vm2, %v3942_v28  ;;  %v3730_v16 = vmax.f32 %v3634_v11, %v3868_v1  ;;  %v3944_v33 = vmax.f32 %v3848_v60, %v3896_v31  ;;  %v3665_v61 = vmax.f32 %v8077_v42, %v3896_v31  ;;  %v3758_v19 = vmax.f32 %v3662_v50, %v3896_v31  ;;  %v3609_v15 = vld [vmem:[#allocation2 + $0x148] sm:$0xf] }
 0x22c   : > { %v4136_v43 = vmax.f32 %v4072_v58, %v4104_v44  ;;  %v4042_v35 = vld [vmem:[#allocation3 + $0x51] sm:$0xff]  ;;  %v4232_v0 = vld [vmem:[#allocation3 + $0x3c] sm:$0xff]  ;;  %v4261_v14 = vmax.f32 %v4197_v52, %v4229_v51  ;;  %v4199_v59 = vmax.f32 %v4135_v26, %v4167_v49  ;;  %5615 = vmatmul.mubr.msk.f32.vlgmr.msra.gmra.mrb[16].mxu1 %vm225_vm1, %v4260_v13  ;;  %3964 = vst.msk [vmem:[#allocation3 + $0x48] sm:$0xff] %vm225_vm1, %v3916_v18  ;;  %v3872_v49 = vld [vmem:[#allocation2 + $0xc8] sm:$0xff] }
 0x22d   : > { %v3570_v55 = vld [vmem:[#allocation2 + $0x178] sm:$0xf]  ;;  %v4074_v62 = vmax.f32 %v4010_v30, %v4042_v35  ;;  %v3618_v32 = vld [vmem:[#allocation2 + $0x190] sm:$0xf]  ;;  %v3584_v2 = vld [vmem:[#allocation2 + $0x80] sm:$0xff]  ;;  %v3851_v4 = vmax.f32 %v3755_v37, %v3896_v31  ;;  %3992 = vst.msk [vmem:[#allocation3 + $0x128] sm:$0xff] %vm225_vm1, %v3944_v33 }
 0x22e   : > { %v4231_v17 = vld [vmem:[#allocation3 + $0x34] sm:$0xff]  ;;  %v4200_v39 = vmax.f32 %v4136_v43, %v4168_v10  ;;  %v3666_v25 = vmax.f32 %v3570_v55, %v3618_v32  ;;  %5617 = vmatprep.mubr.msk.f32.mxu1 %vm225_vm1, %v4261_v14  ;;  %v3871_v45 = vld [vmem:[#allocation2 + $0xc0] sm:$0xff]  ;;  %v3714_v36 = vld [vmem:[#allocation2 + $0x1a8] sm:$0xf]  ;;  %v3632_v63 = vmax.f32 %v3536_v3, %v3584_v2 }
 0x22f   : > { %v4106_v20 = vld [vmem:[#allocation3 + $0x52] sm:$0xff]  ;;  %v4263_v53 = vmax.f32 %v4199_v59, %v4231_v17  ;;  %v3713_v48 = vld [vmem:[#allocation2 + $0x1a0] sm:$0xff]  ;;  %v3919_v7 = vmax.f32 %v3823_v57, %v3871_v45  ;;  %v3826_v11 = vmax.f32 %v3730_v16, %v3871_v45  ;;  %v3556_v45 = vld [vmem:[#allocation2 + $0x108] sm:$0xff] }
 0x230   : > { %v3680_v47 = vld [vmem:[#allocation2 + $0x98] sm:$0xff]  ;;  %v4264_v29 = vmax.f32 %v4200_v39, %v4232_v0  ;;  %v4138_v41 = vmax.f32 %v4074_v62, %v4106_v20  ;;  %v3776_v46 = vld [vmem:[#allocation2 + $0xb0] sm:$0xff]  ;;  %v3810_v21 = vld [vmem:[#allocation2 + $0x1c0] sm:$0xf]  ;;  %v3761_v28 = vmax.f32 %v3665_v61, %v3713_v48  ;;  %v3762_v60 = vmax.f32 %v3666_v25, %v3714_v36  ;;  %5618 = vmatmul.mubr.msk.f32.gmra.mrb[18].mxu1 %vm225_vm1, %v8082_v34 }
 0x231   : > { %v3874_v6 = vld [vmem:[#allocation2 + $0xd8] sm:$0xff]  ;;  %v3635_v58 = vmax.f32 %v3584_v2, %v3680_v47  ;;  %v3854_v50 = vmax.f32 %v3758_v19, %v3713_v48  ;;  %v3947_v51 = vmax.f32 %v3851_v4, %v3713_v48  ;;  %v3728_v37 = vmax.f32 %v3632_v63, %v3680_v47  ;;  %3967 = vst.msk [vmem:[#allocation3 + $0x60] sm:$0xff] %vm225_vm1, %v3919_v7  ;;  %v3875_v26 = vld [vmem:[#allocation2 + $0xe0] sm:$0xff]  ;;  %v3881_v62 = vld [vmem:[#allocation2 + $0x110] sm:$0xff] }
 0x232   : > { %v4170_v12 = vld [vmem:[#allocation3 + $0x53] sm:$0xff]  ;;  %v3922_v43 = vmax.f32 %v3826_v11, %v3874_v6  ;;  %v3857_v1 = vmax.f32 %v3761_v28, %v7963_v23  ;;  %v3858_v30 = vmax.f32 %v3762_v60, %v3810_v21  ;;  %5620 = vmatprep.mubr.msk.f32.mxu1 %vm225_vm1, %v4263_v53  ;;  %v3638_v13 = vmax.f32 %v3680_v47, %v3776_v46  ;;  %v3604_v19 = vld [vmem:[#allocation2 + $0x120] sm:$0xff] }
 0x233   : > { %v3906_v44 = vld [vmem:[#allocation2 + $0x1d8] sm:$0xf]  ;;  %v4202_v8 = vmax.f32 %v4138_v41, %v4170_v12  ;;  %v3731_v52 = vmax.f32 %v3635_v58, %v3776_v46  ;;  %v3950_v35 = vmax.f32 %v3854_v50, %v7963_v23  ;;  %3995 = vst.msk [vmem:[#allocation3 + $0x140] sm:$0xff] %vm225_vm1, %v3947_v51  ;;  %v3824_v34 = vmax.f32 %v3728_v37, %v3776_v46  ;;  %v4009_v32 = vld [vmem:[#allocation3 + $0x48] sm:$0xff]  ;;  %v8116_v20 = vld [vmem:[#allocation2 + $0x150] sm:$0xff] }
 0x234   : > { %v4234_v55 = vld [vmem:[#allocation3 + $0x54] sm:$0xff]  ;;  %3970 = vst.msk [vmem:[#allocation3 + $0x78] sm:$0xff] %vm225_vm1, %v3922_v43  ;;  %v3641_v18 = vmax.f32 %v3776_v46, %v3872_v49  ;;  %v3953_v31 = vmax.f32 %v3857_v1, %v7976_v56  ;;  %v3954_v23 = vmax.f32 %v3858_v30, %v3906_v44  ;;  %v4041_v14 = vld [vmem:[#allocation3 + $0x49] sm:$0xff]  ;;  %v3734_v59 = vmax.f32 %v3638_v13, %v3872_v49  ;;  %v3705_v50 = vld [vmem:[#allocation2 + $0x160] sm:$0xf] }
 0x235   : > { %v8109_v17 = vmax.f32 %v4202_v8, %v4234_v55  ;;  %v3827_v10 = vmax.f32 %v3731_v52, %v3872_v49  ;;  %v3878_v0 = vld [vmem:[#allocation2 + $0xf8] sm:$0xff]  ;;  %3998 = vst.msk [vmem:[#allocation3 + $0x158] sm:$0xff] %vm225_vm1, %v3950_v35  ;;  %v3644_v39 = vmax.f32 %v3872_v49, %v3875_v26  ;;  %5621 = vmatmul.mubr.msk.f32.gmra.mrb[20].mxu1 %vm225_vm1, %v4264_v29  ;;  %v4105_v56 = vld [vmem:[#allocation3 + $0x4a] sm:$0xff]  ;;  %v3612_v51 = vld [vmem:[#allocation2 + $0x160] sm:$0xf] }
 0x236   : > { %v8112_v57 = vld [vmem:[#allocation2 + $0x138] sm:$0xff]  ;;  %v4073_v16 = vmax.f32 %v4009_v32, %v4041_v14  ;;  %v3920_v33 = vmax.f32 %v3824_v34, %v3872_v49  ;;  %v3737_v25 = vmax.f32 %v3641_v18, %v3875_v26  ;;  %4002 = vst.msk [vmem:[#allocation3 + $0x178] sm:$0xf] %vm228_vm2, %v3954_v23  ;;  %v3830_v3 = vmax.f32 %v3734_v59, %v3875_v26  ;;  %v4169_v6 = vld [vmem:[#allocation3 + $0x4b] sm:$0xff]  ;;  %v8145_v37 = vld [vmem:[#allocation2 + $0x180] sm:$0xff] }
 0x237   : > { %v3923_v61 = vmax.f32 %v3827_v10, %v3875_v26  ;;  %4001 = vst.msk [vmem:[#allocation3 + $0x170] sm:$0xff] %vm225_vm1, %v3953_v31  ;;  %v3740_v2 = vmax.f32 %v3644_v39, %v3878_v0  ;;  %v3647_v47 = vmax.f32 %v3875_v26, %v3878_v0  ;;  %v3934_v4 = vmax.f32 %v3838_v38, %v8112_v57  ;;  %v3561_v11 = vld [vmem:[#allocation2 + $0x130] sm:$0xf]  ;;  %v8143_v8 = vld [vmem:[#allocation2 + $0x168] sm:$0xff]  ;;  %v3801_v26 = vld [vmem:[#allocation2 + $0x178] sm:$0xf] }
 0x238   : > { %v4137_v53 = vmax.f32 %v4073_v16, %v4105_v56  ;;  %3968 = vst.msk [vmem:[#allocation3 + $0x68] sm:$0xff] %vm225_vm1, %v3920_v33  ;;  %v3833_v29 = vmax.f32 %v3737_v25, %v3878_v0  ;;  %v3650_v41 = vmax.f32 %v3878_v0, %v3881_v62  ;;  %v3937_v46 = vmax.f32 %v3841_v40, %v8116_v20  ;;  %v4233_v5 = vld [vmem:[#allocation3 + $0x4c] sm:$0xff]  ;;  %v3564_v55 = vld [vmem:[#allocation2 + $0x148] sm:$0xf]  ;;  %v3708_v13 = vld [vmem:[#allocation2 + $0x178] sm:$0xf] }
 0x239   : > { %3971 = vst.msk [vmem:[#allocation3 + $0x80] sm:$0xff] %vm225_vm1, %v3923_v61  ;;  %v3926_v48 = vmax.f32 %v3830_v3, %v3878_v0  ;;  %v3836_v36 = vmax.f32 %v3740_v2, %v3881_v62  ;;  %v3743_v21 = vmax.f32 %v3647_v47, %v3881_v62  ;;  %3982 = vst.msk [vmem:[#allocation3 + $0xd8] sm:$0xff] %vm225_vm1, %v3934_v4  ;;  %v3897_v18 = vld [vmem:[#allocation2 + $0x190] sm:$0xf]  ;;  %v3900_v59 = vld [vmem:[#allocation2 + $0x1a8] sm:$0xf] }
 0x23a   : > { %v3652_v22 = vmax.f32 %v3556_v45, %v3604_v19  ;;  %v4201_v38 = vmax.f32 %v4137_v53, %v4169_v6  ;;  %v3929_v63 = vmax.f32 %v3833_v29, %v3881_v62  ;;  %v3746_v7 = vmax.f32 %v3650_v41, %v8024_v24  ;;  %3985 = vst.msk [vmem:[#allocation3 + $0xf0] sm:$0xff] %vm225_vm1, %v3937_v46  ;;  %v3804_v31 = vld [vmem:[#allocation2 + $0x190] sm:$0xf]  ;;  %v3615_v39 = vld [vmem:[#allocation2 + $0x178] sm:$0xf] }
 0x23b   : > { %v3653_v58 = vmax.f32 %v3881_v62, %v8024_v24  ;;  %3974 = vst.msk [vmem:[#allocation3 + $0x98] sm:$0xff] %vm225_vm1, %v3926_v48  ;;  %v3932_v9 = vmax.f32 %v3836_v36, %v8024_v24  ;;  %v3839_v40 = vmax.f32 %v3743_v21, %v8024_v24  ;;  %v3655_v60 = vmax.f32 %v3604_v19, %v8112_v57  ;;  %v4011_v24 = vld [vmem:[#allocation3 + $0x60] sm:$0xff]  ;;  %v8156_v62 = vld [vmem:[#allocation2 + $0x198] sm:$0xff]  ;;  %v4015_v47 = vld [vmem:[#allocation3 + $0x90] sm:$0xff] }
 0x23c   : > { %v3748_v28 = vmax.f32 %v3652_v22, %v8112_v57  ;;  %v4265_v12 = vmax.f32 %v4201_v38, %v4233_v5  ;;  %3977 = vst.msk [vmem:[#allocation3 + $0xb0] sm:$0xff] %vm225_vm1, %v3929_v63  ;;  %v3842_v49 = vmax.f32 %v3746_v7, %v8026_v27  ;;  %v3657_v52 = vmax.f32 %v3561_v11, %v3609_v15  ;;  %v4013_v25 = vld [vmem:[#allocation3 + $0x78] sm:$0xff]  ;;  %v3567_v29 = vld [vmem:[#allocation2 + $0x160] sm:$0xf]  ;;  %v3711_v41 = vld [vmem:[#allocation2 + $0x190] sm:$0xf] }
 0x23d   : > { %v3749_v44 = vmax.f32 %v3653_v58, %v8026_v27  ;;  %3980 = vst.msk [vmem:[#allocation3 + $0xc8] sm:$0xff] %vm225_vm1, %v3932_v9  ;;  %v3935_v43 = vmax.f32 %v3839_v40, %v8026_v27  ;;  %v3751_v30 = vmax.f32 %v3655_v60, %v8116_v20  ;;  %v3658_v35 = vmax.f32 %v8112_v57, %v8116_v20  ;;  %v3807_v21 = vld [vmem:[#allocation2 + $0x1a8] sm:$0xf]  ;;  %v3903_v5 = vld [vmem:[#allocation2 + $0x1c0] sm:$0xf] }
 0x23e   : > { %v3844_v1 = vmax.f32 %v3748_v28, %v8116_v20  ;;  %5623 = vmatprep.mubr.msk.f32.mxu1 %vm225_vm1, %v4265_v12  ;;  %v3938_v34 = vmax.f32 %v3842_v49, %v8052_v54  ;;  %v3753_v0 = vmax.f32 %v3657_v52, %v3705_v50  ;;  %v3660_v27 = vmax.f32 %v3564_v55, %v3612_v51  ;;  %v4017_v51 = vld [vmem:[#allocation3 + $0xa8] sm:$0xff] }
 0x23f   : > { %v3845_v10 = vmax.f32 %v3749_v44, %v8052_v54  ;;  %5624 = vmatmul.mubr.msk.f32.gmra.mrb[22].mxu1 %vm225_vm1, %v8109_v17  ;;  %v4043_v23 = vld [vmem:[#allocation3 + $0x61] sm:$0xff]  ;;  %3983 = vst.msk [vmem:[#allocation3 + $0xe0] sm:$0xff] %vm225_vm1, %v3935_v43  ;;  %v3847_v32 = vmax.f32 %v3751_v30, %v8143_v8  ;;  %v3754_v14 = vmax.f32 %v3658_v35, %v8143_v8  ;;  %v4044_v61 = vld [vmem:[#allocation3 + $0x69] sm:$0xff] }
 0x240   : > { %v3940_v57 = vmax.f32 %v3844_v1, %v8143_v8  ;;  %v3661_v54 = vmax.f32 %v8116_v20, %v8143_v8  ;;  %v4075_v16 = vmax.f32 %v4011_v24, %v4043_v23  ;;  %v4012_v33 = vld [vmem:[#allocation3 + $0x68] sm:$0xff]  ;;  %3986 = vst.msk [vmem:[#allocation3 + $0xf8] sm:$0xff] %vm225_vm1, %v3938_v34  ;;  %v3849_v19 = vmax.f32 %v3753_v0, %v3801_v26  ;;  %v4045_v6 = vld [vmem:[#allocation3 + $0x79] sm:$0xff]  ;;  %v6034_v1 = vld [vmem:[#allocation2 + $0x1b0] sm:$0xff] }
 0x241   : > { %v3941_v17 = vmax.f32 %v3845_v10, %v8077_v42  ;;  %v3756_v56 = vmax.f32 %v3660_v27, %v3708_v13  ;;  %v4107_v3 = vld [vmem:[#allocation3 + $0x62] sm:$0xff]  ;;  %v4076_v2 = vmax.f32 %v4012_v33, %v4044_v61  ;;  %v3943_v4 = vmax.f32 %v3847_v32, %v8145_v37  ;;  %v4108_v45 = vld [vmem:[#allocation3 + $0x6a] sm:$0xff]  ;;  %v4109_v60 = vld [vmem:[#allocation3 + $0x7a] sm:$0xff] }
 0x242   : > { %3988 = vst.msk [vmem:[#allocation3 + $0x108] sm:$0xff] %vm225_vm1, %v3940_v57  ;;  %v3850_v20 = vmax.f32 %v3754_v14, %v8145_v37  ;;  %v3757_v53 = vmax.f32 %v3661_v54, %v8145_v37  ;;  %v4139_v46 = vmax.f32 %v4075_v16, %v4107_v3  ;;  %v3945_v42 = vmax.f32 %v3849_v19, %v3897_v18  ;;  %v4171_v22 = vld [vmem:[#allocation3 + $0x63] sm:$0xff]  ;;  %v4172_v28 = vld [vmem:[#allocation3 + $0x6b] sm:$0xff]  ;;  %v4173_v13 = vld [vmem:[#allocation3 + $0x7b] sm:$0xff] }
 0x243   : > { %3989 = vst.msk [vmem:[#allocation3 + $0x110] sm:$0xff] %vm225_vm1, %v3941_v17  ;;  %v3852_v48 = vmax.f32 %v3756_v56, %v3804_v31  ;;  %v3663_v36 = vmax.f32 %v3567_v29, %v3615_v39  ;;  %v4140_v15 = vmax.f32 %v4076_v2, %v4108_v45  ;;  %v4077_v38 = vmax.f32 %v4013_v25, %v4045_v6  ;;  %v4014_v63 = vld [vmem:[#allocation3 + $0x80] sm:$0xff]  ;;  %v4236_v52 = vld [vmem:[#allocation3 + $0x6c] sm:$0xff]  ;;  %v4016_v0 = vld [vmem:[#allocation3 + $0x98] sm:$0xff] }
 0x244   : > { %v4046_v7 = vld [vmem:[#allocation3 + $0x81] sm:$0xff]  ;;  %3991 = vst.msk [vmem:[#allocation3 + $0x120] sm:$0xff] %vm225_vm1, %v3943_v4  ;;  %v3946_v58 = vmax.f32 %v3850_v20, %v8156_v62  ;;  %v3853_v11 = vmax.f32 %v3757_v53, %v8156_v62  ;;  %v4203_v9 = vmax.f32 %v4139_v46, %v4171_v22  ;;  %v4047_v43 = vld [vmem:[#allocation3 + $0x91] sm:$0xff]  ;;  %v3664_v35 = vmax.f32 %v8143_v8, %v8145_v37  ;;  %v4048_v18 = vld [vmem:[#allocation3 + $0x99] sm:$0xff] }
 0x245   : > { %v4235_v40 = vld [vmem:[#allocation3 + $0x64] sm:$0xff]  ;;  %v4078_v50 = vmax.f32 %v4014_v63, %v4046_v7  ;;  %3993 = vst.msk [vmem:[#allocation3 + $0x130] sm:$0xf] %vm228_vm2, %v3945_v42  ;;  %v3948_v12 = vmax.f32 %v3852_v48, %v3900_v59  ;;  %v3759_v49 = vmax.f32 %v3663_v36, %v3711_v41  ;;  %v4204_v44 = vmax.f32 %v4140_v15, %v4172_v28  ;;  %v4111_v32 = vld [vmem:[#allocation3 + $0x92] sm:$0xff]  ;;  %v4237_v8 = vld [vmem:[#allocation3 + $0x7c] sm:$0xff] }
 0x246   : > { %v4141_v26 = vmax.f32 %v4077_v38, %v4109_v60  ;;  %v4110_v24 = vld [vmem:[#allocation3 + $0x82] sm:$0xff]  ;;  %3994 = vst.msk [vmem:[#allocation3 + $0x138] sm:$0xff] %vm225_vm1, %v3946_v58  ;;  %v3949_v30 = vmax.f32 %v3853_v11, %v6034_v1  ;;  %v4267_v55 = vmax.f32 %v4203_v9, %v4235_v40  ;;  %v4079_v10 = vmax.f32 %v4015_v47, %v4047_v43  ;;  %v4112_v16 = vld [vmem:[#allocation3 + $0x9a] sm:$0xff]  ;;  %v4018_v3 = vld [vmem:[#allocation3 + $0xb0] sm:$0xff] }
 0x247   : > { %v4142_v34 = vmax.f32 %v4078_v50, %v4110_v24  ;;  %3996 = vst.msk [vmem:[#allocation3 + $0x148] sm:$0xf] %vm228_vm2, %v3948_v12  ;;  %v3855_v27 = vmax.f32 %v3759_v49, %v3807_v21  ;;  %v4268_v31 = vmax.f32 %v4204_v44, %v4236_v52  ;;  %v4174_v57 = vld [vmem:[#allocation3 + $0x83] sm:$0xff]  ;;  %v4080_v14 = vmax.f32 %v4016_v0, %v4048_v18  ;;  %v4175_v17 = vld [vmem:[#allocation3 + $0x93] sm:$0xff]  ;;  %v4177_v15 = vld [vmem:[#allocation3 + $0xab] sm:$0xff] }
 0x248   : > { %v4205_v23 = vmax.f32 %v4141_v26, %v4173_v13  ;;  %v4019_v59 = vld [vmem:[#allocation3 + $0xc0] sm:$0xff]  ;;  %3997 = vst.msk [vmem:[#allocation3 + $0x150] sm:$0xff] %vm225_vm1, %v3949_v30  ;;  %v3760_v54 = vmax.f32 %v3664_v35, %v8156_v62  ;;  %5626 = vmatprep.mubr.msk.f32.mxu1 %vm225_vm1, %v4267_v55  ;;  %v4143_v39 = vmax.f32 %v4079_v10, %v4111_v32  ;;  %v4049_v33 = vld [vmem:[#allocation3 + $0xa9] sm:$0xff]  ;;  %v4050_v2 = vld [vmem:[#allocation3 + $0xb1] sm:$0xff] }
 0x249   : > { %v4206_v37 = vmax.f32 %v4142_v34, %v4174_v57  ;;  %v3951_v61 = vmax.f32 %v3855_v27, %v3903_v5  ;;  %5627 = vmatmul.mubr.msk.f32.gmra.mrb[24].mxu1 %vm225_vm1, %v4268_v31  ;;  %v4144_v19 = vmax.f32 %v4080_v14, %v4112_v16  ;;  %v4081_v56 = vmax.f32 %v4017_v51, %v4049_v33  ;;  %v4238_v4 = vld [vmem:[#allocation3 + $0x84] sm:$0xff]  ;;  %v4176_v62 = vld [vmem:[#allocation3 + $0x9b] sm:$0xff]  ;;  %v4114_v42 = vld [vmem:[#allocation3 + $0xb2] sm:$0xff] }
 0x24a   : > { %v4269_v25 = vmax.f32 %v4205_v23, %v4237_v8  ;;  %v3856_v47 = vmax.f32 %v3760_v54, %v6034_v1  ;;  %v4207_v20 = vmax.f32 %v4143_v39, %v4175_v17  ;;  %v4113_v53 = vld [vmem:[#allocation3 + $0xaa] sm:$0xff]  ;;  %v4082_v29 = vmax.f32 %v4018_v3, %v4050_v2  ;;  %v4239_v46 = vld [vmem:[#allocation3 + $0x94] sm:$0xff]  ;;  %v4051_v48 = vld [vmem:[#allocation3 + $0xc1] sm:$0xff] }
 0x24b   : > { %3999 = vst.msk [vmem:[#allocation3 + $0x160] sm:$0xf] %vm228_vm2, %v3951_v61  ;;  %v4270_v41 = vmax.f32 %v4206_v37, %v4238_v4  ;;  %v4208_v45 = vmax.f32 %v4144_v19, %v4176_v62  ;;  %v4145_v6 = vmax.f32 %v4081_v56, %v4113_v53  ;;  %v6035_v36 = vld [vmem:[#allocation2 + $0x1c8] sm:$0xff]  ;;  %v4083_v63 = vmax.f32 %v4019_v59, %v4051_v48  ;;  %v4240_v11 = vld [vmem:[#allocation3 + $0x9c] sm:$0xff]  ;;  %v4178_v9 = vld [vmem:[#allocation3 + $0xb3] sm:$0xff] }
 0x24c   : > { %5629 = vmatprep.mubr.msk.f32.mxu1 %vm225_vm1, %v4269_v25  ;;  %v3952_v21 = vmax.f32 %v3856_v47, %v6035_v36  ;;  %v4271_v22 = vmax.f32 %v4207_v20, %v4239_v46  ;;  %v4146_v38 = vmax.f32 %v4082_v29, %v4114_v42  ;;  %v4020_v7 = vld [vmem:[#allocation3 + $0xc8] sm:$0xff]  ;;  %v4021_v51 = vld [vmem:[#allocation3 + $0xd8] sm:$0xff]  ;;  %v4022_v1 = vld [vmem:[#allocation3 + $0xe0] sm:$0xff] }
 0x24d   : > { %v4052_v58 = vld [vmem:[#allocation3 + $0xc9] sm:$0xff]  ;;  %5630 = vmatmul.mubr.msk.f32.gmra.mrb[26].mxu1 %vm225_vm1, %v4270_v41  ;;  %v4209_v5 = vmax.f32 %v4145_v6, %v4177_v15  ;;  %v4053_v12 = vld [vmem:[#allocation3 + $0xd9] sm:$0xff]  ;;  %v4272_v49 = vmax.f32 %v4208_v45, %v4240_v11  ;;  %v4054_v34 = vld [vmem:[#allocation3 + $0xe1] sm:$0xff] }
 0x24e   : > { %v4115_v40 = vld [vmem:[#allocation3 + $0xc2] sm:$0xff]  ;;  %v4084_v28 = vmax.f32 %v4020_v7, %v4052_v58  ;;  %4000 = vst.msk [vmem:[#allocation3 + $0x168] sm:$0xff] %vm225_vm1, %v3952_v21  ;;  %5632 = vmatprep.mubr.msk.f32.mxu1 %vm225_vm1, %v4271_v22  ;;  %v4116_v50 = vld [vmem:[#allocation3 + $0xca] sm:$0xff]  ;;  %v4210_v52 = vmax.f32 %v4146_v38, %v4178_v9  ;;  %v4085_v43 = vmax.f32 %v4021_v51, %v4053_v12  ;;  %v4242_v35 = vld [vmem:[#allocation3 + $0xb4] sm:$0xff] }
 0x24f   : > { %v4147_v60 = vmax.f32 %v4083_v63, %v4115_v40  ;;  %v4241_v44 = vld [vmem:[#allocation3 + $0xac] sm:$0xff]  ;;  %v4179_v26 = vld [vmem:[#allocation3 + $0xc3] sm:$0xff]  ;;  %v4117_v13 = vld [vmem:[#allocation3 + $0xda] sm:$0xff]  ;;  %v4086_v18 = vmax.f32 %v4022_v1, %v4054_v34 }
 0x250   : > { %v4148_v24 = vmax.f32 %v4084_v28, %v4116_v50  ;;  %v4273_v30 = vmax.f32 %v4209_v5, %v4241_v44  ;;  %v4243_v10 = vld [vmem:[#allocation3 + $0xc4] sm:$0xff]  ;;  %v4149_v0 = vmax.f32 %v4085_v43, %v4117_v13  ;;  %v4023_v27 = vld [vmem:[#allocation3 + $0xf0] sm:$0xff]  ;;  %v4181_v57 = vld [vmem:[#allocation3 + $0xdb] sm:$0xff]  ;;  %v4274_v59 = vmax.f32 %v4210_v52, %v4242_v35 }
 0x251   : > { %v4211_v55 = vmax.f32 %v4147_v60, %v4179_v26  ;;  %5633 = vmatmul.mubr.msk.f32.gmra.mrb[28].mxu1 %vm225_vm1, %v4272_v49  ;;  %v4055_v31 = vld [vmem:[#allocation3 + $0xf1] sm:$0xff]  ;;  %v4118_v32 = vld [vmem:[#allocation3 + $0xe2] sm:$0xff]  ;;  %v4056_v16 = vld [vmem:[#allocation3 + $0xf9] sm:$0xff] }
 0x252   : > { %5635 = vmatprep.mubr.msk.f32.mxu1 %vm225_vm1, %v4273_v30  ;;  %v4180_v23 = vld [vmem:[#allocation3 + $0xcb] sm:$0xff]  ;;  %v4087_v14 = vmax.f32 %v4023_v27, %v4055_v31  ;;  %v4150_v8 = vmax.f32 %v4086_v18, %v4118_v32  ;;  %v4024_v39 = vld [vmem:[#allocation3 + $0xf8] sm:$0xff]  ;;  %v4213_v61 = vmax.f32 %v4149_v0, %v4181_v57  ;;  %v4182_v3 = vld [vmem:[#allocation3 + $0xe3] sm:$0xff] }
 0x253   : > { %v4212_v54 = vmax.f32 %v4148_v24, %v4180_v23  ;;  %v4119_v37 = vld [vmem:[#allocation3 + $0xf2] sm:$0xff]  ;;  %v4275_v33 = vmax.f32 %v4211_v55, %v4243_v10  ;;  %v4088_v17 = vmax.f32 %v4024_v39, %v4056_v16  ;;  %v4025_v19 = vld [vmem:[#allocation3 + $0x108] sm:$0xff]  ;;  %v4120_v47 = vld [vmem:[#allocation3 + $0xfa] sm:$0xff] }
 0x254   : > { %v4151_v25 = vmax.f32 %v4087_v14, %v4119_v37  ;;  %v4244_v56 = vld [vmem:[#allocation3 + $0xcc] sm:$0xff]  ;;  %v4245_v29 = vld [vmem:[#allocation3 + $0xdc] sm:$0xff]  ;;  %v4214_v41 = vmax.f32 %v4150_v8, %v4182_v3  ;;  %v4246_v63 = vld [vmem:[#allocation3 + $0xe4] sm:$0xff] }
 0x255   : > { %5636 = vmatmul.mubr.msk.f32.gmra.mrb[30].mxu1 %vm225_vm1, %v4274_v59  ;;  %v4057_v2 = vld [vmem:[#allocation3 + $0x109] sm:$0xff]  ;;  %v4058_v62 = vld [vmem:[#allocation3 + $0x111] sm:$0xff]  ;;  %v4276_v53 = vmax.f32 %v4212_v54, %v4244_v56  ;;  %v4152_v45 = vmax.f32 %v4088_v17, %v4120_v47  ;;  %v4277_v48 = vmax.f32 %v4213_v61, %v4245_v29  ;;  %v4027_v22 = vld [vmem:[#allocation3 + $0x120] sm:$0xff] }
 0x256   : > { %5638 = vmatprep.mubr.msk.f32.mxu1 %vm225_vm1, %v4275_v33  ;;  %v4089_v4 = vmax.f32 %v4025_v19, %v4057_v2  ;;  %v4026_v20 = vld [vmem:[#allocation3 + $0x110] sm:$0xff]  ;;  %v4059_v15 = vld [vmem:[#allocation3 + $0x121] sm:$0xff]  ;;  %v4278_v28 = vmax.f32 %v4214_v41, %v4246_v63  ;;  %v4029_v49 = vld [vmem:[#allocation3 + $0x138] sm:$0xff] }
 0x257   : > { %v4183_v46 = vld [vmem:[#allocation3 + $0xf3] sm:$0xff]  ;;  %v4121_v6 = vld [vmem:[#allocation3 + $0x10a] sm:$0xff]  ;;  %v4090_v42 = vmax.f32 %v4026_v20, %v4058_v62  ;;  %v4091_v58 = vmax.f32 %v4027_v22, %v4059_v15  ;;  %v4184_v5 = vld [vmem:[#allocation3 + $0xfb] sm:$0xff] }
 0x258   : > { %v4215_v36 = vmax.f32 %v4151_v25, %v4183_v46  ;;  %v4153_v21 = vmax.f32 %v4089_v4, %v4121_v6  ;;  %v4028_v38 = vld [vmem:[#allocation3 + $0x128] sm:$0xff]  ;;  %v4247_v7 = vld [vmem:[#allocation3 + $0xf4] sm:$0xff]  ;;  %v4216_v60 = vmax.f32 %v4152_v45, %v4184_v5  ;;  %v4030_v1 = vld [vmem:[#allocation3 + $0x140] sm:$0xff] }
 0x259   : > { %5639 = vmatmul.mubr.msk.f32.gmra.mrb[0].mxu1 %vm225_vm1, %v4276_v53  ;;  %v4060_v11 = vld [vmem:[#allocation3 + $0x129] sm:$0xff]  ;;  %v4122_v40 = vld [vmem:[#allocation3 + $0x112] sm:$0xff]  ;;  %v4062_v30 = vld [vmem:[#allocation3 + $0x141] sm:$0xff] }
 0x25a   : > { %5641 = vmatprep.mubr.msk.f32.mxu1 %vm225_vm1, %v4277_v48  ;;  %v4185_v9 = vld [vmem:[#allocation3 + $0x10b] sm:$0xff]  ;;  %v4154_v50 = vmax.f32 %v4090_v42, %v4122_v40  ;;  %v4123_v51 = vld [vmem:[#allocation3 + $0x122] sm:$0xff]  ;;  %v4092_v12 = vmax.f32 %v4028_v38, %v4060_v11  ;;  %v4061_v44 = vld [vmem:[#allocation3 + $0x139] sm:$0xff]  ;;  %v4279_v52 = vmax.f32 %v4215_v36, %v4247_v7  ;;  %v4094_v32 = vmax.f32 %v4030_v1, %v4062_v30 }
 0x25b   : > { %v4217_v26 = vmax.f32 %v4153_v21, %v4185_v9  ;;  %v4155_v24 = vmax.f32 %v4091_v58, %v4123_v51  ;;  %v4093_v43 = vmax.f32 %v4029_v49, %v4061_v44  ;;  %v4248_v35 = vld [vmem:[#allocation3 + $0xfc] sm:$0xff]  ;;  %v4186_v55 = vld [vmem:[#allocation3 + $0x113] sm:$0xff]  ;;  %v4124_v13 = vld [vmem:[#allocation3 + $0x12a] sm:$0xff] }
 0x25c   : > { %v4031_v34 = vld [vmem:[#allocation3 + $0x150] sm:$0xff]  ;;  %v4280_v0 = vmax.f32 %v4216_v60, %v4248_v35  ;;  %v4218_v27 = vmax.f32 %v4154_v50, %v4186_v55  ;;  %v4187_v31 = vld [vmem:[#allocation3 + $0x123] sm:$0xff]  ;;  %v4156_v23 = vmax.f32 %v4092_v12, %v4124_v13  ;;  %v4125_v57 = vld [vmem:[#allocation3 + $0x13a] sm:$0xff] }
 0x25d   : > { %5642 = vmatmul.mubr.msk.f32.gmra.mrb[2].mxu1 %vm225_vm1, %v4278_v28  ;;  %v4063_v10 = vld [vmem:[#allocation3 + $0x151] sm:$0xff]  ;;  %v4219_v59 = vmax.f32 %v4155_v24, %v4187_v31  ;;  %v4157_v54 = vmax.f32 %v4093_v43, %v4125_v57  ;;  %v4064_v39 = vld [vmem:[#allocation3 + $0x159] sm:$0xff]  ;;  %v4033_v16 = vld [vmem:[#allocation3 + $0x168] sm:$0xff] }
 0x25e   : > { %5644 = vmatprep.mubr.msk.f32.mxu1 %vm225_vm1, %v4279_v52  ;;  %v4249_v18 = vld [vmem:[#allocation3 + $0x10c] sm:$0xff]  ;;  %v4095_v8 = vmax.f32 %v4031_v34, %v4063_v10  ;;  %v4032_v37 = vld [vmem:[#allocation3 + $0x158] sm:$0xff]  ;;  %v4126_v17 = vld [vmem:[#allocation3 + $0x142] sm:$0xff] }
 0x25f   : > { %v4281_v14 = vmax.f32 %v4217_v26, %v4249_v18  ;;  %v4065_v33 = vld [vmem:[#allocation3 + $0x169] sm:$0xff]  ;;  %v4250_v61 = vld [vmem:[#allocation3 + $0x114] sm:$0xff]  ;;  %v4158_v47 = vmax.f32 %v4094_v32, %v4126_v17  ;;  %v4096_v20 = vmax.f32 %v4032_v37, %v4064_v39  ;;  %v4253_v21 = vld [vmem:[#allocation3 + $0x13c] sm:$0xff] }
 0x260   : > { %v4188_v25 = vld [vmem:[#allocation3 + $0x12b] sm:$0xff]  ;;  %v4282_v19 = vmax.f32 %v4218_v27, %v4250_v61  ;;  %v4189_v2 = vld [vmem:[#allocation3 + $0x13b] sm:$0xff]  ;;  %v4097_v41 = vmax.f32 %v4033_v16, %v4065_v33  ;;  %v4190_v42 = vld [vmem:[#allocation3 + $0x143] sm:$0xff] }
 0x261   : > { %5645 = vmatmul.mubr.msk.f32.gmra.mrb[4].mxu1 %vm225_vm1, %v4280_v0  ;;  %v4251_v56 = vld [vmem:[#allocation3 + $0x124] sm:$0xff]  ;;  %v4220_v3 = vmax.f32 %v4156_v23, %v4188_v25  ;;  %v4127_v4 = vld [vmem:[#allocation3 + $0x152] sm:$0xff]  ;;  %v4221_v53 = vmax.f32 %v4157_v54, %v4189_v2  ;;  %v4128_v48 = vld [vmem:[#allocation3 + $0x15a] sm:$0xff]  ;;  %v4222_v22 = vmax.f32 %v4158_v47, %v4190_v42 }
 0x262   : > { %5647 = vmatprep.mubr.msk.f32.mxu1 %vm225_vm1, %v4281_v14  ;;  %v4283_v62 = vmax.f32 %v4219_v59, %v4251_v56  ;;  %v4159_v29 = vmax.f32 %v4095_v8, %v4127_v4  ;;  %v4034_v46 = vld [vmem:[#allocation3 + $0x170] sm:$0xff]  ;;  %v4160_v38 = vmax.f32 %v4096_v20, %v4128_v48  ;;  %v4254_v9 = vld [vmem:[#allocation3 + $0x144] sm:$0xff]  ;;  %v4192_v40 = vld [vmem:[#allocation3 + $0x15b] sm:$0xff] }
 0x263   : > { %v4066_v45 = vld [vmem:[#allocation3 + $0x171] sm:$0xff]  ;;  %v4285_v58 = vmax.f32 %v4221_v53, %v4253_v21  ;;  %v4286_v60 = vmax.f32 %v4222_v22, %v4254_v9  ;;  %v4256_v26 = vld [vmem:[#allocation3 + $0x15c] sm:$0xff] }
 0x264   : > { %v4252_v6 = vld [vmem:[#allocation3 + $0x12c] sm:$0xff]  ;;  %v4098_v7 = vmax.f32 %v4034_v46, %v4066_v45  ;;  %v4255_v50 = vld [vmem:[#allocation3 + $0x154] sm:$0xff]  ;;  %v4224_v51 = vmax.f32 %v4160_v38, %v4192_v40 }
 0x265   : > { %5648 = vmatmul.mubr.msk.f32.gmra.mrb[6].mxu1 %vm225_vm1, %v4282_v19  ;;  %v4284_v36 = vmax.f32 %v4220_v3, %v4252_v6  ;;  %v4191_v15 = vld [vmem:[#allocation3 + $0x153] sm:$0xff]  ;;  %v4129_v63 = vld [vmem:[#allocation3 + $0x16a] sm:$0xff]  ;;  %v8260_v6 = vld [vmem:[%s8524_s4] ss:$0 sm:$0xff] }
 0x266   : > { %5650 = vmatprep.mubr.msk.f32.mxu1 %vm225_vm1, %v4283_v62  ;;  %v4223_v11 = vmax.f32 %v4159_v29, %v4191_v15  ;;  %v4161_v5 = vmax.f32 %v4097_v41, %v4129_v63  ;;  %v4130_v28 = vld [vmem:[#allocation3 + $0x172] sm:$0xff]  ;;  %v4288_v43 = vmax.f32 %v4224_v51, %v4256_v26 }
 0x267   : > { %v4193_v12 = vld [vmem:[#allocation3 + $0x16b] sm:$0xff]  ;;  %v4162_v49 = vmax.f32 %v4098_v7, %v4130_v28  ;;  %v4194_v24 = vld [vmem:[#allocation3 + $0x173] sm:$0xff] }
 0x268   : > { %v4287_v44 = vmax.f32 %v4223_v11, %v4255_v50  ;;  %v4225_v52 = vmax.f32 %v4161_v5, %v4193_v12  ;;  %v4257_v1 = vld [vmem:[#allocation3 + $0x16c] sm:$0xff]  ;;  %v4258_v55 = vld [vmem:[#allocation3 + $0x174] sm:$0xff] }
 0x269   : > { %5651 = vmatmul.mubr.msk.f32.gmra.mrb[8].mxu1 %vm225_vm1, %v4284_v36  ;;  %v4226_v30 = vmax.f32 %v4162_v49, %v4194_v24 }
 0x26a   : > { %5653 = vmatprep.mubr.msk.f32.mxu1 %vm225_vm1, %v4285_v58  ;;  %v4289_v35 = vmax.f32 %v4225_v52, %v4257_v1 }
 0x26b   : > { %v4290_v13 = vmax.f32 %v4226_v30, %v4258_v55 }
 0x26d   : > { %5654 = vmatmul.mubr.msk.f32.gmra.mrb[10].mxu1 %vm225_vm1, %v4286_v60 }
 0x26e   : > { %5656 = vmatprep.mubr.msk.f32.mxu1 %vm225_vm1, %v4287_v44 }
 0x271   : > { %5657 = vmatmul.mubr.msk.f32.gmra.mrb[12].mxu1 %vm225_vm1, %v4288_v43 }
 0x272   : > { %5659 = vmatprep.mubr.msk.f32.mxu1 %vm225_vm1, %v4289_v35  ;;  %v8209_v34 = vpop.f32.mrb[48].mxu0 }
 0x273   : > { %v8211_v10 = vpop.f32.mrb[49].mxu0 }
 0x275   : > { %5660 = vmatmul.mubr.msk.f32.gmra.mrb[14].mxu1 %vm225_vm1, %v4290_v13 }
 0x277   : > { %v8213_v0 = vpop.f32.mrb[50].mxu0 }
 0x278   : > { %v8215_v18 = vpop.f32.mrb[51].mxu0 }
 0x27b   : > { %v8217_v27 = vpop.f32.mrb[52].mxu0 }
 0x27c   : > { %v8219_v31 = vpop.f32.mrb[53].mxu0 }
 0x28c   : > { %v8221_v23 = vpop.f32.mrb[54].mxu0 }
 0x28d   : > { %v8223_v57 = vpop.f32.mrb[55].mxu0 }
 0x291   : > { %v8225_v32 = vpop.f32.mrb[56].mxu0 }
 0x292   : > { %v8227_v14 = vpop.f32.mrb[57].mxu0 }
 0x296   : > { %v8229_v59 = vpop.f32.mrb[58].mxu0 }
 0x297   : > { %v8231_v54 = vpop.f32.mrb[59].mxu0 }
 0x2ac   : > { %v8233_v8 = vpop.f32.mrb[60].mxu0 }
 0x2ad   : > { %v8235_v37 = vpop.f32.mrb[61].mxu0 }
 0x2cc   : > { %v8237_v39 = vpop.f32.mrb[62].mxu0 }
 0x2cd   : > { %v8239_v16 = vpop.f32.mrb[63].mxu0 }
 0x2d3   : > { %v5516_v33 = vpop.f32.mrb[32].mxu0 }
 0x2d4   : > { %v2174_v61 = vpop.f32.mrb[33].mxu0 }
 0x2d7   : > { %v5519_v25 = vpop.f32.mrb[34].mxu0 }
 0x2d8   : > { %v2184_v17 = vpop.f32.mrb[35].mxu0 }
 0x2de   : > { %v5522_v19 = vpop.f32.mrb[36].mxu0 }
 0x2df   : > { %v2194_v56 = vpop.f32.mrb[37].mxu0 }
 0x2e3   : > { %v5525_v3 = vpop.f32.mrb[38].mxu0 }
 0x2e4   : > { %v2204_v2 = vpop.f32.mrb[39].mxu0 }
 0x2e8   : > { %v8241_v47 = vpop.f32.mrb[40].mxu0 }
 0x2e9   : > { %v8243_v4 = vpop.f32.mrb[41].mxu0 }
 0x2ec   : > { %v8245_v20 = vpop.f32.mrb[42].mxu0 }
 0x2ed   : > { %v8247_v62 = vpop.f32.mrb[43].mxu0 }
 0x2f4   : > { %v8249_v53 = vpop.f32.mrb[44].mxu0 }
 0x2f5   : > { %v8251_v29 = vpop.f32.mrb[45].mxu0 }
 0x2f8   : > { %v8253_v41 = vpop.f32.mrb[46].mxu0 }
 0x2f9   : > { %v8255_v46 = vpop.f32.mrb[47].mxu0 }
 0x2ff   : > { %v5616_v45 = vpop.f32.mrb[16].mxu1 }
 0x300   : > { %v5664_v42 = vadd.f32 %v5616_v45, %v5516_v33  ;;  %v4458_v48 = vpop.f32.mrb[17].mxu1 }
 0x301   : > { %v5665_v36 = vadd.f32 %v4458_v48, %v2174_v61 }
 0x302   : > { %v8263_v21 = vadd.f32 %v5664_v42, %v8260_v6 }
 0x303   : > { %v8266_v22 = vadd.f32 %v5665_v36, %v8260_v6  ;;  %v5619_v15 = vpop.f32.mrb[18].mxu1 }
 0x304   : > { %v5212_v38 = vmul.f32 -1.442695, %v8263_v21  ;;  %v5666_v63 = vadd.f32 %v5619_v15, %v5519_v25  ;;  %v4468_v7 = vpop.f32.mrb[19].mxu1 }
 0x305   : > { %v5211_v58 = vmul.f32 -1.442695, %v8266_v22  ;;  %v5667_v11 = vadd.f32 %v4468_v7, %v2184_v17 }
 0x306   : > { %5897 = vpow2.f32 %v5212_v38  ;;  %v8271_v5 = vadd.f32 %v5666_v63, %v8260_v6 }
 0x307   : > { %5899 = vpow2.f32 %v5211_v58  ;;  %v8274_v9 = vadd.f32 %v5667_v11, %v8260_v6 }
 0x308   : > { %v5622_v40 = vpop.f32.mrb[20].mxu1  ;;  %v5214_v28 = vmul.f32 -1.442695, %v8271_v5 }
 0x309   : > { %v5668_v60 = vadd.f32 %v5622_v40, %v5522_v19  ;;  %v4478_v50 = vpop.f32.mrb[21].mxu1  ;;  %v5213_v51 = vmul.f32 -1.442695, %v8274_v9 }
 0x30a   : > { %v5669_v12 = vadd.f32 %v4478_v50, %v2194_v56  ;;  %5901 = vpow2.f32 %v5214_v28 }
 0x30b   : > { %v8279_v49 = vadd.f32 %v5668_v60, %v8260_v6  ;;  %5903 = vpow2.f32 %v5213_v51 }
 0x30c   : > { %v8282_v44 = vadd.f32 %v5669_v12, %v8260_v6 }
 0x30d   : > { %v5216_v52 = vmul.f32 -1.442695, %v8279_v49 }
 0x30e   : > { %v5215_v26 = vmul.f32 -1.442695, %v8282_v44 }
 0x30f   : > { %5905 = vpow2.f32 %v5216_v52 }
 0x310   : > { %5907 = vpow2.f32 %v5215_v26  ;;  %v5898_v24 = vpop.eup %5897 }
 0x311   : > { %v5900_v1 = vpop.eup %5899  ;;  %v4785_v30 = vadd.f32 1.0, %v5898_v24 }
 0x312   : > { %v5625_v43 = vpop.f32.mrb[22].mxu1  ;;  %v4784_v13 = vadd.f32 1.0, %v5900_v1 }
 0x313   : > { %v5670_v35 = vadd.f32 %v5625_v43, %v5525_v3  ;;  %v4488_v55 = vpop.f32.mrb[23].mxu1  ;;  %5909 = vrcp.f32 %v4785_v30 }
 0x314   : > { %v5671_v33 = vadd.f32 %v4488_v55, %v2204_v2  ;;  %v5902_v25 = vpop.eup %5901  ;;  %5911 = vrcp.f32 %v4784_v13 }
 0x315   : > { %v8287_v61 = vadd.f32 %v5670_v35, %v8260_v6  ;;  %v5904_v19 = vpop.eup %5903  ;;  %v4787_v56 = vadd.f32 1.0, %v5902_v25 }
 0x316   : > { %v8290_v17 = vadd.f32 %v5671_v33, %v8260_v6  ;;  %v4786_v42 = vadd.f32 1.0, %v5904_v19 }
 0x317   : > { %v5218_v45 = vmul.f32 -1.442695, %v8287_v61  ;;  %5913 = vrcp.f32 %v4787_v56 }
 0x318   : > { %v5217_v48 = vmul.f32 -1.442695, %v8290_v17  ;;  %5915 = vrcp.f32 %v4786_v42 }
 0x319   : > { %v5906_v3 = vpop.eup %5905  ;;  %5917 = vpow2.f32 %v5218_v45 }
 0x31a   : > { %v5908_v2 = vpop.eup %5907  ;;  %v4789_v36 = vadd.f32 1.0, %v5906_v3  ;;  %5919 = vpow2.f32 %v5217_v48 }
 0x31b   : > { %v4788_v15 = vadd.f32 1.0, %v5908_v2 }
 0x31c   : > { %v5628_v38 = vpop.f32.mrb[24].mxu1  ;;  %5921 = vrcp.f32 %v4789_v36 }
 0x31d   : > { %v5672_v63 = vadd.f32 %v5628_v38, %v8241_v47  ;;  %v4498_v7 = vpop.f32.mrb[25].mxu1  ;;  %5923 = vrcp.f32 %v4788_v15  ;;  %v5910_v11 = vpop.eup %5909 }
 0x31e   : > { %v5673_v58 = vadd.f32 %v4498_v7, %v8243_v4  ;;  %v5912_v28 = vpop.eup %5911  ;;  %v4881_v47 = vmul.f32 %v5910_v11, %v8263_v21 }
 0x31f   : > { %v8304_v40 = vadd.f32 %v5672_v63, %v8260_v6  ;;  %v4880_v50 = vmul.f32 %v5912_v28, %v8266_v22 }
 0x320   : > { %v8308_v60 = vadd.f32 %v5673_v58, %v8260_v6  ;;  %v5631_v4 = vpop.f32.mrb[26].mxu1  ;;  %4914 = vst.msk [vmem:[%s8301_s21 + $0x8] sm:$0xff] %vm4912_vm5, %v4881_v47 }
 0x321   : > { %v5220_v51 = vmul.f32 -1.442695, %v8304_v40  ;;  %v5674_v12 = vadd.f32 %v5631_v4, %v8245_v20  ;;  %v4508_v52 = vpop.f32.mrb[27].mxu1  ;;  %v5914_v43 = vpop.eup %5913  ;;  %4913 = vst.msk [vmem:[%s8301_s21] sm:$0xff] %vm4912_vm5, %v4880_v50 }
 0x322   : > { %v5219_v26 = vmul.f32 -1.442695, %v8308_v60  ;;  %v5675_v24 = vadd.f32 %v4508_v52, %v8247_v62  ;;  %v5916_v22 = vpop.eup %5915  ;;  %v4883_v1 = vmul.f32 %v5914_v43, %v8271_v5 }
 0x323   : > { %5925 = vpow2.f32 %v5220_v51  ;;  %v8320_v21 = vadd.f32 %v5674_v12, %v8260_v6  ;;  %v5918_v35 = vpop.eup %5917  ;;  %v4882_v62 = vmul.f32 %v5916_v22, %v8274_v9 }
 0x324   : > { %5927 = vpow2.f32 %v5219_v26  ;;  %v8324_v20 = vadd.f32 %v5675_v24, %v8260_v6  ;;  %v5634_v30 = vpop.f32.mrb[28].mxu1  ;;  %v5920_v25 = vpop.eup %5919  ;;  %4916 = vst.msk [vmem:[%s8301_s21 + $0x18] sm:$0xff] %vm4912_vm5, %v4883_v1  ;;  %v4791_v19 = vadd.f32 1.0, %v5918_v35 }
 0x325   : > { %v5222_v55 = vmul.f32 -1.442695, %v8320_v21  ;;  %v5676_v13 = vadd.f32 %v5634_v30, %v8249_v53  ;;  %v4518_v33 = vpop.f32.mrb[29].mxu1  ;;  %4915 = vst.msk [vmem:[%s8301_s21 + $0x10] sm:$0xff] %vm4912_vm5, %v4882_v62  ;;  %v4790_v42 = vadd.f32 1.0, %v5920_v25 }
 0x326   : > { %v5221_v56 = vmul.f32 -1.442695, %v8324_v20  ;;  %v5677_v5 = vadd.f32 %v4518_v33, %v8251_v29  ;;  %v5922_v45 = vpop.eup %5921 }
 0x327   : > { %5929 = vpow2.f32 %v5222_v55  ;;  %v8336_v9 = vadd.f32 %v5676_v13, %v8260_v6  ;;  %v5924_v53 = vpop.eup %5923  ;;  %v4885_v48 = vmul.f32 %v5922_v45, %v8279_v49 }
 0x328   : > { %5931 = vrcp.f32 %v4791_v19  ;;  %v8340_v3 = vadd.f32 %v5677_v5, %v8260_v6  ;;  %v5637_v2 = vpop.f32.mrb[30].mxu1  ;;  %v4884_v29 = vmul.f32 %v5924_v53, %v8282_v44 }
 0x329   : > { %5933 = vrcp.f32 %v4790_v42  ;;  %v5224_v36 = vmul.f32 -1.442695, %v8336_v9  ;;  %v5678_v15 = vadd.f32 %v5637_v2, %v8253_v41  ;;  %v4528_v38 = vpop.f32.mrb[31].mxu1  ;;  %4918 = vst.msk [vmem:[%s8301_s21 + $0x28] sm:$0xff] %vm4912_vm5, %v4885_v48 }
 0x32a   : > { %5935 = vpow2.f32 %v5221_v56  ;;  %v5223_v63 = vmul.f32 -1.442695, %v8340_v3  ;;  %v5679_v49 = vadd.f32 %v4528_v38, %v8255_v46  ;;  %4917 = vst.msk [vmem:[%s8301_s21 + $0x20] sm:$0xff] %vm4912_vm5, %v4884_v29 }
 0x32b   : > { %5937 = vpow2.f32 %v5224_v36  ;;  %v8352_v7 = vadd.f32 %v5678_v15, %v8260_v6 }
 0x32c   : > { %5939 = vpow2.f32 %v5223_v63  ;;  %v8355_v44 = vadd.f32 %v5679_v49, %v8260_v6  ;;  %v5640_v58 = vpop.f32.mrb[0].mxu1 }
 0x32d   : > { %v5926_v41 = vpop.eup %5925  ;;  %v5226_v11 = vmul.f32 -1.442695, %v8352_v7  ;;  %v5680_v28 = vadd.f32 %v5640_v58, %v8209_v34  ;;  %v4538_v47 = vpop.f32.mrb[1].mxu1 }
 0x32e   : > { %v5928_v4 = vpop.eup %5927  ;;  %v4793_v50 = vadd.f32 1.0, %v5926_v41  ;;  %v5225_v46 = vmul.f32 -1.442695, %v8355_v44  ;;  %v5681_v51 = vadd.f32 %v4538_v47, %v8211_v10 }
 0x32f   : > { %v4792_v12 = vadd.f32 1.0, %v5928_v4  ;;  %5941 = vpow2.f32 %v5226_v11  ;;  %v8362_v52 = vadd.f32 %v5680_v28, %v8260_v6 }
 0x330   : > { %5943 = vrcp.f32 %v4793_v50  ;;  %v8365_v26 = vadd.f32 %v5681_v51, %v8260_v6  ;;  %v5643_v24 = vpop.f32.mrb[2].mxu1 }
 0x331   : > { %v5930_v43 = vpop.eup %5929  ;;  %5945 = vrcp.f32 %v4792_v12  ;;  %v5228_v34 = vmul.f32 -1.442695, %v8362_v52  ;;  %v5682_v22 = vadd.f32 %v5643_v24, %v8213_v0  ;;  %v4548_v1 = vpop.f32.mrb[3].mxu1 }
 0x332   : > { %v5932_v30 = vpop.eup %5931  ;;  %v4795_v10 = vadd.f32 1.0, %v5930_v43  ;;  %5947 = vpow2.f32 %v5225_v46  ;;  %v5227_v35 = vmul.f32 -1.442695, %v8365_v26  ;;  %v5683_v62 = vadd.f32 %v4548_v1, %v8215_v18 }
 0x333   : > { %v5934_v55 = vpop.eup %5933  ;;  %v4887_v13 = vmul.f32 %v5932_v30, %v8287_v61  ;;  %5949 = vpow2.f32 %v5228_v34  ;;  %v8373_v33 = vadd.f32 %v5682_v22, %v8260_v6 }
 0x334   : > { %v5936_v25 = vpop.eup %5935  ;;  %v4886_v0 = vmul.f32 %v5934_v55, %v8290_v17  ;;  %5951 = vrcp.f32 %v4795_v10  ;;  %v8377_v19 = vadd.f32 %v5683_v62, %v8260_v6  ;;  %v5646_v56 = vpop.f32.mrb[4].mxu1 }
 0x335   : > { %v5938_v5 = vpop.eup %5937  ;;  %4920 = vst.msk [vmem:[%s8301_s21 + $0x38] sm:$0xff] %vm4912_vm5, %v4887_v13  ;;  %v4794_v18 = vadd.f32 1.0, %v5936_v25  ;;  %5953 = vpow2.f32 %v5227_v35  ;;  %v5684_v45 = vadd.f32 %v5646_v56, %v8217_v27  ;;  %v4558_v61 = vpop.f32.mrb[5].mxu1  ;;  %v5230_v48 = vmul.f32 -1.442695, %v8373_v33 }
 0x336   : > { %v5940_v42 = vpop.eup %5939  ;;  %4919 = vst.msk [vmem:[%s8301_s21 + $0x30] sm:$0xff] %vm4912_vm5, %v4886_v0  ;;  %v4797_v53 = vadd.f32 1.0, %v5938_v5  ;;  %v5685_v17 = vadd.f32 %v4558_v61, %v8219_v31  ;;  %v5229_v29 = vmul.f32 -1.442695, %v8377_v19 }
 0x337   : > { %5955 = vrcp.f32 %v4794_v18  ;;  %v4796_v2 = vadd.f32 1.0, %v5940_v42  ;;  %v8388_v36 = vadd.f32 %v5684_v45, %v8260_v6 }
 0x338   : > { %5957 = vrcp.f32 %v4797_v53  ;;  %v8391_v15 = vadd.f32 %v5685_v17, %v8260_v6  ;;  %v5649_v27 = vpop.f32.mrb[6].mxu1 }
 0x339   : > { %v5942_v38 = vpop.eup %5941  ;;  %5959 = vrcp.f32 %v4796_v2  ;;  %v5232_v63 = vmul.f32 -1.442695, %v8388_v36  ;;  %v5686_v49 = vadd.f32 %v5649_v27, %v8221_v23  ;;  %v4568_v58 = vpop.f32.mrb[7].mxu1 }
 0x33a   : > { %v5944_v31 = vpop.eup %5943  ;;  %v4799_v41 = vadd.f32 1.0, %v5942_v38  ;;  %5961 = vpow2.f32 %v5230_v48  ;;  %v5231_v11 = vmul.f32 -1.442695, %v8391_v15  ;;  %v5687_v28 = vadd.f32 %v4568_v58, %v8223_v57 }
 0x33b   : > { %v5946_v47 = vpop.eup %5945  ;;  %v4889_v4 = vmul.f32 %v5944_v31, %v8304_v40  ;;  %5963 = vpow2.f32 %v5229_v29  ;;  %v8399_v50 = vadd.f32 %v5686_v49, %v8260_v6 }
 0x33c   : > { %v5948_v46 = vpop.eup %5947  ;;  %v4888_v23 = vmul.f32 %v5946_v47, %v8308_v60  ;;  %5965 = vrcp.f32 %v4799_v41  ;;  %v8403_v51 = vadd.f32 %v5687_v28, %v8260_v6  ;;  %v5652_v12 = vpop.f32.mrb[8].mxu1 }
 0x33d   : > { %v5950_v24 = vpop.eup %5949  ;;  %4922 = vst.msk [vmem:[%s8301_s21 + $0x48] sm:$0xff] %vm4912_vm5, %v4889_v4  ;;  %v4798_v57 = vadd.f32 1.0, %v5948_v46  ;;  %5967 = vpow2.f32 %v5232_v63  ;;  %v5234_v40 = vmul.f32 -1.442695, %v8399_v50  ;;  %v5688_v43 = vadd.f32 %v5652_v12, %v8225_v32  ;;  %v4578_v34 = vpop.f32.mrb[9].mxu1 }
 0x33e   : > { %v5952_v22 = vpop.eup %5951  ;;  %4921 = vst.msk [vmem:[%s8301_s21 + $0x40] sm:$0xff] %vm4912_vm5, %v4888_v23  ;;  %v4801_v60 = vadd.f32 1.0, %v5950_v24  ;;  %5969 = vpow2.f32 %v5231_v11  ;;  %v5689_v1 = vadd.f32 %v4578_v34, %v8227_v14  ;;  %v5233_v35 = vmul.f32 -1.442695, %v8403_v51 }
 0x33f   : > { %v5954_v30 = vpop.eup %5953  ;;  %v4891_v10 = vmul.f32 %v5952_v22, %v8320_v21  ;;  %5971 = vrcp.f32 %v4798_v57  ;;  %v8415_v62 = vadd.f32 %v5688_v43, %v8260_v6 }
 0x340   : > { %5973 = vrcp.f32 %v4801_v60  ;;  %v4800_v32 = vadd.f32 1.0, %v5954_v30  ;;  %v8418_v55 = vadd.f32 %v5689_v1, %v8260_v6  ;;  %v5655_v13 = vpop.f32.mrb[10].mxu1 }
 0x341   : > { %v5956_v25 = vpop.eup %5955  ;;  %4924 = vst.msk [vmem:[%s8301_s21 + $0x58] sm:$0xff] %vm4912_vm5, %v4891_v10  ;;  %5975 = vpow2.f32 %v5234_v40  ;;  %v5236_v14 = vmul.f32 -1.442695, %v8415_v62  ;;  %v5690_v21 = vadd.f32 %v5655_v13, %v8229_v59  ;;  %v4588_v0 = vpop.f32.mrb[11].mxu1 }
 0x342   : > { %v5958_v56 = vpop.eup %5957  ;;  %v4890_v5 = vmul.f32 %v5956_v25, %v8324_v20  ;;  %5977 = vrcp.f32 %v4800_v32  ;;  %v5235_v18 = vmul.f32 -1.442695, %v8418_v55  ;;  %v5691_v45 = vadd.f32 %v4588_v0, %v8231_v54 }
 0x343   : > { %v5960_v61 = vpop.eup %5959  ;;  %v4893_v42 = vmul.f32 %v5958_v56, %v8336_v9  ;;  %5979 = vpow2.f32 %v5233_v35  ;;  %v8429_v53 = vadd.f32 %v5690_v21, %v8260_v6 }
 0x344   : > { %v5962_v48 = vpop.eup %5961  ;;  %4923 = vst.msk [vmem:[%s8301_s21 + $0x50] sm:$0xff] %vm4912_vm5, %v4890_v5  ;;  %v4892_v59 = vmul.f32 %v5960_v61, %v8340_v3  ;;  %5981 = vpow2.f32 %v5236_v14  ;;  %v8435_v20 = vadd.f32 %v5691_v45, %v8260_v6  ;;  %v5658_v17 = vpop.f32.mrb[12].mxu1 }
 0x345   : > { %v5964_v2 = vpop.eup %5963  ;;  %4926 = vst.msk [vmem:[%s8301_s21 + $0x68] sm:$0xff] %vm4912_vm5, %v4893_v42  ;;  %v4803_v54 = vadd.f32 1.0, %v5962_v48  ;;  %5983 = vpow2.f32 %v5235_v18  ;;  %v5238_v9 = vmul.f32 -1.442695, %v8429_v53  ;;  %v5692_v29 = vadd.f32 %v5658_v17, %v8233_v8  ;;  %v4598_v27 = vpop.f32.mrb[13].mxu1 }
 0x346   : > { %v5966_v38 = vpop.eup %5965  ;;  %4925 = vst.msk [vmem:[%s8301_s21 + $0x60] sm:$0xff] %vm4912_vm5, %v4892_v59  ;;  %v4802_v3 = vadd.f32 1.0, %v5964_v2  ;;  %v5693_v63 = vadd.f32 %v4598_v27, %v8235_v37  ;;  %v5237_v8 = vmul.f32 -1.442695, %v8435_v20 }
 0x347   : > { %v5968_v49 = vpop.eup %5967  ;;  %v4895_v58 = vmul.f32 %v5966_v38, %v8352_v7  ;;  %5985 = vrcp.f32 %v4803_v54  ;;  %v8446_v31 = vadd.f32 %v5692_v29, %v8260_v6 }
 0x348   : > { %v5970_v41 = vpop.eup %5969  ;;  %5987 = vrcp.f32 %v4802_v3  ;;  %v4805_v11 = vadd.f32 1.0, %v5968_v49  ;;  %v8450_v28 = vadd.f32 %v5693_v63, %v8260_v6  ;;  %v5661_v47 = vpop.f32.mrb[14].mxu1 }
 0x349   : > { %v5972_v4 = vpop.eup %5971  ;;  %4928 = vst.msk [vmem:[%s8301_s21 + $0x78] sm:$0xff] %vm4912_vm5, %v4895_v58  ;;  %v4804_v37 = vadd.f32 1.0, %v5970_v41  ;;  %5989 = vpow2.f32 %v5238_v9  ;;  %v5240_v7 = vmul.f32 -1.442695, %v8446_v31  ;;  %v5694_v46 = vadd.f32 %v5661_v47, %v8237_v39  ;;  %v4608_v23 = vpop.f32.mrb[15].mxu1 }
 0x34a   : > { %v5974_v12 = vpop.eup %5973  ;;  %v4894_v24 = vmul.f32 %v5972_v4, %v8355_v44  ;;  %5991 = vrcp.f32 %v4805_v11  ;;  %v5695_v57 = vadd.f32 %v4608_v23, %v8239_v16  ;;  %v5239_v34 = vmul.f32 -1.442695, %v8450_v28 }
 0x34b   : > { %v5976_v40 = vpop.eup %5975  ;;  %v4897_v43 = vmul.f32 %v5974_v12, %v8362_v52  ;;  %5993 = vrcp.f32 %v4804_v37  ;;  %v8461_v22 = vadd.f32 %v5694_v46, %v8260_v6 }
 0x34c   : > { %v5978_v60 = vpop.eup %5977  ;;  %4927 = vst.msk [vmem:[%s8301_s21 + $0x70] sm:$0xff] %vm4912_vm5, %v4894_v24  ;;  %v4807_v39 = vadd.f32 1.0, %v5976_v40  ;;  %5995 = vpow2.f32 %v5237_v8  ;;  %v8466_v44 = vadd.f32 %v5695_v57, %v8260_v6 }
 0x34d   : > { %v5980_v1 = vpop.eup %5979  ;;  %4930 = vst.msk [vmem:[%s8301_s21 + $0x88] sm:$0xff] %vm4912_vm5, %v4897_v43  ;;  %v4896_v16 = vmul.f32 %v5978_v60, %v8365_v26  ;;  %5997 = vpow2.f32 %v5240_v7  ;;  %v5242_v32 = vmul.f32 -1.442695, %v8461_v22 }
 0x34e   : > { %v5982_v52 = vpop.eup %5981  ;;  %5999 = vrcp.f32 %v4807_v39  ;;  %v4806_v30 = vadd.f32 1.0, %v5980_v1  ;;  %v5241_v13 = vmul.f32 -1.442695, %v8466_v44 }
 0x34f   : > { %v5984_v10 = vpop.eup %5983  ;;  %4929 = vst.msk [vmem:[%s8301_s21 + $0x80] sm:$0xff] %vm4912_vm5, %v4896_v16  ;;  %v4809_v35 = vadd.f32 1.0, %v5982_v52  ;;  %6001 = vpow2.f32 %v5239_v34 }
 0x350   : > { %6003 = vrcp.f32 %v4806_v30  ;;  %v4808_v6 = vadd.f32 1.0, %v5984_v10 }
 0x351   : > { %v5986_v25 = vpop.eup %5985  ;;  %6005 = vrcp.f32 %v4809_v35 }
 0x352   : > { %v5988_v26 = vpop.eup %5987  ;;  %v4899_v14 = vmul.f32 %v5986_v25, %v8373_v33  ;;  %6007 = vrcp.f32 %v4808_v6 }
 0x353   : > { %v5990_v21 = vpop.eup %5989  ;;  %v4898_v0 = vmul.f32 %v5988_v26, %v8377_v19  ;;  %6009 = vpow2.f32 %v5242_v32 }
 0x354   : > { %v5992_v56 = vpop.eup %5991  ;;  %4932 = vst.msk [vmem:[%s8301_s21 + $0x98] sm:$0xff] %vm4912_vm5, %v4899_v14  ;;  %v4811_v5 = vadd.f32 1.0, %v5990_v21  ;;  %6011 = vpow2.f32 %v5241_v13 }
 0x355   : > { %v5994_v18 = vpop.eup %5993  ;;  %4931 = vst.msk [vmem:[%s8301_s21 + $0x90] sm:$0xff] %vm4912_vm5, %v4898_v0  ;;  %v4901_v45 = vmul.f32 %v5992_v56, %v8388_v36 }
 0x356   : > { %v5996_v61 = vpop.eup %5995  ;;  %v4900_v33 = vmul.f32 %v5994_v18, %v8391_v15  ;;  %6013 = vrcp.f32 %v4811_v5 }
 0x357   : > { %v5998_v42 = vpop.eup %5997  ;;  %4934 = vst.msk [vmem:[%s8301_s21 + $0xa8] sm:$0xff] %vm4912_vm5, %v4901_v45  ;;  %v4810_v19 = vadd.f32 1.0, %v5996_v61 }
 0x358   : > { %v6000_v48 = vpop.eup %5999  ;;  %4933 = vst.msk [vmem:[%s8301_s21 + $0xa0] sm:$0xff] %vm4912_vm5, %v4900_v33  ;;  %v4813_v59 = vadd.f32 1.0, %v5998_v42 }
 0x359   : > { %v6002_v17 = vpop.eup %6001  ;;  %v4903_v2 = vmul.f32 %v6000_v48, %v8399_v50  ;;  %6015 = vrcp.f32 %v4810_v19 }
 0x35a   : > { %v6004_v36 = vpop.eup %6003  ;;  %6017 = vrcp.f32 %v4813_v59  ;;  %v4812_v54 = vadd.f32 1.0, %v6002_v17 }
 0x35b   : > { %v6006_v15 = vpop.eup %6005  ;;  %4936 = vst.msk [vmem:[%s8301_s21 + $0xb8] sm:$0xff] %vm4912_vm5, %v4903_v2  ;;  %v4902_v9 = vmul.f32 %v6004_v36, %v8403_v51 }
 0x35c   : > { %v6008_v29 = vpop.eup %6007  ;;  %v4905_v27 = vmul.f32 %v6006_v15, %v8415_v62  ;;  %6019 = vrcp.f32 %v4812_v54 }
 0x35d   : > { %v6010_v38 = vpop.eup %6009  ;;  %4935 = vst.msk [vmem:[%s8301_s21 + $0xb0] sm:$0xff] %vm4912_vm5, %v4902_v9  ;;  %v4904_v50 = vmul.f32 %v6008_v29, %v8418_v55 }
 0x35e   : > { %v6012_v3 = vpop.eup %6011  ;;  %4938 = vst.msk [vmem:[%s8301_s21 + $0xc8] sm:$0xff] %vm4912_vm5, %v4905_v27  ;;  %v4815_v63 = vadd.f32 1.0, %v6010_v38 }
 0x35f   : > { %4937 = vst.msk [vmem:[%s8301_s21 + $0xc0] sm:$0xff] %vm4912_vm5, %v4904_v50  ;;  %v4814_v51 = vadd.f32 1.0, %v6012_v3 }
 0x360   : > { %v6014_v49 = vpop.eup %6013  ;;  %6021 = vrcp.f32 %v4815_v63 }
 0x361   : > { %v4907_v62 = vmul.f32 %v6014_v49, %v8429_v53  ;;  %6023 = vrcp.f32 %v4814_v51 }
 0x363   : > { %v6016_v58 = vpop.eup %6015  ;;  %4940 = vst.msk [vmem:[%s8301_s21 + $0xd8] sm:$0xff] %vm4912_vm5, %v4907_v62 }
 0x364   : > { %v6018_v55 = vpop.eup %6017  ;;  %v4906_v41 = vmul.f32 %v6016_v58, %v8435_v20 }
 0x365   : > { %v4909_v11 = vmul.f32 %v6018_v55, %v8446_v31 }
 0x366   : > { %v6020_v8 = vpop.eup %6019  ;;  %4939 = vst.msk [vmem:[%s8301_s21 + $0xd0] sm:$0xff] %vm4912_vm5, %v4906_v41 }
 0x367   : > { %4942 = vst.msk [vmem:[%s8301_s21 + $0xe8] sm:$0xff] %vm4912_vm5, %v4909_v11  ;;  %v4908_v47 = vmul.f32 %v6020_v8, %v8450_v28 }
 0x369   : > { %4941 = vst.msk [vmem:[%s8301_s21 + $0xe0] sm:$0xff] %vm4912_vm5, %v4908_v47 }
 0x36a   : > { %v6022_v53 = vpop.eup %6021 }
 0x36b   : > { %v6024_v4 = vpop.eup %6023  ;;  %v4911_v37 = vmul.f32 %v6022_v53, %v8461_v22 }
 0x36c   : > { %v4910_v7 = vmul.f32 %v6024_v4, %v8466_v44 }
 0x36d   : > { %4944 = vst.msk [vmem:[%s8301_s21 + $0xf8] sm:$0xff] %vm4912_vm5, %v4911_v37 }
 0x36e   : > { %4943 = vst.msk [vmem:[%s8301_s21 + $0xf0] sm:$0xff] %vm4912_vm5, %v4910_v7 }
 0x36f PF: > { %s15_s18 = sadd.s32 1, %s6042_s18  }
 0x370   : > { %p12_p4 = scmp.ge.s32.totalorder %s15_s18, 4  }
 0x372   :  { %14 = sbr.rel (!%p12_p4) target bundleno = 1 (0x1), region = 77 }

</bundles_post_ra>
